<compile_context>
chip_gen: v7x
topology: tpu7x:2x2x1
jax: 0.10.0
libtpu: 0.0.40
codegen_flags: <defaults>
</compile_context>

<pallas_src>
import functools
import math

import jax
import jax.numpy as jnp
from jax import lax
from jax.experimental import pallas as pl
from jax.experimental.pallas import tpu as pltpu

HIDDEN = 128                         # nn.RNN(hidden_size=128)
KAN_NUM = 5                          # pykan default grid intervals
KAN_K = 3                            # pykan default spline order
KAN_NB = KAN_NUM + KAN_K             # number of B-spline bases = 8
KAN_G = KAN_NUM + 2 * KAN_K + 1      # extended grid points = 12
_H = 2.0 / KAN_NUM                   # grid_range = [-1, 1]
KAN_KNOTS = tuple(float(-1.0 + (i - KAN_K) * _H) for i in range(KAN_G))

# TODO(synk): exact KAN.train_kan.layer_nums_nobi values unknown; first entry
# must be the RNN hidden size (128) and the last must be 1 (sigmoid+squeeze(1)).
LAYER_NUMS_NOBI = (128, 64, 1)

MAX_BATCH_BLOCK = 32                 # rows per batch block (vreg pressure cap,
                                     # and the unit sharded across v7x's 2 TCs)


def _round_up(v, m):
    return -(-v // m) * m


def _vmem_capacity_bytes():
    try:
        return int(pltpu.get_tpu_info().vmem_capacity_bytes)
    except Exception:
        return 64 * 1024 * 1024      # v7x per-TensorCore VMEM (smallest gen)


# ------------------------------ KAN math --------------------------------------
def _kan_apply(x, wbase, wsp_flat, knots, k, precision=None):
    """One KANLayer on a (bb, in_pad) block. knots are compile-time floats."""
    g = knots
    one = jnp.float32(1.0)
    zero = jnp.float32(0.0)
    # order-0 basis (pykan B_batch start)
    basis = [jnp.where((x >= g[i]) & (x < g[i + 1]), one, zero)
             for i in range(len(g) - 1)]
    # Cox-de Boor recursion; uniform extended grid => denominators are nonzero
    # compile-time constants, emitted as reciprocal multiplies (no f32 divides).
    for kk in range(1, k + 1):
        nxt = []
        for i in range(len(basis) - 1):
            inv_l = 1.0 / (g[i + kk] - g[i])
            inv_r = 1.0 / (g[i + kk + 1] - g[i + 1])
            nxt.append((x - g[i]) * inv_l * basis[i]
                       + (g[i + kk + 1] - x) * inv_r * basis[i + 1])
        basis = nxt
    # one K = nb*in_pad matmul instead of nb separate K = in_pad matmuls
    bcat = jnp.concatenate(basis, axis=-1)
    y = jnp.dot(x * jax.nn.sigmoid(x), wbase,
                preferred_element_type=jnp.float32, precision=precision)
    y = y + jnp.dot(bcat, wsp_flat,
                    preferred_element_type=jnp.float32, precision=precision)
    return y


# ------------------------------ fused kernel ----------------------------------
def _fused_kernel(*refs, t_chunk, unroll, n_kan, knots, k):
    xp_ref, wbig_ref, b1_ref = refs[:3]
    kan_refs = refs[3:3 + 2 * n_kan]
    out_ref = refs[3 + 2 * n_kan]
    h1_ref, h2_ref = refs[3 + 2 * n_kan + 1:]

    c = pl.program_id(1)                 # time-chunk index ("arbitrary" axis)
    first_chunk = c == 0

    @pl.when(first_chunk)
    def _init():
        h1_ref[...] = jnp.zeros_like(h1_ref)
        h2_ref[...] = jnp.zeros_like(h2_ref)

    b1 = b1_ref[...]                     # (1, 128); broadcast-added in the loop

    # Skewed recurrence: iteration t computes h1[t] and h2[t-1].  Both depend
    # only on (h1[t-1], h2[t-2]) from the previous iteration, so the single
    # fused (bb,256)x(256,256) matmul + the two tanh's of consecutive steps
    # can overlap on the MXU/EUP.  W_big = [[Whh0, Wih1], [0, Whh1]].
    def step(lt, carry):
        h1_prev, h2_prev = carry                           # h1[t-1], h2[t-2]
        z = jnp.concatenate([h1_prev, h2_prev], axis=-1)   # (bb, 256)
        r = jnp.dot(z, wbig_ref[...], preferred_element_type=jnp.float32)
        h1_cur = jnp.tanh(r[:, :HIDDEN] + xp_ref[lt])      # h1[t]
        h2_cur = jnp.tanh(r[:, HIDDEN:] + b1)              # h2[t-1]
        # at the global first step, "h2[t-1]" is really h0 == 0
        keep = 1.0 - jnp.logical_and(first_chunk, lt == 0).astype(jnp.float32)
        return (h1_cur, h2_cur * keep)

    h1, h2 = lax.fori_loop(0, t_chunk, step, (h1_ref[...], h2_ref[...]),
                           unroll=unroll)
    h1_ref[...] = h1                     # carry (h1[t_end], h2[t_end-1])
    h2_ref[...] = h2                     # across time chunks in VMEM

    @pl.when(c == pl.num_programs(1) - 1)
    def _finish():
        # drain the skew: h2[T-1] = tanh(h1[T-1] @ Wih1 + h2[T-2] @ Whh1 + b1)
        z = jnp.concatenate([h1, h2], axis=-1)
        r = jnp.dot(z, wbig_ref[...], preferred_element_type=jnp.float32)
        y = jnp.tanh(r[:, HIDDEN:] + b1)                   # == output[:, -1, :]
        for j in range(n_kan):
            y = _kan_apply(y, kan_refs[2 * j][...], kan_refs[2 * j + 1][...],
                           knots, k)
        out_ref[...] = jax.nn.sigmoid(y)                   # lane-dense store


# ------------------------------ wrapper ----------------------------------------
def _pick_time_chunk(T, bb, xp_budget_bytes):
    per_step = 2 * bb * HIDDEN * 4       # double-buffered xp rows per time step
    max_t = max(1, xp_budget_bytes // per_step) if xp_budget_bytes > 0 else 1
    best = 1
    for cand in range(1, T + 1):
        if T % cand == 0 and cand <= max_t:
            best = cand
    return best


def rnn_kan_forward(x, params):
    B, T, F = x.shape
    rnn = params["rnn"]
    n_kan = len(params["kan"])
    out_pad = params["kan"][-1]["wbase"].shape[1]

    # batch blocking: sublane-aligned, capped for vreg pressure / v7x TC split
    bb = min(_round_up(B, 8), MAX_BATCH_BLOCK)
    b_pad = _round_up(B, bb)
    num_bb = b_pad // bb

    # -- layer-0 input projection hoisted to XLA (avoids lane-sparse F block) --
    x_t = jnp.transpose(x, (1, 0, 2))                       # (T, B, F)
    if b_pad != B:
        x_t = jnp.pad(x_t, ((0, 0), (0, b_pad - B), (0, 0)))
    xp = jnp.einsum("tbf,fh->tbh", x_t, rnn["wih0_t"],
                    precision=lax.Precision.HIGHEST,
                    preferred_element_type=jnp.float32) + rnn["b0"]

    # -- fused recurrence weight: [[Whh0, Wih1], [0, Whh1]] (256, 256) ---------
    w_big = jnp.zeros((2 * HIDDEN, 2 * HIDDEN), jnp.float32)
    w_big = w_big.at[:HIDDEN, :HIDDEN].set(rnn["whh0_t"])
    w_big = w_big.at[:HIDDEN, HIDDEN:].set(rnn["wih1_t"])
    w_big = w_big.at[HIDDEN:, HIDDEN:].set(rnn["whh1_t"])

    resident_args = [w_big, rnn["b1"]]
    for lp in params["kan"]:
        resident_args += [lp["wbase"], lp["wsp_flat"]]

    # -- VMEM-aware time chunking + explicit vmem limit ------------------------
    weight_bytes = sum(int(a.size) * a.dtype.itemsize for a in resident_args)
    fixed_bytes = (2 * weight_bytes            # resident weights (2x buffered)
                   + 2 * bb * out_pad * 4      # output block
                   + 2 * bb * HIDDEN * 4       # h1/h2 scratch
                   + (2 << 20))                # compiler slack
    vmem_budget = (_vmem_capacity_bytes() * 3) // 4
    t_chunk = _pick_time_chunk(T, bb, vmem_budget - fixed_bytes)
    num_chunks = T // t_chunk
    unroll = max(u for u in (8, 4, 2, 1) if t_chunk % u == 0)

    in_specs = [pl.BlockSpec((t_chunk, bb, HIDDEN), lambda bi, c: (c, bi, 0))]

    def resident(a):
        zeros = (0,) * a.ndim
        return pl.BlockSpec(a.shape, lambda bi, c, _z=zeros: _z)

    in_specs += [resident(a) for a in resident_args]

    kern = functools.partial(_fused_kernel, t_chunk=t_chunk, unroll=unroll,
                             n_kan=n_kan, knots=KAN_KNOTS, k=KAN_K)
    out = pl.pallas_call(
        kern,
        out_shape=jax.ShapeDtypeStruct((b_pad, out_pad), jnp.float32),
        grid=(num_bb, num_chunks),
        in_specs=in_specs,
        out_specs=pl.BlockSpec((bb, out_pad), lambda bi, c: (bi, 0)),
        scratch_shapes=[
            pltpu.VMEM((bb, HIDDEN), jnp.float32),          # h1 carry
            pltpu.VMEM((bb, HIDDEN), jnp.float32),          # h2 carry
        ],
        compiler_params=pltpu.CompilerParams(
            dimension_semantics=("parallel", "arbitrary"),
            vmem_limit_bytes=int(vmem_budget)),
    )(xp, *resident_args)
    # column 0 of the padded lane-dense output == sigmoid(y).squeeze(1)
    return out[:B, 0]


# ------------------------- deterministic parameters ---------------------------
def init_params(key, feature_number):
    assert LAYER_NUMS_NOBI[0] == HIDDEN
    n_kan = len(LAYER_NUMS_NOBI) - 1
    keys = jax.random.split(key, 8 + 2 * n_kan)
    bound = 1.0 / math.sqrt(HIDDEN)

    def u(k, shape):
        return jax.random.uniform(k, shape, jnp.float32, -bound, bound)

    rnn = dict(
        wih0_t=u(keys[0], (feature_number, HIDDEN)),
        whh0_t=u(keys[1], (HIDDEN, HIDDEN)),
        b0=u(keys[2], (1, HIDDEN)) + u(keys[3], (1, HIDDEN)),   # b_ih0 + b_hh0
        wih1_t=u(keys[4], (HIDDEN, HIDDEN)),
        whh1_t=u(keys[5], (HIDDEN, HIDDEN)),
        b1=u(keys[6], (1, HIDDEN)) + u(keys[7], (1, HIDDEN)),   # b_ih1 + b_hh1
    )

    kan = []
    ki = 8
    for i in range(n_kan):
        in_dim, out_dim = LAYER_NUMS_NOBI[i], LAYER_NUMS_NOBI[i + 1]
        in_pad, out_pad = _round_up(in_dim, 128), _round_up(out_dim, 128)
        coef = 0.1 * jax.random.normal(keys[ki], (in_dim, out_dim, KAN_NB),
                                       jnp.float32)
        scale_base = (jax.random.uniform(keys[ki + 1], (in_dim, out_dim),
                                         jnp.float32, -1.0, 1.0)
                      / math.sqrt(in_dim))
        scale_sp = 1.0 / math.sqrt(in_dim)                      # mask == 1
        # base-branch weight (mask*scale_base), zero-padded to 128 multiples
        wbase = (jnp.zeros((in_pad, out_pad), jnp.float32)
                 .at[:in_dim, :out_dim].set(scale_base))
        # spline-branch weight (mask*scale_sp*coef), flattened for one matmul:
        # rows ordered [basis0 x in_pad | basis1 x in_pad | ...]
        wsp = jnp.transpose(coef, (2, 0, 1)) * scale_sp          # (nb, in, out)
        wsp_pad = (jnp.zeros((KAN_NB, in_pad, out_pad), jnp.float32)
                   .at[:, :in_dim, :out_dim].set(wsp))
        kan.append(dict(wbase=wbase,
                        wsp_flat=wsp_pad.reshape(KAN_NB * in_pad, out_pad)))
        ki += 2

    return dict(rnn=rnn, kan=kan)


# -------------------------- pure-JAX reference (f32) ---------------------------
def _reference_forward(x, params):
    rnn = params["rnn"]
    B = x.shape[0]
    hi = lax.Precision.HIGHEST
    xp = jnp.einsum("btf,fh->bth", x, rnn["wih0_t"], precision=hi) + rnn["b0"]

    def cell(carry, xpt):
        h1, h2 = carry
        h1n = jnp.tanh(xpt + jnp.dot(h1, rnn["whh0_t"], precision=hi))
        h2n = jnp.tanh(jnp.dot(h1n, rnn["wih1_t"], precision=hi)
                       + jnp.dot(h2, rnn["whh1_t"], precision=hi) + rnn["b1"])
        return (h1n, h2n), None

    h0 = jnp.zeros((B, HIDDEN), jnp.float32)
    (_, h2), _ = lax.scan(cell, (h0, h0), jnp.transpose(xp, (1, 0, 2)))
    y = h2
    for lp in params["kan"]:
        in_pad = lp["wbase"].shape[0]
        if y.shape[1] != in_pad:
            y = jnp.pad(y, ((0, 0), (0, in_pad - y.shape[1])))
        y = _kan_apply(y, lp["wbase"], lp["wsp_flat"], KAN_KNOTS, KAN_K,
                       precision=hi)
    return jax.nn.sigmoid(y)[:, 0]


if __name__ == "__main__":
    key = jax.random.PRNGKey(0)
    k_x, k_p = jax.random.split(key)

    FEATURE = 4
    BATCH, SEQ = 2, 8
    x = jax.random.normal(k_x, (BATCH, SEQ, FEATURE), jnp.float32)
    params = init_params(k_p, FEATURE)

    fwd = jax.jit(rnn_kan_forward)
    out = jax.block_until_ready(fwd(x, params))

    assert out.shape == (BATCH,), out.shape
    assert bool(jnp.all(jnp.isfinite(out)))
    assert bool(jnp.all((out >= 0.0) & (out <= 1.0)))        # sigmoid output
    ref = jax.block_until_ready(jax.jit(_reference_forward)(x, params))
    assert bool(jnp.allclose(out, ref, atol=5e-3, rtol=1e-3)), (out, ref)
    print("KERNEL_OK")
</pallas_src>

<mosaic_0001>
module attributes {stable_mosaic.version = 11 : i64} {
  func.func @_fused_kernel(%arg0: i32, %arg1: i32, %arg2: memref<8x8x128xf32, #tpu.memory_space<vmem>>, %arg3: memref<256x256xf32, #tpu.memory_space<vmem>>, %arg4: memref<1x128xf32, #tpu.memory_space<vmem>>, %arg5: memref<128x128xf32, #tpu.memory_space<vmem>>, %arg6: memref<1024x128xf32, #tpu.memory_space<vmem>>, %arg7: memref<128x128xf32, #tpu.memory_space<vmem>>, %arg8: memref<1024x128xf32, #tpu.memory_space<vmem>>, %arg9: memref<8x128xf32, #tpu.memory_space<vmem>>, %arg10: memref<8x128xf32, #tpu.memory_space<vmem>>, %arg11: memref<8x128xf32, #tpu.memory_space<vmem>>) attributes {dimension_semantics = [#tpu.dimension_semantics<parallel>, #tpu.dimension_semantics<arbitrary>], iteration_bounds = array<i64: 1, 1>, scalar_prefetch = 0 : i64, scratch_operands = 2 : i64, tpu.core_type = #tpu.core_type<tc>, window_params = [{transform_indices = @transform_0, window_bounds = array<i64: 8, 8, 128>}, {pipeline_mode = #tpu.pipeline_mode<synchronous>, transform_indices = @transform_1, window_bounds = array<i64: 256, 256>}, {pipeline_mode = #tpu.pipeline_mode<synchronous>, transform_indices = @transform_2, window_bounds = array<i64: 1, 128>}, {pipeline_mode = #tpu.pipeline_mode<synchronous>, transform_indices = @transform_3, window_bounds = array<i64: 128, 128>}, {pipeline_mode = #tpu.pipeline_mode<synchronous>, transform_indices = @transform_4, window_bounds = array<i64: 1024, 128>}, {pipeline_mode = #tpu.pipeline_mode<synchronous>, transform_indices = @transform_5, window_bounds = array<i64: 128, 128>}, {pipeline_mode = #tpu.pipeline_mode<synchronous>, transform_indices = @transform_6, window_bounds = array<i64: 1024, 128>}, {transform_indices = @transform_7, window_bounds = array<i64: 8, 128>}]} {
    %c0_i32 = arith.constant 0 : i32
    %0 = arith.cmpi eq, %arg1, %c0_i32 : i32
    %1 = arith.extui %0 : i1 to i32
    %c0_i32_0 = arith.constant 0 : i32
    %2 = arith.cmpi ne, %1, %c0_i32_0 : i32
    scf.if %2 {
      %cst_68 = arith.constant 0.000000e+00 : f32
      %171 = vector.broadcast %cst_68 : f32 to vector<8x128xf32>
      %c0_69 = arith.constant 0 : index
      %c0_70 = arith.constant 0 : index
      %172 = vector.load %arg10[%c0_69, %c0_70] : memref<8x128xf32, #tpu.memory_space<vmem>>, vector<8x128xf32>
      tpu.vector_store %arg10[%c0_69, %c0_70], %171 {strides = array<i32>} : memref<8x128xf32, #tpu.memory_space<vmem>>, vector<8x128xf32>,
      %cst_71 = arith.constant 0.000000e+00 : f32
      %173 = vector.broadcast %cst_71 : f32 to vector<8x128xf32>
      %c0_72 = arith.constant 0 : index
      %c0_73 = arith.constant 0 : index
      %174 = vector.load %arg11[%c0_72, %c0_73] : memref<8x128xf32, #tpu.memory_space<vmem>>, vector<8x128xf32>
      tpu.vector_store %arg11[%c0_72, %c0_73], %173 {strides = array<i32>} : memref<8x128xf32, #tpu.memory_space<vmem>>, vector<8x128xf32>,
    } else {
    }
    %c0 = arith.constant 0 : index
    %c0_1 = arith.constant 0 : index
    %3 = vector.load %arg4[%c0, %c0_1] : memref<1x128xf32, #tpu.memory_space<vmem>>, vector<1x128xf32>
    %c0_2 = arith.constant 0 : index
    %c0_3 = arith.constant 0 : index
    %4 = vector.load %arg10[%c0_2, %c0_3] : memref<8x128xf32, #tpu.memory_space<vmem>>, vector<8x128xf32>
    %c0_4 = arith.constant 0 : index
    %c0_5 = arith.constant 0 : index
    %5 = vector.load %arg11[%c0_4, %c0_5] : memref<8x128xf32, #tpu.memory_space<vmem>>, vector<8x128xf32>
    %c0_i32_6 = arith.constant 0 : i32
    %6 = tpu.concatenate %4, %5 in 1 : vector<8x128xf32>, vector<8x128xf32> -> vector<8x256xf32>
    %c0_7 = arith.constant 0 : index
    %c0_8 = arith.constant 0 : index
    %7 = vector.load %arg3[%c0_7, %c0_8] : memref<256x256xf32, #tpu.memory_space<vmem>>, vector<256x256xf32>
    %cst = arith.constant dense<0.000000e+00> : vector<8x256xf32>
    %8 = tpu.matmul %6, %7, %cst {dimension_numbers = #tpu.dot_dimension_numbers<[1], [0], [0], [1], [0, 0, 1, 1], [], []>} : vector<8x256xf32>, vector<256x256xf32>, vector<8x256xf32> -> vector<8x256xf32>
    %9 = vector.extract_strided_slice %8 {offsets = [0, 0], sizes = [8, 128], strides = [1, 1]} : vector<8x256xf32> to vector<8x128xf32>
    %10 = arith.index_cast %c0_i32_6 : i32 to index
    %c0_9 = arith.constant 0 : index
    %c0_10 = arith.constant 0 : index
    %11 = vector.load %arg2[%10, %c0_9, %c0_10] : memref<8x8x128xf32, #tpu.memory_space<vmem>>, vector<1x8x128xf32>
    %12 = vector.shape_cast %11 : vector<1x8x128xf32> to vector<8x128xf32>
    %13 = arith.addf %9, %12 : vector<8x128xf32>
    %14 = math.tanh %13 : vector<8x128xf32>
    %15 = vector.extract_strided_slice %8 {offsets = [0, 128], sizes = [8, 128], strides = [1, 1]} : vector<8x256xf32> to vector<8x128xf32>
    %16 = vector.broadcast %3 : vector<1x128xf32> to vector<8x128xf32>
    %17 = arith.addf %15, %16 : vector<8x128xf32>
    %18 = math.tanh %17 : vector<8x128xf32>
    %c0_i32_11 = arith.constant 0 : i32
    %19 = arith.cmpi eq, %c0_i32_6, %c0_i32_11 : i32
    %20 = arith.andi %0, %19 : i1
    %21 = arith.extui %20 : i1 to i32
    %22 = arith.sitofp %21 : i32 to f32
    %cst_12 = arith.constant 1.000000e+00 : f32
    %23 = arith.subf %cst_12, %22 : f32
    %24 = vector.broadcast %23 : f32 to vector<8x128xf32>
    %25 = arith.mulf %18, %24 : vector<8x128xf32>
    %c1_i32 = arith.constant 1 : i32
    %26 = tpu.concatenate %14, %25 in 1 : vector<8x128xf32>, vector<8x128xf32> -> vector<8x256xf32>
    %c0_13 = arith.constant 0 : index
    %c0_14 = arith.constant 0 : index
    %27 = vector.load %arg3[%c0_13, %c0_14] : memref<256x256xf32, #tpu.memory_space<vmem>>, vector<256x256xf32>
    %cst_15 = arith.constant dense<0.000000e+00> : vector<8x256xf32>
    %28 = tpu.matmul %26, %27, %cst_15 {dimension_numbers = #tpu.dot_dimension_numbers<[1], [0], [0], [1], [0, 0, 1, 1], [], []>} : vector<8x256xf32>, vector<256x256xf32>, vector<8x256xf32> -> vector<8x256xf32>
    %29 = vector.extract_strided_slice %28 {offsets = [0, 0], sizes = [8, 128], strides = [1, 1]} : vector<8x256xf32> to vector<8x128xf32>
    %30 = arith.index_cast %c1_i32 : i32 to index
    %c0_16 = arith.constant 0 : index
    %c0_17 = arith.constant 0 : index
    %31 = vector.load %arg2[%30, %c0_16, %c0_17] : memref<8x8x128xf32, #tpu.memory_space<vmem>>, vector<1x8x128xf32>
    %32 = vector.shape_cast %31 : vector<1x8x128xf32> to vector<8x128xf32>
    %33 = arith.addf %29, %32 : vector<8x128xf32>
    %34 = math.tanh %33 : vector<8x128xf32>
    %35 = vector.extract_strided_slice %28 {offsets = [0, 128], sizes = [8, 128], strides = [1, 1]} : vector<8x256xf32> to vector<8x128xf32>
    %36 = vector.broadcast %3 : vector<1x128xf32> to vector<8x128xf32>
    %37 = arith.addf %35, %36 : vector<8x128xf32>
    %38 = math.tanh %37 : vector<8x128xf32>
    %c0_i32_18 = arith.constant 0 : i32
    %39 = arith.cmpi eq, %c1_i32, %c0_i32_18 : i32
    %40 = arith.andi %0, %39 : i1
    %41 = arith.extui %40 : i1 to i32
    %42 = arith.sitofp %41 : i32 to f32
    %cst_19 = arith.constant 1.000000e+00 : f32
    %43 = arith.subf %cst_19, %42 : f32
    %44 = vector.broadcast %43 : f32 to vector<8x128xf32>
    %45 = arith.mulf %38, %44 : vector<8x128xf32>
    %c2_i32 = arith.constant 2 : i32
    %46 = tpu.concatenate %34, %45 in 1 : vector<8x128xf32>, vector<8x128xf32> -> vector<8x256xf32>
    %c0_20 = arith.constant 0 : index
    %c0_21 = arith.constant 0 : index
    %47 = vector.load %arg3[%c0_20, %c0_21] : memref<256x256xf32, #tpu.memory_space<vmem>>, vector<256x256xf32>
    %cst_22 = arith.constant dense<0.000000e+00> : vector<8x256xf32>
    %48 = tpu.matmul %46, %47, %cst_22 {dimension_numbers = #tpu.dot_dimension_numbers<[1], [0], [0], [1], [0, 0, 1, 1], [], []>} : vector<8x256xf32>, vector<256x256xf32>, vector<8x256xf32> -> vector<8x256xf32>
    %49 = vector.extract_strided_slice %48 {offsets = [0, 0], sizes = [8, 128], strides = [1, 1]} : vector<8x256xf32> to vector<8x128xf32>
    %50 = arith.index_cast %c2_i32 : i32 to index
    %c0_23 = arith.constant 0 : index
    %c0_24 = arith.constant 0 : index
    %51 = vector.load %arg2[%50, %c0_23, %c0_24] : memref<8x8x128xf32, #tpu.memory_space<vmem>>, vector<1x8x128xf32>
    %52 = vector.shape_cast %51 : vector<1x8x128xf32> to vector<8x128xf32>
    %53 = arith.addf %49, %52 : vector<8x128xf32>
    %54 = math.tanh %53 : vector<8x128xf32>
    %55 = vector.extract_strided_slice %48 {offsets = [0, 128], sizes = [8, 128], strides = [1, 1]} : vector<8x256xf32> to vector<8x128xf32>
    %56 = vector.broadcast %3 : vector<1x128xf32> to vector<8x128xf32>
    %57 = arith.addf %55, %56 : vector<8x128xf32>
    %58 = math.tanh %57 : vector<8x128xf32>
    %c0_i32_25 = arith.constant 0 : i32
    %59 = arith.cmpi eq, %c2_i32, %c0_i32_25 : i32
    %60 = arith.andi %0, %59 : i1
    %61 = arith.extui %60 : i1 to i32
    %62 = arith.sitofp %61 : i32 to f32
    %cst_26 = arith.constant 1.000000e+00 : f32
    %63 = arith.subf %cst_26, %62 : f32
    %64 = vector.broadcast %63 : f32 to vector<8x128xf32>
    %65 = arith.mulf %58, %64 : vector<8x128xf32>
    %c3_i32 = arith.constant 3 : i32
    %66 = tpu.concatenate %54, %65 in 1 : vector<8x128xf32>, vector<8x128xf32> -> vector<8x256xf32>
    %c0_27 = arith.constant 0 : index
    %c0_28 = arith.constant 0 : index
    %67 = vector.load %arg3[%c0_27, %c0_28] : memref<256x256xf32, #tpu.memory_space<vmem>>, vector<256x256xf32>
    %cst_29 = arith.constant dense<0.000000e+00> : vector<8x256xf32>
    %68 = tpu.matmul %66, %67, %cst_29 {dimension_numbers = #tpu.dot_dimension_numbers<[1], [0], [0], [1], [0, 0, 1, 1], [], []>} : vector<8x256xf32>, vector<256x256xf32>, vector<8x256xf32> -> vector<8x256xf32>
    %69 = vector.extract_strided_slice %68 {offsets = [0, 0], sizes = [8, 128], strides = [1, 1]} : vector<8x256xf32> to vector<8x128xf32>
    %70 = arith.index_cast %c3_i32 : i32 to index
    %c0_30 = arith.constant 0 : index
    %c0_31 = arith.constant 0 : index
    %71 = vector.load %arg2[%70, %c0_30, %c0_31] : memref<8x8x128xf32, #tpu.memory_space<vmem>>, vector<1x8x128xf32>
    %72 = vector.shape_cast %71 : vector<1x8x128xf32> to vector<8x128xf32>
    %73 = arith.addf %69, %72 : vector<8x128xf32>
    %74 = math.tanh %73 : vector<8x128xf32>
    %75 = vector.extract_strided_slice %68 {offsets = [0, 128], sizes = [8, 128], strides = [1, 1]} : vector<8x256xf32> to vector<8x128xf32>
    %76 = vector.broadcast %3 : vector<1x128xf32> to vector<8x128xf32>
    %77 = arith.addf %75, %76 : vector<8x128xf32>
    %78 = math.tanh %77 : vector<8x128xf32>
    %c0_i32_32 = arith.constant 0 : i32
    %79 = arith.cmpi eq, %c3_i32, %c0_i32_32 : i32
    %80 = arith.andi %0, %79 : i1
    %81 = arith.extui %80 : i1 to i32
    %82 = arith.sitofp %81 : i32 to f32
    %cst_33 = arith.constant 1.000000e+00 : f32
    %83 = arith.subf %cst_33, %82 : f32
    %84 = vector.broadcast %83 : f32 to vector<8x128xf32>
    %85 = arith.mulf %78, %84 : vector<8x128xf32>
    %c4_i32 = arith.constant 4 : i32
    %86 = tpu.concatenate %74, %85 in 1 : vector<8x128xf32>, vector<8x128xf32> -> vector<8x256xf32>
    %c0_34 = arith.constant 0 : index
    %c0_35 = arith.constant 0 : index
    %87 = vector.load %arg3[%c0_34, %c0_35] : memref<256x256xf32, #tpu.memory_space<vmem>>, vector<256x256xf32>
    %cst_36 = arith.constant dense<0.000000e+00> : vector<8x256xf32>
    %88 = tpu.matmul %86, %87, %cst_36 {dimension_numbers = #tpu.dot_dimension_numbers<[1], [0], [0], [1], [0, 0, 1, 1], [], []>} : vector<8x256xf32>, vector<256x256xf32>, vector<8x256xf32> -> vector<8x256xf32>
    %89 = vector.extract_strided_slice %88 {offsets = [0, 0], sizes = [8, 128], strides = [1, 1]} : vector<8x256xf32> to vector<8x128xf32>
    %90 = arith.index_cast %c4_i32 : i32 to index
    %c0_37 = arith.constant 0 : index
    %c0_38 = arith.constant 0 : index
    %91 = vector.load %arg2[%90, %c0_37, %c0_38] : memref<8x8x128xf32, #tpu.memory_space<vmem>>, vector<1x8x128xf32>
    %92 = vector.shape_cast %91 : vector<1x8x128xf32> to vector<8x128xf32>
    %93 = arith.addf %89, %92 : vector<8x128xf32>
    %94 = math.tanh %93 : vector<8x128xf32>
    %95 = vector.extract_strided_slice %88 {offsets = [0, 128], sizes = [8, 128], strides = [1, 1]} : vector<8x256xf32> to vector<8x128xf32>
    %96 = vector.broadcast %3 : vector<1x128xf32> to vector<8x128xf32>
    %97 = arith.addf %95, %96 : vector<8x128xf32>
    %98 = math.tanh %97 : vector<8x128xf32>
    %c0_i32_39 = arith.constant 0 : i32
    %99 = arith.cmpi eq, %c4_i32, %c0_i32_39 : i32
    %100 = arith.andi %0, %99 : i1
    %101 = arith.extui %100 : i1 to i32
    %102 = arith.sitofp %101 : i32 to f32
    %cst_40 = arith.constant 1.000000e+00 : f32
    %103 = arith.subf %cst_40, %102 : f32
    %104 = vector.broadcast %103 : f32 to vector<8x128xf32>
    %105 = arith.mulf %98, %104 : vector<8x128xf32>
    %c5_i32 = arith.constant 5 : i32
    %106 = tpu.concatenate %94, %105 in 1 : vector<8x128xf32>, vector<8x128xf32> -> vector<8x256xf32>
    %c0_41 = arith.constant 0 : index
    %c0_42 = arith.constant 0 : index
    %107 = vector.load %arg3[%c0_41, %c0_42] : memref<256x256xf32, #tpu.memory_space<vmem>>, vector<256x256xf32>
    %cst_43 = arith.constant dense<0.000000e+00> : vector<8x256xf32>
    %108 = tpu.matmul %106, %107, %cst_43 {dimension_numbers = #tpu.dot_dimension_numbers<[1], [0], [0], [1], [0, 0, 1, 1], [], []>} : vector<8x256xf32>, vector<256x256xf32>, vector<8x256xf32> -> vector<8x256xf32>
    %109 = vector.extract_strided_slice %108 {offsets = [0, 0], sizes = [8, 128], strides = [1, 1]} : vector<8x256xf32> to vector<8x128xf32>
    %110 = arith.index_cast %c5_i32 : i32 to index
    %c0_44 = arith.constant 0 : index
    %c0_45 = arith.constant 0 : index
    %111 = vector.load %arg2[%110, %c0_44, %c0_45] : memref<8x8x128xf32, #tpu.memory_space<vmem>>, vector<1x8x128xf32>
    %112 = vector.shape_cast %111 : vector<1x8x128xf32> to vector<8x128xf32>
    %113 = arith.addf %109, %112 : vector<8x128xf32>
    %114 = math.tanh %113 : vector<8x128xf32>
    %115 = vector.extract_strided_slice %108 {offsets = [0, 128], sizes = [8, 128], strides = [1, 1]} : vector<8x256xf32> to vector<8x128xf32>
    %116 = vector.broadcast %3 : vector<1x128xf32> to vector<8x128xf32>
    %117 = arith.addf %115, %116 : vector<8x128xf32>
    %118 = math.tanh %117 : vector<8x128xf32>
    %c0_i32_46 = arith.constant 0 : i32
    %119 = arith.cmpi eq, %c5_i32, %c0_i32_46 : i32
    %120 = arith.andi %0, %119 : i1
    %121 = arith.extui %120 : i1 to i32
    %122 = arith.sitofp %121 : i32 to f32
    %cst_47 = arith.constant 1.000000e+00 : f32
    %123 = arith.subf %cst_47, %122 : f32
    %124 = vector.broadcast %123 : f32 to vector<8x128xf32>
    %125 = arith.mulf %118, %124 : vector<8x128xf32>
    %c6_i32 = arith.constant 6 : i32
    %126 = tpu.concatenate %114, %125 in 1 : vector<8x128xf32>, vector<8x128xf32> -> vector<8x256xf32>
    %c0_48 = arith.constant 0 : index
    %c0_49 = arith.constant 0 : index
    %127 = vector.load %arg3[%c0_48, %c0_49] : memref<256x256xf32, #tpu.memory_space<vmem>>, vector<256x256xf32>
    %cst_50 = arith.constant dense<0.000000e+00> : vector<8x256xf32>
    %128 = tpu.matmul %126, %127, %cst_50 {dimension_numbers = #tpu.dot_dimension_numbers<[1], [0], [0], [1], [0, 0, 1, 1], [], []>} : vector<8x256xf32>, vector<256x256xf32>, vector<8x256xf32> -> vector<8x256xf32>
    %129 = vector.extract_strided_slice %128 {offsets = [0, 0], sizes = [8, 128], strides = [1, 1]} : vector<8x256xf32> to vector<8x128xf32>
    %130 = arith.index_cast %c6_i32 : i32 to index
    %c0_51 = arith.constant 0 : index
    %c0_52 = arith.constant 0 : index
    %131 = vector.load %arg2[%130, %c0_51, %c0_52] : memref<8x8x128xf32, #tpu.memory_space<vmem>>, vector<1x8x128xf32>
    %132 = vector.shape_cast %131 : vector<1x8x128xf32> to vector<8x128xf32>
    %133 = arith.addf %129, %132 : vector<8x128xf32>
    %134 = math.tanh %133 : vector<8x128xf32>
    %135 = vector.extract_strided_slice %128 {offsets = [0, 128], sizes = [8, 128], strides = [1, 1]} : vector<8x256xf32> to vector<8x128xf32>
    %136 = vector.broadcast %3 : vector<1x128xf32> to vector<8x128xf32>
    %137 = arith.addf %135, %136 : vector<8x128xf32>
    %138 = math.tanh %137 : vector<8x128xf32>
    %c0_i32_53 = arith.constant 0 : i32
    %139 = arith.cmpi eq, %c6_i32, %c0_i32_53 : i32
    %140 = arith.andi %0, %139 : i1
    %141 = arith.extui %140 : i1 to i32
    %142 = arith.sitofp %141 : i32 to f32
    %cst_54 = arith.constant 1.000000e+00 : f32
    %143 = arith.subf %cst_54, %142 : f32
    %144 = vector.broadcast %143 : f32 to vector<8x128xf32>
    %145 = arith.mulf %138, %144 : vector<8x128xf32>
    %c7_i32 = arith.constant 7 : i32
    %146 = tpu.concatenate %134, %145 in 1 : vector<8x128xf32>, vector<8x128xf32> -> vector<8x256xf32>
    %c0_55 = arith.constant 0 : index
    %c0_56 = arith.constant 0 : index
    %147 = vector.load %arg3[%c0_55, %c0_56] : memref<256x256xf32, #tpu.memory_space<vmem>>, vector<256x256xf32>
    %cst_57 = arith.constant dense<0.000000e+00> : vector<8x256xf32>
    %148 = tpu.matmul %146, %147, %cst_57 {dimension_numbers = #tpu.dot_dimension_numbers<[1], [0], [0], [1], [0, 0, 1, 1], [], []>} : vector<8x256xf32>, vector<256x256xf32>, vector<8x256xf32> -> vector<8x256xf32>
    %149 = vector.extract_strided_slice %148 {offsets = [0, 0], sizes = [8, 128], strides = [1, 1]} : vector<8x256xf32> to vector<8x128xf32>
    %150 = arith.index_cast %c7_i32 : i32 to index
    %c0_58 = arith.constant 0 : index
    %c0_59 = arith.constant 0 : index
    %151 = vector.load %arg2[%150, %c0_58, %c0_59] : memref<8x8x128xf32, #tpu.memory_space<vmem>>, vector<1x8x128xf32>
    %152 = vector.shape_cast %151 : vector<1x8x128xf32> to vector<8x128xf32>
    %153 = arith.addf %149, %152 : vector<8x128xf32>
    %154 = math.tanh %153 : vector<8x128xf32>
    %155 = vector.extract_strided_slice %148 {offsets = [0, 128], sizes = [8, 128], strides = [1, 1]} : vector<8x256xf32> to vector<8x128xf32>
    %156 = vector.broadcast %3 : vector<1x128xf32> to vector<8x128xf32>
    %157 = arith.addf %155, %156 : vector<8x128xf32>
    %158 = math.tanh %157 : vector<8x128xf32>
    %c0_i32_60 = arith.constant 0 : i32
    %159 = arith.cmpi eq, %c7_i32, %c0_i32_60 : i32
    %160 = arith.andi %0, %159 : i1
    %161 = arith.extui %160 : i1 to i32
    %162 = arith.sitofp %161 : i32 to f32
    %cst_61 = arith.constant 1.000000e+00 : f32
    %163 = arith.subf %cst_61, %162 : f32
    %164 = vector.broadcast %163 : f32 to vector<8x128xf32>
    %165 = arith.mulf %158, %164 : vector<8x128xf32>
    %c8_i32 = arith.constant 8 : i32
    %c0_62 = arith.constant 0 : index
    %c0_63 = arith.constant 0 : index
    %166 = vector.load %arg10[%c0_62, %c0_63] : memref<8x128xf32, #tpu.memory_space<vmem>>, vector<8x128xf32>
    tpu.vector_store %arg10[%c0_62, %c0_63], %154 {strides = array<i32>} : memref<8x128xf32, #tpu.memory_space<vmem>>, vector<8x128xf32>,
    %c0_64 = arith.constant 0 : index
    %c0_65 = arith.constant 0 : index
    %167 = vector.load %arg11[%c0_64, %c0_65] : memref<8x128xf32, #tpu.memory_space<vmem>>, vector<8x128xf32>
    tpu.vector_store %arg11[%c0_64, %c0_65], %165 {strides = array<i32>} : memref<8x128xf32, #tpu.memory_space<vmem>>, vector<8x128xf32>,
    %c0_i32_66 = arith.constant 0 : i32
    %168 = arith.cmpi eq, %arg1, %c0_i32_66 : i32
    %169 = arith.extui %168 : i1 to i32
    %c0_i32_67 = arith.constant 0 : i32
    %170 = arith.cmpi ne, %169, %c0_i32_67 : i32
    scf.if %170 {
      %171 = tpu.concatenate %154, %165 in 1 : vector<8x128xf32>, vector<8x128xf32> -> vector<8x256xf32>
      %c0_68 = arith.constant 0 : index
      %c0_69 = arith.constant 0 : index
      %172 = vector.load %arg3[%c0_68, %c0_69] : memref<256x256xf32, #tpu.memory_space<vmem>>, vector<256x256xf32>
      %cst_70 = arith.constant dense<0.000000e+00> : vector<8x256xf32>
      %173 = tpu.matmul %171, %172, %cst_70 {dimension_numbers = #tpu.dot_dimension_numbers<[1], [0], [0], [1], [0, 0, 1, 1], [], []>} : vector<8x256xf32>, vector<256x256xf32>, vector<8x256xf32> -> vector<8x256xf32>
      %174 = vector.extract_strided_slice %173 {offsets = [0, 128], sizes = [8, 128], strides = [1, 1]} : vector<8x256xf32> to vector<8x128xf32>
      %175 = vector.broadcast %3 : vector<1x128xf32> to vector<8x128xf32>
      %176 = arith.addf %174, %175 : vector<8x128xf32>
      %177 = math.tanh %176 : vector<8x128xf32>
      %c0_71 = arith.constant 0 : index
      %c0_72 = arith.constant 0 : index
      %178 = vector.load %arg5[%c0_71, %c0_72] : memref<128x128xf32, #tpu.memory_space<vmem>>, vector<128x128xf32>
      %c0_73 = arith.constant 0 : index
      %c0_74 = arith.constant 0 : index
      %179 = vector.load %arg6[%c0_73, %c0_74] : memref<1024x128xf32, #tpu.memory_space<vmem>>, vector<1024x128xf32>
      %cst_75 = arith.constant -2.200000e+00 : f32
      %180 = vector.broadcast %cst_75 : f32 to vector<8x128xf32>
      %181 = arith.cmpf oge, %177, %180 : vector<8x128xf32>
      %cst_76 = arith.constant -1.800000e+00 : f32
      %182 = vector.broadcast %cst_76 : f32 to vector<8x128xf32>
      %183 = arith.cmpf olt, %177, %182 : vector<8x128xf32>
      %184 = arith.andi %181, %183 : vector<8x128xi1>
      %cst_77 = arith.constant 1.000000e+00 : f32
      %cst_78 = arith.constant 0.000000e+00 : f32
      %185 = vector.broadcast %cst_77 : f32 to vector<8x128xf32>
      %186 = vector.broadcast %cst_78 : f32 to vector<8x128xf32>
      %187 = arith.select %184, %185, %186 : vector<8x128xi1>, vector<8x128xf32>
      %cst_79 = arith.constant -1.800000e+00 : f32
      %188 = vector.broadcast %cst_79 : f32 to vector<8x128xf32>
      %189 = arith.cmpf oge, %177, %188 : vector<8x128xf32>
      %cst_80 = arith.constant -1.400000e+00 : f32
      %190 = vector.broadcast %cst_80 : f32 to vector<8x128xf32>
      %191 = arith.cmpf olt, %177, %190 : vector<8x128xf32>
      %192 = arith.andi %189, %191 : vector<8x128xi1>
      %cst_81 = arith.constant 1.000000e+00 : f32
      %cst_82 = arith.constant 0.000000e+00 : f32
      %193 = vector.broadcast %cst_81 : f32 to vector<8x128xf32>
      %194 = vector.broadcast %cst_82 : f32 to vector<8x128xf32>
      %195 = arith.select %192, %193, %194 : vector<8x128xi1>, vector<8x128xf32>
      %cst_83 = arith.constant -1.400000e+00 : f32
      %196 = vector.broadcast %cst_83 : f32 to vector<8x128xf32>
      %197 = arith.cmpf oge, %177, %196 : vector<8x128xf32>
      %cst_84 = arith.constant -1.000000e+00 : f32
      %198 = vector.broadcast %cst_84 : f32 to vector<8x128xf32>
      %199 = arith.cmpf olt, %177, %198 : vector<8x128xf32>
      %200 = arith.andi %197, %199 : vector<8x128xi1>
      %cst_85 = arith.constant 1.000000e+00 : f32
      %cst_86 = arith.constant 0.000000e+00 : f32
      %201 = vector.broadcast %cst_85 : f32 to vector<8x128xf32>
      %202 = vector.broadcast %cst_86 : f32 to vector<8x128xf32>
      %203 = arith.select %200, %201, %202 : vector<8x128xi1>, vector<8x128xf32>
      %cst_87 = arith.constant -1.000000e+00 : f32
      %204 = vector.broadcast %cst_87 : f32 to vector<8x128xf32>
      %205 = arith.cmpf oge, %177, %204 : vector<8x128xf32>
      %cst_88 = arith.constant -6.000000e-01 : f32
      %206 = vector.broadcast %cst_88 : f32 to vector<8x128xf32>
      %207 = arith.cmpf olt, %177, %206 : vector<8x128xf32>
      %208 = arith.andi %205, %207 : vector<8x128xi1>
      %cst_89 = arith.constant 1.000000e+00 : f32
      %cst_90 = arith.constant 0.000000e+00 : f32
      %209 = vector.broadcast %cst_89 : f32 to vector<8x128xf32>
      %210 = vector.broadcast %cst_90 : f32 to vector<8x128xf32>
      %211 = arith.select %208, %209, %210 : vector<8x128xi1>, vector<8x128xf32>
      %cst_91 = arith.constant -6.000000e-01 : f32
      %212 = vector.broadcast %cst_91 : f32 to vector<8x128xf32>
      %213 = arith.cmpf oge, %177, %212 : vector<8x128xf32>
      %cst_92 = arith.constant -2.000000e-01 : f32
      %214 = vector.broadcast %cst_92 : f32 to vector<8x128xf32>
      %215 = arith.cmpf olt, %177, %214 : vector<8x128xf32>
      %216 = arith.andi %213, %215 : vector<8x128xi1>
      %cst_93 = arith.constant 1.000000e+00 : f32
      %cst_94 = arith.constant 0.000000e+00 : f32
      %217 = vector.broadcast %cst_93 : f32 to vector<8x128xf32>
      %218 = vector.broadcast %cst_94 : f32 to vector<8x128xf32>
      %219 = arith.select %216, %217, %218 : vector<8x128xi1>, vector<8x128xf32>
      %cst_95 = arith.constant -2.000000e-01 : f32
      %220 = vector.broadcast %cst_95 : f32 to vector<8x128xf32>
      %221 = arith.cmpf oge, %177, %220 : vector<8x128xf32>
      %cst_96 = arith.constant 2.000000e-01 : f32
      %222 = vector.broadcast %cst_96 : f32 to vector<8x128xf32>
      %223 = arith.cmpf olt, %177, %222 : vector<8x128xf32>
      %224 = arith.andi %221, %223 : vector<8x128xi1>
      %cst_97 = arith.constant 1.000000e+00 : f32
      %cst_98 = arith.constant 0.000000e+00 : f32
      %225 = vector.broadcast %cst_97 : f32 to vector<8x128xf32>
      %226 = vector.broadcast %cst_98 : f32 to vector<8x128xf32>
      %227 = arith.select %224, %225, %226 : vector<8x128xi1>, vector<8x128xf32>
      %cst_99 = arith.constant 2.000000e-01 : f32
      %228 = vector.broadcast %cst_99 : f32 to vector<8x128xf32>
      %229 = arith.cmpf oge, %177, %228 : vector<8x128xf32>
      %cst_100 = arith.constant 6.000000e-01 : f32
      %230 = vector.broadcast %cst_100 : f32 to vector<8x128xf32>
      %231 = arith.cmpf olt, %177, %230 : vector<8x128xf32>
      %232 = arith.andi %229, %231 : vector<8x128xi1>
      %cst_101 = arith.constant 1.000000e+00 : f32
      %cst_102 = arith.constant 0.000000e+00 : f32
      %233 = vector.broadcast %cst_101 : f32 to vector<8x128xf32>
      %234 = vector.broadcast %cst_102 : f32 to vector<8x128xf32>
      %235 = arith.select %232, %233, %234 : vector<8x128xi1>, vector<8x128xf32>
      %cst_103 = arith.constant 6.000000e-01 : f32
      %236 = vector.broadcast %cst_103 : f32 to vector<8x128xf32>
      %237 = arith.cmpf oge, %177, %236 : vector<8x128xf32>
      %cst_104 = arith.constant 1.000000e+00 : f32
      %238 = vector.broadcast %cst_104 : f32 to vector<8x128xf32>
      %239 = arith.cmpf olt, %177, %238 : vector<8x128xf32>
      %240 = arith.andi %237, %239 : vector<8x128xi1>
      %cst_105 = arith.constant 1.000000e+00 : f32
      %cst_106 = arith.constant 0.000000e+00 : f32
      %241 = vector.broadcast %cst_105 : f32 to vector<8x128xf32>
      %242 = vector.broadcast %cst_106 : f32 to vector<8x128xf32>
      %243 = arith.select %240, %241, %242 : vector<8x128xi1>, vector<8x128xf32>
      %cst_107 = arith.constant 1.000000e+00 : f32
      %244 = vector.broadcast %cst_107 : f32 to vector<8x128xf32>
      %245 = arith.cmpf oge, %177, %244 : vector<8x128xf32>
      %cst_108 = arith.constant 1.400000e+00 : f32
      %246 = vector.broadcast %cst_108 : f32 to vector<8x128xf32>
      %247 = arith.cmpf olt, %177, %246 : vector<8x128xf32>
      %248 = arith.andi %245, %247 : vector<8x128xi1>
      %cst_109 = arith.constant 1.000000e+00 : f32
      %cst_110 = arith.constant 0.000000e+00 : f32
      %249 = vector.broadcast %cst_109 : f32 to vector<8x128xf32>
      %250 = vector.broadcast %cst_110 : f32 to vector<8x128xf32>
      %251 = arith.select %248, %249, %250 : vector<8x128xi1>, vector<8x128xf32>
      %cst_111 = arith.constant 1.400000e+00 : f32
      %252 = vector.broadcast %cst_111 : f32 to vector<8x128xf32>
      %253 = arith.cmpf oge, %177, %252 : vector<8x128xf32>
      %cst_112 = arith.constant 1.800000e+00 : f32
      %254 = vector.broadcast %cst_112 : f32 to vector<8x128xf32>
      %255 = arith.cmpf olt, %177, %254 : vector<8x128xf32>
      %256 = arith.andi %253, %255 : vector<8x128xi1>
      %cst_113 = arith.constant 1.000000e+00 : f32
      %cst_114 = arith.constant 0.000000e+00 : f32
      %257 = vector.broadcast %cst_113 : f32 to vector<8x128xf32>
      %258 = vector.broadcast %cst_114 : f32 to vector<8x128xf32>
      %259 = arith.select %256, %257, %258 : vector<8x128xi1>, vector<8x128xf32>
      %cst_115 = arith.constant 1.800000e+00 : f32
      %260 = vector.broadcast %cst_115 : f32 to vector<8x128xf32>
      %261 = arith.cmpf oge, %177, %260 : vector<8x128xf32>
      %cst_116 = arith.constant 2.200000e+00 : f32
      %262 = vector.broadcast %cst_116 : f32 to vector<8x128xf32>
      %263 = arith.cmpf olt, %177, %262 : vector<8x128xf32>
      %264 = arith.andi %261, %263 : vector<8x128xi1>
      %cst_117 = arith.constant 1.000000e+00 : f32
      %cst_118 = arith.constant 0.000000e+00 : f32
      %265 = vector.broadcast %cst_117 : f32 to vector<8x128xf32>
      %266 = vector.broadcast %cst_118 : f32 to vector<8x128xf32>
      %267 = arith.select %264, %265, %266 : vector<8x128xi1>, vector<8x128xf32>
      %cst_119 = arith.constant -2.200000e+00 : f32
      %268 = vector.broadcast %cst_119 : f32 to vector<8x128xf32>
      %269 = arith.subf %177, %268 : vector<8x128xf32>
      %cst_120 = arith.constant 2.500000e+00 : f32
      %270 = vector.broadcast %cst_120 : f32 to vector<8x128xf32>
      %271 = arith.mulf %269, %270 : vector<8x128xf32>
      %272 = arith.mulf %271, %187 : vector<8x128xf32>
      %cst_121 = arith.constant -1.400000e+00 : f32
      %273 = vector.broadcast %cst_121 : f32 to vector<8x128xf32>
      %274 = arith.subf %273, %177 : vector<8x128xf32>
      %cst_122 = arith.constant 2.500000e+00 : f32
      %275 = vector.broadcast %cst_122 : f32 to vector<8x128xf32>
      %276 = arith.mulf %274, %275 : vector<8x128xf32>
      %277 = arith.mulf %276, %195 : vector<8x128xf32>
      %278 = arith.addf %272, %277 : vector<8x128xf32>
      %cst_123 = arith.constant -1.800000e+00 : f32
      %279 = vector.broadcast %cst_123 : f32 to vector<8x128xf32>
      %280 = arith.subf %177, %279 : vector<8x128xf32>
      %cst_124 = arith.constant 2.500000e+00 : f32
      %281 = vector.broadcast %cst_124 : f32 to vector<8x128xf32>
      %282 = arith.mulf %280, %281 : vector<8x128xf32>
      %283 = arith.mulf %282, %195 : vector<8x128xf32>
      %cst_125 = arith.constant -1.000000e+00 : f32
      %284 = vector.broadcast %cst_125 : f32 to vector<8x128xf32>
      %285 = arith.subf %284, %177 : vector<8x128xf32>
      %cst_126 = arith.constant 2.500000e+00 : f32
      %286 = vector.broadcast %cst_126 : f32 to vector<8x128xf32>
      %287 = arith.mulf %285, %286 : vector<8x128xf32>
      %288 = arith.mulf %287, %203 : vector<8x128xf32>
      %289 = arith.addf %283, %288 : vector<8x128xf32>
      %cst_127 = arith.constant -1.400000e+00 : f32
      %290 = vector.broadcast %cst_127 : f32 to vector<8x128xf32>
      %291 = arith.subf %177, %290 : vector<8x128xf32>
      %cst_128 = arith.constant 2.500000e+00 : f32
      %292 = vector.broadcast %cst_128 : f32 to vector<8x128xf32>
      %293 = arith.mulf %291, %292 : vector<8x128xf32>
      %294 = arith.mulf %293, %203 : vector<8x128xf32>
      %cst_129 = arith.constant -6.000000e-01 : f32
      %295 = vector.broadcast %cst_129 : f32 to vector<8x128xf32>
      %296 = arith.subf %295, %177 : vector<8x128xf32>
      %cst_130 = arith.constant 2.500000e+00 : f32
      %297 = vector.broadcast %cst_130 : f32 to vector<8x128xf32>
      %298 = arith.mulf %296, %297 : vector<8x128xf32>
      %299 = arith.mulf %298, %211 : vector<8x128xf32>
      %300 = arith.addf %294, %299 : vector<8x128xf32>
      %cst_131 = arith.constant -1.000000e+00 : f32
      %301 = vector.broadcast %cst_131 : f32 to vector<8x128xf32>
      %302 = arith.subf %177, %301 : vector<8x128xf32>
      %cst_132 = arith.constant 2.500000e+00 : f32
      %303 = vector.broadcast %cst_132 : f32 to vector<8x128xf32>
      %304 = arith.mulf %302, %303 : vector<8x128xf32>
      %305 = arith.mulf %304, %211 : vector<8x128xf32>
      %cst_133 = arith.constant -2.000000e-01 : f32
      %306 = vector.broadcast %cst_133 : f32 to vector<8x128xf32>
      %307 = arith.subf %306, %177 : vector<8x128xf32>
      %cst_134 = arith.constant 2.500000e+00 : f32
      %308 = vector.broadcast %cst_134 : f32 to vector<8x128xf32>
      %309 = arith.mulf %307, %308 : vector<8x128xf32>
      %310 = arith.mulf %309, %219 : vector<8x128xf32>
      %311 = arith.addf %305, %310 : vector<8x128xf32>
      %cst_135 = arith.constant -6.000000e-01 : f32
      %312 = vector.broadcast %cst_135 : f32 to vector<8x128xf32>
      %313 = arith.subf %177, %312 : vector<8x128xf32>
      %cst_136 = arith.constant 2.500000e+00 : f32
      %314 = vector.broadcast %cst_136 : f32 to vector<8x128xf32>
      %315 = arith.mulf %313, %314 : vector<8x128xf32>
      %316 = arith.mulf %315, %219 : vector<8x128xf32>
      %cst_137 = arith.constant 2.000000e-01 : f32
      %317 = vector.broadcast %cst_137 : f32 to vector<8x128xf32>
      %318 = arith.subf %317, %177 : vector<8x128xf32>
      %cst_138 = arith.constant 2.500000e+00 : f32
      %319 = vector.broadcast %cst_138 : f32 to vector<8x128xf32>
      %320 = arith.mulf %318, %319 : vector<8x128xf32>
      %321 = arith.mulf %320, %227 : vector<8x128xf32>
      %322 = arith.addf %316, %321 : vector<8x128xf32>
      %cst_139 = arith.constant -2.000000e-01 : f32
      %323 = vector.broadcast %cst_139 : f32 to vector<8x128xf32>
      %324 = arith.subf %177, %323 : vector<8x128xf32>
      %cst_140 = arith.constant 2.500000e+00 : f32
      %325 = vector.broadcast %cst_140 : f32 to vector<8x128xf32>
      %326 = arith.mulf %324, %325 : vector<8x128xf32>
      %327 = arith.mulf %326, %227 : vector<8x128xf32>
      %cst_141 = arith.constant 6.000000e-01 : f32
      %328 = vector.broadcast %cst_141 : f32 to vector<8x128xf32>
      %329 = arith.subf %328, %177 : vector<8x128xf32>
      %cst_142 = arith.constant 2.500000e+00 : f32
      %330 = vector.broadcast %cst_142 : f32 to vector<8x128xf32>
      %331 = arith.mulf %329, %330 : vector<8x128xf32>
      %332 = arith.mulf %331, %235 : vector<8x128xf32>
      %333 = arith.addf %327, %332 : vector<8x128xf32>
      %cst_143 = arith.constant 2.000000e-01 : f32
      %334 = vector.broadcast %cst_143 : f32 to vector<8x128xf32>
      %335 = arith.subf %177, %334 : vector<8x128xf32>
      %cst_144 = arith.constant 2.500000e+00 : f32
      %336 = vector.broadcast %cst_144 : f32 to vector<8x128xf32>
      %337 = arith.mulf %335, %336 : vector<8x128xf32>
      %338 = arith.mulf %337, %235 : vector<8x128xf32>
      %cst_145 = arith.constant 1.000000e+00 : f32
      %339 = vector.broadcast %cst_145 : f32 to vector<8x128xf32>
      %340 = arith.subf %339, %177 : vector<8x128xf32>
      %cst_146 = arith.constant 2.500000e+00 : f32
      %341 = vector.broadcast %cst_146 : f32 to vector<8x128xf32>
      %342 = arith.mulf %340, %341 : vector<8x128xf32>
      %343 = arith.mulf %342, %243 : vector<8x128xf32>
      %344 = arith.addf %338, %343 : vector<8x128xf32>
      %cst_147 = arith.constant 6.000000e-01 : f32
      %345 = vector.broadcast %cst_147 : f32 to vector<8x128xf32>
      %346 = arith.subf %177, %345 : vector<8x128xf32>
      %cst_148 = arith.constant 2.500000e+00 : f32
      %347 = vector.broadcast %cst_148 : f32 to vector<8x128xf32>
      %348 = arith.mulf %346, %347 : vector<8x128xf32>
      %349 = arith.mulf %348, %243 : vector<8x128xf32>
      %cst_149 = arith.constant 1.400000e+00 : f32
      %350 = vector.broadcast %cst_149 : f32 to vector<8x128xf32>
      %351 = arith.subf %350, %177 : vector<8x128xf32>
      %cst_150 = arith.constant 2.500000e+00 : f32
      %352 = vector.broadcast %cst_150 : f32 to vector<8x128xf32>
      %353 = arith.mulf %351, %352 : vector<8x128xf32>
      %354 = arith.mulf %353, %251 : vector<8x128xf32>
      %355 = arith.addf %349, %354 : vector<8x128xf32>
      %cst_151 = arith.constant 1.000000e+00 : f32
      %356 = vector.broadcast %cst_151 : f32 to vector<8x128xf32>
      %357 = arith.subf %177, %356 : vector<8x128xf32>
      %cst_152 = arith.constant 2.500000e+00 : f32
      %358 = vector.broadcast %cst_152 : f32 to vector<8x128xf32>
      %359 = arith.mulf %357, %358 : vector<8x128xf32>
      %360 = arith.mulf %359, %251 : vector<8x128xf32>
      %cst_153 = arith.constant 1.800000e+00 : f32
      %361 = vector.broadcast %cst_153 : f32 to vector<8x128xf32>
      %362 = arith.subf %361, %177 : vector<8x128xf32>
      %cst_154 = arith.constant 2.500000e+00 : f32
      %363 = vector.broadcast %cst_154 : f32 to vector<8x128xf32>
      %364 = arith.mulf %362, %363 : vector<8x128xf32>
      %365 = arith.mulf %364, %259 : vector<8x128xf32>
      %366 = arith.addf %360, %365 : vector<8x128xf32>
      %cst_155 = arith.constant 1.400000e+00 : f32
      %367 = vector.broadcast %cst_155 : f32 to vector<8x128xf32>
      %368 = arith.subf %177, %367 : vector<8x128xf32>
      %cst_156 = arith.constant 2.500000e+00 : f32
      %369 = vector.broadcast %cst_156 : f32 to vector<8x128xf32>
      %370 = arith.mulf %368, %369 : vector<8x128xf32>
      %371 = arith.mulf %370, %259 : vector<8x128xf32>
      %cst_157 = arith.constant 2.200000e+00 : f32
      %372 = vector.broadcast %cst_157 : f32 to vector<8x128xf32>
      %373 = arith.subf %372, %177 : vector<8x128xf32>
      %cst_158 = arith.constant 2.500000e+00 : f32
      %374 = vector.broadcast %cst_158 : f32 to vector<8x128xf32>
      %375 = arith.mulf %373, %374 : vector<8x128xf32>
      %376 = arith.mulf %375, %267 : vector<8x128xf32>
      %377 = arith.addf %371, %376 : vector<8x128xf32>
      %cst_159 = arith.constant -2.200000e+00 : f32
      %378 = vector.broadcast %cst_159 : f32 to vector<8x128xf32>
      %379 = arith.subf %177, %378 : vector<8x128xf32>
      %cst_160 = arith.constant 1.250000e+00 : f32
      %380 = vector.broadcast %cst_160 : f32 to vector<8x128xf32>
      %381 = arith.mulf %379, %380 : vector<8x128xf32>
      %382 = arith.mulf %381, %278 : vector<8x128xf32>
      %cst_161 = arith.constant -1.000000e+00 : f32
      %383 = vector.broadcast %cst_161 : f32 to vector<8x128xf32>
      %384 = arith.subf %383, %177 : vector<8x128xf32>
      %cst_162 = arith.constant 1.250000e+00 : f32
      %385 = vector.broadcast %cst_162 : f32 to vector<8x128xf32>
      %386 = arith.mulf %384, %385 : vector<8x128xf32>
      %387 = arith.mulf %386, %289 : vector<8x128xf32>
      %388 = arith.addf %382, %387 : vector<8x128xf32>
      %cst_163 = arith.constant -1.800000e+00 : f32
      %389 = vector.broadcast %cst_163 : f32 to vector<8x128xf32>
      %390 = arith.subf %177, %389 : vector<8x128xf32>
      %cst_164 = arith.constant 1.250000e+00 : f32
      %391 = vector.broadcast %cst_164 : f32 to vector<8x128xf32>
      %392 = arith.mulf %390, %391 : vector<8x128xf32>
      %393 = arith.mulf %392, %289 : vector<8x128xf32>
      %cst_165 = arith.constant -6.000000e-01 : f32
      %394 = vector.broadcast %cst_165 : f32 to vector<8x128xf32>
      %395 = arith.subf %394, %177 : vector<8x128xf32>
      %cst_166 = arith.constant 1.250000e+00 : f32
      %396 = vector.broadcast %cst_166 : f32 to vector<8x128xf32>
      %397 = arith.mulf %395, %396 : vector<8x128xf32>
      %398 = arith.mulf %397, %300 : vector<8x128xf32>
      %399 = arith.addf %393, %398 : vector<8x128xf32>
      %cst_167 = arith.constant -1.400000e+00 : f32
      %400 = vector.broadcast %cst_167 : f32 to vector<8x128xf32>
      %401 = arith.subf %177, %400 : vector<8x128xf32>
      %cst_168 = arith.constant 1.250000e+00 : f32
      %402 = vector.broadcast %cst_168 : f32 to vector<8x128xf32>
      %403 = arith.mulf %401, %402 : vector<8x128xf32>
      %404 = arith.mulf %403, %300 : vector<8x128xf32>
      %cst_169 = arith.constant -2.000000e-01 : f32
      %405 = vector.broadcast %cst_169 : f32 to vector<8x128xf32>
      %406 = arith.subf %405, %177 : vector<8x128xf32>
      %cst_170 = arith.constant 1.250000e+00 : f32
      %407 = vector.broadcast %cst_170 : f32 to vector<8x128xf32>
      %408 = arith.mulf %406, %407 : vector<8x128xf32>
      %409 = arith.mulf %408, %311 : vector<8x128xf32>
      %410 = arith.addf %404, %409 : vector<8x128xf32>
      %cst_171 = arith.constant -1.000000e+00 : f32
      %411 = vector.broadcast %cst_171 : f32 to vector<8x128xf32>
      %412 = arith.subf %177, %411 : vector<8x128xf32>
      %cst_172 = arith.constant 1.250000e+00 : f32
      %413 = vector.broadcast %cst_172 : f32 to vector<8x128xf32>
      %414 = arith.mulf %412, %413 : vector<8x128xf32>
      %415 = arith.mulf %414, %311 : vector<8x128xf32>
      %cst_173 = arith.constant 2.000000e-01 : f32
      %416 = vector.broadcast %cst_173 : f32 to vector<8x128xf32>
      %417 = arith.subf %416, %177 : vector<8x128xf32>
      %cst_174 = arith.constant 1.250000e+00 : f32
      %418 = vector.broadcast %cst_174 : f32 to vector<8x128xf32>
      %419 = arith.mulf %417, %418 : vector<8x128xf32>
      %420 = arith.mulf %419, %322 : vector<8x128xf32>
      %421 = arith.addf %415, %420 : vector<8x128xf32>
      %cst_175 = arith.constant -6.000000e-01 : f32
      %422 = vector.broadcast %cst_175 : f32 to vector<8x128xf32>
      %423 = arith.subf %177, %422 : vector<8x128xf32>
      %cst_176 = arith.constant 1.250000e+00 : f32
      %424 = vector.broadcast %cst_176 : f32 to vector<8x128xf32>
      %425 = arith.mulf %423, %424 : vector<8x128xf32>
      %426 = arith.mulf %425, %322 : vector<8x128xf32>
      %cst_177 = arith.constant 6.000000e-01 : f32
      %427 = vector.broadcast %cst_177 : f32 to vector<8x128xf32>
      %428 = arith.subf %427, %177 : vector<8x128xf32>
      %cst_178 = arith.constant 1.250000e+00 : f32
      %429 = vector.broadcast %cst_178 : f32 to vector<8x128xf32>
      %430 = arith.mulf %428, %429 : vector<8x128xf32>
      %431 = arith.mulf %430, %333 : vector<8x128xf32>
      %432 = arith.addf %426, %431 : vector<8x128xf32>
      %cst_179 = arith.constant -2.000000e-01 : f32
      %433 = vector.broadcast %cst_179 : f32 to vector<8x128xf32>
      %434 = arith.subf %177, %433 : vector<8x128xf32>
      %cst_180 = arith.constant 1.250000e+00 : f32
      %435 = vector.broadcast %cst_180 : f32 to vector<8x128xf32>
      %436 = arith.mulf %434, %435 : vector<8x128xf32>
      %437 = arith.mulf %436, %333 : vector<8x128xf32>
      %cst_181 = arith.constant 1.000000e+00 : f32
      %438 = vector.broadcast %cst_181 : f32 to vector<8x128xf32>
      %439 = arith.subf %438, %177 : vector<8x128xf32>
      %cst_182 = arith.constant 1.250000e+00 : f32
      %440 = vector.broadcast %cst_182 : f32 to vector<8x128xf32>
      %441 = arith.mulf %439, %440 : vector<8x128xf32>
      %442 = arith.mulf %441, %344 : vector<8x128xf32>
      %443 = arith.addf %437, %442 : vector<8x128xf32>
      %cst_183 = arith.constant 2.000000e-01 : f32
      %444 = vector.broadcast %cst_183 : f32 to vector<8x128xf32>
      %445 = arith.subf %177, %444 : vector<8x128xf32>
      %cst_184 = arith.constant 1.250000e+00 : f32
      %446 = vector.broadcast %cst_184 : f32 to vector<8x128xf32>
      %447 = arith.mulf %445, %446 : vector<8x128xf32>
      %448 = arith.mulf %447, %344 : vector<8x128xf32>
      %cst_185 = arith.constant 1.400000e+00 : f32
      %449 = vector.broadcast %cst_185 : f32 to vector<8x128xf32>
      %450 = arith.subf %449, %177 : vector<8x128xf32>
      %cst_186 = arith.constant 1.250000e+00 : f32
      %451 = vector.broadcast %cst_186 : f32 to vector<8x128xf32>
      %452 = arith.mulf %450, %451 : vector<8x128xf32>
      %453 = arith.mulf %452, %355 : vector<8x128xf32>
      %454 = arith.addf %448, %453 : vector<8x128xf32>
      %cst_187 = arith.constant 6.000000e-01 : f32
      %455 = vector.broadcast %cst_187 : f32 to vector<8x128xf32>
      %456 = arith.subf %177, %455 : vector<8x128xf32>
      %cst_188 = arith.constant 1.250000e+00 : f32
      %457 = vector.broadcast %cst_188 : f32 to vector<8x128xf32>
      %458 = arith.mulf %456, %457 : vector<8x128xf32>
      %459 = arith.mulf %458, %355 : vector<8x128xf32>
      %cst_189 = arith.constant 1.800000e+00 : f32
      %460 = vector.broadcast %cst_189 : f32 to vector<8x128xf32>
      %461 = arith.subf %460, %177 : vector<8x128xf32>
      %cst_190 = arith.constant 1.250000e+00 : f32
      %462 = vector.broadcast %cst_190 : f32 to vector<8x128xf32>
      %463 = arith.mulf %461, %462 : vector<8x128xf32>
      %464 = arith.mulf %463, %366 : vector<8x128xf32>
      %465 = arith.addf %459, %464 : vector<8x128xf32>
      %cst_191 = arith.constant 1.000000e+00 : f32
      %466 = vector.broadcast %cst_191 : f32 to vector<8x128xf32>
      %467 = arith.subf %177, %466 : vector<8x128xf32>
      %cst_192 = arith.constant 1.250000e+00 : f32
      %468 = vector.broadcast %cst_192 : f32 to vector<8x128xf32>
      %469 = arith.mulf %467, %468 : vector<8x128xf32>
      %470 = arith.mulf %469, %366 : vector<8x128xf32>
      %cst_193 = arith.constant 2.200000e+00 : f32
      %471 = vector.broadcast %cst_193 : f32 to vector<8x128xf32>
      %472 = arith.subf %471, %177 : vector<8x128xf32>
      %cst_194 = arith.constant 1.250000e+00 : f32
      %473 = vector.broadcast %cst_194 : f32 to vector<8x128xf32>
      %474 = arith.mulf %472, %473 : vector<8x128xf32>
      %475 = arith.mulf %474, %377 : vector<8x128xf32>
      %476 = arith.addf %470, %475 : vector<8x128xf32>
      %cst_195 = arith.constant -2.200000e+00 : f32
      %477 = vector.broadcast %cst_195 : f32 to vector<8x128xf32>
      %478 = arith.subf %177, %477 : vector<8x128xf32>
      %cst_196 = arith.constant 0.833333313 : f32
      %479 = vector.broadcast %cst_196 : f32 to vector<8x128xf32>
      %480 = arith.mulf %478, %479 : vector<8x128xf32>
      %481 = arith.mulf %480, %388 : vector<8x128xf32>
      %cst_197 = arith.constant -6.000000e-01 : f32
      %482 = vector.broadcast %cst_197 : f32 to vector<8x128xf32>
      %483 = arith.subf %482, %177 : vector<8x128xf32>
      %cst_198 = arith.constant 0.833333313 : f32
      %484 = vector.broadcast %cst_198 : f32 to vector<8x128xf32>
      %485 = arith.mulf %483, %484 : vector<8x128xf32>
      %486 = arith.mulf %485, %399 : vector<8x128xf32>
      %487 = arith.addf %481, %486 : vector<8x128xf32>
      %cst_199 = arith.constant -1.800000e+00 : f32
      %488 = vector.broadcast %cst_199 : f32 to vector<8x128xf32>
      %489 = arith.subf %177, %488 : vector<8x128xf32>
      %cst_200 = arith.constant 0.833333313 : f32
      %490 = vector.broadcast %cst_200 : f32 to vector<8x128xf32>
      %491 = arith.mulf %489, %490 : vector<8x128xf32>
      %492 = arith.mulf %491, %399 : vector<8x128xf32>
      %cst_201 = arith.constant -2.000000e-01 : f32
      %493 = vector.broadcast %cst_201 : f32 to vector<8x128xf32>
      %494 = arith.subf %493, %177 : vector<8x128xf32>
      %cst_202 = arith.constant 0.833333313 : f32
      %495 = vector.broadcast %cst_202 : f32 to vector<8x128xf32>
      %496 = arith.mulf %494, %495 : vector<8x128xf32>
      %497 = arith.mulf %496, %410 : vector<8x128xf32>
      %498 = arith.addf %492, %497 : vector<8x128xf32>
      %cst_203 = arith.constant -1.400000e+00 : f32
      %499 = vector.broadcast %cst_203 : f32 to vector<8x128xf32>
      %500 = arith.subf %177, %499 : vector<8x128xf32>
      %cst_204 = arith.constant 0.833333313 : f32
      %501 = vector.broadcast %cst_204 : f32 to vector<8x128xf32>
      %502 = arith.mulf %500, %501 : vector<8x128xf32>
      %503 = arith.mulf %502, %410 : vector<8x128xf32>
      %cst_205 = arith.constant 2.000000e-01 : f32
      %504 = vector.broadcast %cst_205 : f32 to vector<8x128xf32>
      %505 = arith.subf %504, %177 : vector<8x128xf32>
      %cst_206 = arith.constant 0.833333313 : f32
      %506 = vector.broadcast %cst_206 : f32 to vector<8x128xf32>
      %507 = arith.mulf %505, %506 : vector<8x128xf32>
      %508 = arith.mulf %507, %421 : vector<8x128xf32>
      %509 = arith.addf %503, %508 : vector<8x128xf32>
      %cst_207 = arith.constant -1.000000e+00 : f32
      %510 = vector.broadcast %cst_207 : f32 to vector<8x128xf32>
      %511 = arith.subf %177, %510 : vector<8x128xf32>
      %cst_208 = arith.constant 0.833333313 : f32
      %512 = vector.broadcast %cst_208 : f32 to vector<8x128xf32>
      %513 = arith.mulf %511, %512 : vector<8x128xf32>
      %514 = arith.mulf %513, %421 : vector<8x128xf32>
      %cst_209 = arith.constant 6.000000e-01 : f32
      %515 = vector.broadcast %cst_209 : f32 to vector<8x128xf32>
      %516 = arith.subf %515, %177 : vector<8x128xf32>
      %cst_210 = arith.constant 0.833333313 : f32
      %517 = vector.broadcast %cst_210 : f32 to vector<8x128xf32>
      %518 = arith.mulf %516, %517 : vector<8x128xf32>
      %519 = arith.mulf %518, %432 : vector<8x128xf32>
      %520 = arith.addf %514, %519 : vector<8x128xf32>
      %cst_211 = arith.constant -6.000000e-01 : f32
      %521 = vector.broadcast %cst_211 : f32 to vector<8x128xf32>
      %522 = arith.subf %177, %521 : vector<8x128xf32>
      %cst_212 = arith.constant 0.833333313 : f32
      %523 = vector.broadcast %cst_212 : f32 to vector<8x128xf32>
      %524 = arith.mulf %522, %523 : vector<8x128xf32>
      %525 = arith.mulf %524, %432 : vector<8x128xf32>
      %cst_213 = arith.constant 1.000000e+00 : f32
      %526 = vector.broadcast %cst_213 : f32 to vector<8x128xf32>
      %527 = arith.subf %526, %177 : vector<8x128xf32>
      %cst_214 = arith.constant 0.833333313 : f32
      %528 = vector.broadcast %cst_214 : f32 to vector<8x128xf32>
      %529 = arith.mulf %527, %528 : vector<8x128xf32>
      %530 = arith.mulf %529, %443 : vector<8x128xf32>
      %531 = arith.addf %525, %530 : vector<8x128xf32>
      %cst_215 = arith.constant -2.000000e-01 : f32
      %532 = vector.broadcast %cst_215 : f32 to vector<8x128xf32>
      %533 = arith.subf %177, %532 : vector<8x128xf32>
      %cst_216 = arith.constant 0.833333313 : f32
      %534 = vector.broadcast %cst_216 : f32 to vector<8x128xf32>
      %535 = arith.mulf %533, %534 : vector<8x128xf32>
      %536 = arith.mulf %535, %443 : vector<8x128xf32>
      %cst_217 = arith.constant 1.400000e+00 : f32
      %537 = vector.broadcast %cst_217 : f32 to vector<8x128xf32>
      %538 = arith.subf %537, %177 : vector<8x128xf32>
      %cst_218 = arith.constant 0.833333313 : f32
      %539 = vector.broadcast %cst_218 : f32 to vector<8x128xf32>
      %540 = arith.mulf %538, %539 : vector<8x128xf32>
      %541 = arith.mulf %540, %454 : vector<8x128xf32>
      %542 = arith.addf %536, %541 : vector<8x128xf32>
      %cst_219 = arith.constant 2.000000e-01 : f32
      %543 = vector.broadcast %cst_219 : f32 to vector<8x128xf32>
      %544 = arith.subf %177, %543 : vector<8x128xf32>
      %cst_220 = arith.constant 0.833333313 : f32
      %545 = vector.broadcast %cst_220 : f32 to vector<8x128xf32>
      %546 = arith.mulf %544, %545 : vector<8x128xf32>
      %547 = arith.mulf %546, %454 : vector<8x128xf32>
      %cst_221 = arith.constant 1.800000e+00 : f32
      %548 = vector.broadcast %cst_221 : f32 to vector<8x128xf32>
      %549 = arith.subf %548, %177 : vector<8x128xf32>
      %cst_222 = arith.constant 0.833333313 : f32
      %550 = vector.broadcast %cst_222 : f32 to vector<8x128xf32>
      %551 = arith.mulf %549, %550 : vector<8x128xf32>
      %552 = arith.mulf %551, %465 : vector<8x128xf32>
      %553 = arith.addf %547, %552 : vector<8x128xf32>
      %cst_223 = arith.constant 6.000000e-01 : f32
      %554 = vector.broadcast %cst_223 : f32 to vector<8x128xf32>
      %555 = arith.subf %177, %554 : vector<8x128xf32>
      %cst_224 = arith.constant 0.833333313 : f32
      %556 = vector.broadcast %cst_224 : f32 to vector<8x128xf32>
      %557 = arith.mulf %555, %556 : vector<8x128xf32>
      %558 = arith.mulf %557, %465 : vector<8x128xf32>
      %cst_225 = arith.constant 2.200000e+00 : f32
      %559 = vector.broadcast %cst_225 : f32 to vector<8x128xf32>
      %560 = arith.subf %559, %177 : vector<8x128xf32>
      %cst_226 = arith.constant 0.833333313 : f32
      %561 = vector.broadcast %cst_226 : f32 to vector<8x128xf32>
      %562 = arith.mulf %560, %561 : vector<8x128xf32>
      %563 = arith.mulf %562, %476 : vector<8x128xf32>
      %564 = arith.addf %558, %563 : vector<8x128xf32>
      %565 = tpu.concatenate %487, %498, %509, %520, %531, %542, %553, %564 in 1 : vector<8x128xf32>, vector<8x128xf32>, vector<8x128xf32>, vector<8x128xf32>, vector<8x128xf32>, vector<8x128xf32>, vector<8x128xf32>, vector<8x128xf32> -> vector<8x1024xf32>
      %566 = arith.negf %177 : vector<8x128xf32>
      %567 = math.exp %566 : vector<8x128xf32>
      %cst_227 = arith.constant 1.000000e+00 : f32
      %568 = vector.broadcast %cst_227 : f32 to vector<8x128xf32>
      %569 = arith.addf %568, %567 : vector<8x128xf32>
      %570 = arith.divf %568, %569 : vector<8x128xf32>
      %571 = arith.mulf %177, %570 : vector<8x128xf32>
      %cst_228 = arith.constant dense<0.000000e+00> : vector<8x128xf32>
      %572 = tpu.matmul %571, %178, %cst_228 {dimension_numbers = #tpu.dot_dimension_numbers<[1], [0], [0], [1], [0, 0, 1, 1], [], []>} : vector<8x128xf32>, vector<128x128xf32>, vector<8x128xf32> -> vector<8x128xf32>
      %cst_229 = arith.constant dense<0.000000e+00> : vector<8x128xf32>
      %573 = tpu.matmul %565, %179, %cst_229 {dimension_numbers = #tpu.dot_dimension_numbers<[1], [0], [0], [1], [0, 0, 1, 1], [], []>} : vector<8x1024xf32>, vector<1024x128xf32>, vector<8x128xf32> -> vector<8x128xf32>
      %574 = arith.addf %572, %573 : vector<8x128xf32>
      %c0_230 = arith.constant 0 : index
      %c0_231 = arith.constant 0 : index
      %575 = vector.load %arg7[%c0_230, %c0_231] : memref<128x128xf32, #tpu.memory_space<vmem>>, vector<128x128xf32>
      %c0_232 = arith.constant 0 : index
      %c0_233 = arith.constant 0 : index
      %576 = vector.load %arg8[%c0_232, %c0_233] : memref<1024x128xf32, #tpu.memory_space<vmem>>, vector<1024x128xf32>
      %cst_234 = arith.constant -2.200000e+00 : f32
      %577 = vector.broadcast %cst_234 : f32 to vector<8x128xf32>
      %578 = arith.cmpf oge, %574, %577 : vector<8x128xf32>
      %cst_235 = arith.constant -1.800000e+00 : f32
      %579 = vector.broadcast %cst_235 : f32 to vector<8x128xf32>
      %580 = arith.cmpf olt, %574, %579 : vector<8x128xf32>
      %581 = arith.andi %578, %580 : vector<8x128xi1>
      %cst_236 = arith.constant 1.000000e+00 : f32
      %cst_237 = arith.constant 0.000000e+00 : f32
      %582 = vector.broadcast %cst_236 : f32 to vector<8x128xf32>
      %583 = vector.broadcast %cst_237 : f32 to vector<8x128xf32>
      %584 = arith.select %581, %582, %583 : vector<8x128xi1>, vector<8x128xf32>
      %cst_238 = arith.constant -1.800000e+00 : f32
      %585 = vector.broadcast %cst_238 : f32 to vector<8x128xf32>
      %586 = arith.cmpf oge, %574, %585 : vector<8x128xf32>
      %cst_239 = arith.constant -1.400000e+00 : f32
      %587 = vector.broadcast %cst_239 : f32 to vector<8x128xf32>
      %588 = arith.cmpf olt, %574, %587 : vector<8x128xf32>
      %589 = arith.andi %586, %588 : vector<8x128xi1>
      %cst_240 = arith.constant 1.000000e+00 : f32
      %cst_241 = arith.constant 0.000000e+00 : f32
      %590 = vector.broadcast %cst_240 : f32 to vector<8x128xf32>
      %591 = vector.broadcast %cst_241 : f32 to vector<8x128xf32>
      %592 = arith.select %589, %590, %591 : vector<8x128xi1>, vector<8x128xf32>
      %cst_242 = arith.constant -1.400000e+00 : f32
      %593 = vector.broadcast %cst_242 : f32 to vector<8x128xf32>
      %594 = arith.cmpf oge, %574, %593 : vector<8x128xf32>
      %cst_243 = arith.constant -1.000000e+00 : f32
      %595 = vector.broadcast %cst_243 : f32 to vector<8x128xf32>
      %596 = arith.cmpf olt, %574, %595 : vector<8x128xf32>
      %597 = arith.andi %594, %596 : vector<8x128xi1>
      %cst_244 = arith.constant 1.000000e+00 : f32
      %cst_245 = arith.constant 0.000000e+00 : f32
      %598 = vector.broadcast %cst_244 : f32 to vector<8x128xf32>
      %599 = vector.broadcast %cst_245 : f32 to vector<8x128xf32>
      %600 = arith.select %597, %598, %599 : vector<8x128xi1>, vector<8x128xf32>
      %cst_246 = arith.constant -1.000000e+00 : f32
      %601 = vector.broadcast %cst_246 : f32 to vector<8x128xf32>
      %602 = arith.cmpf oge, %574, %601 : vector<8x128xf32>
      %cst_247 = arith.constant -6.000000e-01 : f32
      %603 = vector.broadcast %cst_247 : f32 to vector<8x128xf32>
      %604 = arith.cmpf olt, %574, %603 : vector<8x128xf32>
      %605 = arith.andi %602, %604 : vector<8x128xi1>
      %cst_248 = arith.constant 1.000000e+00 : f32
      %cst_249 = arith.constant 0.000000e+00 : f32
      %606 = vector.broadcast %cst_248 : f32 to vector<8x128xf32>
      %607 = vector.broadcast %cst_249 : f32 to vector<8x128xf32>
      %608 = arith.select %605, %606, %607 : vector<8x128xi1>, vector<8x128xf32>
      %cst_250 = arith.constant -6.000000e-01 : f32
      %609 = vector.broadcast %cst_250 : f32 to vector<8x128xf32>
      %610 = arith.cmpf oge, %574, %609 : vector<8x128xf32>
      %cst_251 = arith.constant -2.000000e-01 : f32
      %611 = vector.broadcast %cst_251 : f32 to vector<8x128xf32>
      %612 = arith.cmpf olt, %574, %611 : vector<8x128xf32>
      %613 = arith.andi %610, %612 : vector<8x128xi1>
      %cst_252 = arith.constant 1.000000e+00 : f32
      %cst_253 = arith.constant 0.000000e+00 : f32
      %614 = vector.broadcast %cst_252 : f32 to vector<8x128xf32>
      %615 = vector.broadcast %cst_253 : f32 to vector<8x128xf32>
      %616 = arith.select %613, %614, %615 : vector<8x128xi1>, vector<8x128xf32>
      %cst_254 = arith.constant -2.000000e-01 : f32
      %617 = vector.broadcast %cst_254 : f32 to vector<8x128xf32>
      %618 = arith.cmpf oge, %574, %617 : vector<8x128xf32>
      %cst_255 = arith.constant 2.000000e-01 : f32
      %619 = vector.broadcast %cst_255 : f32 to vector<8x128xf32>
      %620 = arith.cmpf olt, %574, %619 : vector<8x128xf32>
      %621 = arith.andi %618, %620 : vector<8x128xi1>
      %cst_256 = arith.constant 1.000000e+00 : f32
      %cst_257 = arith.constant 0.000000e+00 : f32
      %622 = vector.broadcast %cst_256 : f32 to vector<8x128xf32>
      %623 = vector.broadcast %cst_257 : f32 to vector<8x128xf32>
      %624 = arith.select %621, %622, %623 : vector<8x128xi1>, vector<8x128xf32>
      %cst_258 = arith.constant 2.000000e-01 : f32
      %625 = vector.broadcast %cst_258 : f32 to vector<8x128xf32>
      %626 = arith.cmpf oge, %574, %625 : vector<8x128xf32>
      %cst_259 = arith.constant 6.000000e-01 : f32
      %627 = vector.broadcast %cst_259 : f32 to vector<8x128xf32>
      %628 = arith.cmpf olt, %574, %627 : vector<8x128xf32>
      %629 = arith.andi %626, %628 : vector<8x128xi1>
      %cst_260 = arith.constant 1.000000e+00 : f32
      %cst_261 = arith.constant 0.000000e+00 : f32
      %630 = vector.broadcast %cst_260 : f32 to vector<8x128xf32>
      %631 = vector.broadcast %cst_261 : f32 to vector<8x128xf32>
      %632 = arith.select %629, %630, %631 : vector<8x128xi1>, vector<8x128xf32>
      %cst_262 = arith.constant 6.000000e-01 : f32
      %633 = vector.broadcast %cst_262 : f32 to vector<8x128xf32>
      %634 = arith.cmpf oge, %574, %633 : vector<8x128xf32>
      %cst_263 = arith.constant 1.000000e+00 : f32
      %635 = vector.broadcast %cst_263 : f32 to vector<8x128xf32>
      %636 = arith.cmpf olt, %574, %635 : vector<8x128xf32>
      %637 = arith.andi %634, %636 : vector<8x128xi1>
      %cst_264 = arith.constant 1.000000e+00 : f32
      %cst_265 = arith.constant 0.000000e+00 : f32
      %638 = vector.broadcast %cst_264 : f32 to vector<8x128xf32>
      %639 = vector.broadcast %cst_265 : f32 to vector<8x128xf32>
      %640 = arith.select %637, %638, %639 : vector<8x128xi1>, vector<8x128xf32>
      %cst_266 = arith.constant 1.000000e+00 : f32
      %641 = vector.broadcast %cst_266 : f32 to vector<8x128xf32>
      %642 = arith.cmpf oge, %574, %641 : vector<8x128xf32>
      %cst_267 = arith.constant 1.400000e+00 : f32
      %643 = vector.broadcast %cst_267 : f32 to vector<8x128xf32>
      %644 = arith.cmpf olt, %574, %643 : vector<8x128xf32>
      %645 = arith.andi %642, %644 : vector<8x128xi1>
      %cst_268 = arith.constant 1.000000e+00 : f32
      %cst_269 = arith.constant 0.000000e+00 : f32
      %646 = vector.broadcast %cst_268 : f32 to vector<8x128xf32>
      %647 = vector.broadcast %cst_269 : f32 to vector<8x128xf32>
      %648 = arith.select %645, %646, %647 : vector<8x128xi1>, vector<8x128xf32>
      %cst_270 = arith.constant 1.400000e+00 : f32
      %649 = vector.broadcast %cst_270 : f32 to vector<8x128xf32>
      %650 = arith.cmpf oge, %574, %649 : vector<8x128xf32>
      %cst_271 = arith.constant 1.800000e+00 : f32
      %651 = vector.broadcast %cst_271 : f32 to vector<8x128xf32>
      %652 = arith.cmpf olt, %574, %651 : vector<8x128xf32>
      %653 = arith.andi %650, %652 : vector<8x128xi1>
      %cst_272 = arith.constant 1.000000e+00 : f32
      %cst_273 = arith.constant 0.000000e+00 : f32
      %654 = vector.broadcast %cst_272 : f32 to vector<8x128xf32>
      %655 = vector.broadcast %cst_273 : f32 to vector<8x128xf32>
      %656 = arith.select %653, %654, %655 : vector<8x128xi1>, vector<8x128xf32>
      %cst_274 = arith.constant 1.800000e+00 : f32
      %657 = vector.broadcast %cst_274 : f32 to vector<8x128xf32>
      %658 = arith.cmpf oge, %574, %657 : vector<8x128xf32>
      %cst_275 = arith.constant 2.200000e+00 : f32
      %659 = vector.broadcast %cst_275 : f32 to vector<8x128xf32>
      %660 = arith.cmpf olt, %574, %659 : vector<8x128xf32>
      %661 = arith.andi %658, %660 : vector<8x128xi1>
      %cst_276 = arith.constant 1.000000e+00 : f32
      %cst_277 = arith.constant 0.000000e+00 : f32
      %662 = vector.broadcast %cst_276 : f32 to vector<8x128xf32>
      %663 = vector.broadcast %cst_277 : f32 to vector<8x128xf32>
      %664 = arith.select %661, %662, %663 : vector<8x128xi1>, vector<8x128xf32>
      %cst_278 = arith.constant -2.200000e+00 : f32
      %665 = vector.broadcast %cst_278 : f32 to vector<8x128xf32>
      %666 = arith.subf %574, %665 : vector<8x128xf32>
      %cst_279 = arith.constant 2.500000e+00 : f32
      %667 = vector.broadcast %cst_279 : f32 to vector<8x128xf32>
      %668 = arith.mulf %666, %667 : vector<8x128xf32>
      %669 = arith.mulf %668, %584 : vector<8x128xf32>
      %cst_280 = arith.constant -1.400000e+00 : f32
      %670 = vector.broadcast %cst_280 : f32 to vector<8x128xf32>
      %671 = arith.subf %670, %574 : vector<8x128xf32>
      %cst_281 = arith.constant 2.500000e+00 : f32
      %672 = vector.broadcast %cst_281 : f32 to vector<8x128xf32>
      %673 = arith.mulf %671, %672 : vector<8x128xf32>
      %674 = arith.mulf %673, %592 : vector<8x128xf32>
      %675 = arith.addf %669, %674 : vector<8x128xf32>
      %cst_282 = arith.constant -1.800000e+00 : f32
      %676 = vector.broadcast %cst_282 : f32 to vector<8x128xf32>
      %677 = arith.subf %574, %676 : vector<8x128xf32>
      %cst_283 = arith.constant 2.500000e+00 : f32
      %678 = vector.broadcast %cst_283 : f32 to vector<8x128xf32>
      %679 = arith.mulf %677, %678 : vector<8x128xf32>
      %680 = arith.mulf %679, %592 : vector<8x128xf32>
      %cst_284 = arith.constant -1.000000e+00 : f32
      %681 = vector.broadcast %cst_284 : f32 to vector<8x128xf32>
      %682 = arith.subf %681, %574 : vector<8x128xf32>
      %cst_285 = arith.constant 2.500000e+00 : f32
      %683 = vector.broadcast %cst_285 : f32 to vector<8x128xf32>
      %684 = arith.mulf %682, %683 : vector<8x128xf32>
      %685 = arith.mulf %684, %600 : vector<8x128xf32>
      %686 = arith.addf %680, %685 : vector<8x128xf32>
      %cst_286 = arith.constant -1.400000e+00 : f32
      %687 = vector.broadcast %cst_286 : f32 to vector<8x128xf32>
      %688 = arith.subf %574, %687 : vector<8x128xf32>
      %cst_287 = arith.constant 2.500000e+00 : f32
      %689 = vector.broadcast %cst_287 : f32 to vector<8x128xf32>
      %690 = arith.mulf %688, %689 : vector<8x128xf32>
      %691 = arith.mulf %690, %600 : vector<8x128xf32>
      %cst_288 = arith.constant -6.000000e-01 : f32
      %692 = vector.broadcast %cst_288 : f32 to vector<8x128xf32>
      %693 = arith.subf %692, %574 : vector<8x128xf32>
      %cst_289 = arith.constant 2.500000e+00 : f32
      %694 = vector.broadcast %cst_289 : f32 to vector<8x128xf32>
      %695 = arith.mulf %693, %694 : vector<8x128xf32>
      %696 = arith.mulf %695, %608 : vector<8x128xf32>
      %697 = arith.addf %691, %696 : vector<8x128xf32>
      %cst_290 = arith.constant -1.000000e+00 : f32
      %698 = vector.broadcast %cst_290 : f32 to vector<8x128xf32>
      %699 = arith.subf %574, %698 : vector<8x128xf32>
      %cst_291 = arith.constant 2.500000e+00 : f32
      %700 = vector.broadcast %cst_291 : f32 to vector<8x128xf32>
      %701 = arith.mulf %699, %700 : vector<8x128xf32>
      %702 = arith.mulf %701, %608 : vector<8x128xf32>
      %cst_292 = arith.constant -2.000000e-01 : f32
      %703 = vector.broadcast %cst_292 : f32 to vector<8x128xf32>
      %704 = arith.subf %703, %574 : vector<8x128xf32>
      %cst_293 = arith.constant 2.500000e+00 : f32
      %705 = vector.broadcast %cst_293 : f32 to vector<8x128xf32>
      %706 = arith.mulf %704, %705 : vector<8x128xf32>
      %707 = arith.mulf %706, %616 : vector<8x128xf32>
      %708 = arith.addf %702, %707 : vector<8x128xf32>
      %cst_294 = arith.constant -6.000000e-01 : f32
      %709 = vector.broadcast %cst_294 : f32 to vector<8x128xf32>
      %710 = arith.subf %574, %709 : vector<8x128xf32>
      %cst_295 = arith.constant 2.500000e+00 : f32
      %711 = vector.broadcast %cst_295 : f32 to vector<8x128xf32>
      %712 = arith.mulf %710, %711 : vector<8x128xf32>
      %713 = arith.mulf %712, %616 : vector<8x128xf32>
      %cst_296 = arith.constant 2.000000e-01 : f32
      %714 = vector.broadcast %cst_296 : f32 to vector<8x128xf32>
      %715 = arith.subf %714, %574 : vector<8x128xf32>
      %cst_297 = arith.constant 2.500000e+00 : f32
      %716 = vector.broadcast %cst_297 : f32 to vector<8x128xf32>
      %717 = arith.mulf %715, %716 : vector<8x128xf32>
      %718 = arith.mulf %717, %624 : vector<8x128xf32>
      %719 = arith.addf %713, %718 : vector<8x128xf32>
      %cst_298 = arith.constant -2.000000e-01 : f32
      %720 = vector.broadcast %cst_298 : f32 to vector<8x128xf32>
      %721 = arith.subf %574, %720 : vector<8x128xf32>
      %cst_299 = arith.constant 2.500000e+00 : f32
      %722 = vector.broadcast %cst_299 : f32 to vector<8x128xf32>
      %723 = arith.mulf %721, %722 : vector<8x128xf32>
      %724 = arith.mulf %723, %624 : vector<8x128xf32>
      %cst_300 = arith.constant 6.000000e-01 : f32
      %725 = vector.broadcast %cst_300 : f32 to vector<8x128xf32>
      %726 = arith.subf %725, %574 : vector<8x128xf32>
      %cst_301 = arith.constant 2.500000e+00 : f32
      %727 = vector.broadcast %cst_301 : f32 to vector<8x128xf32>
      %728 = arith.mulf %726, %727 : vector<8x128xf32>
      %729 = arith.mulf %728, %632 : vector<8x128xf32>
      %730 = arith.addf %724, %729 : vector<8x128xf32>
      %cst_302 = arith.constant 2.000000e-01 : f32
      %731 = vector.broadcast %cst_302 : f32 to vector<8x128xf32>
      %732 = arith.subf %574, %731 : vector<8x128xf32>
      %cst_303 = arith.constant 2.500000e+00 : f32
      %733 = vector.broadcast %cst_303 : f32 to vector<8x128xf32>
      %734 = arith.mulf %732, %733 : vector<8x128xf32>
      %735 = arith.mulf %734, %632 : vector<8x128xf32>
      %cst_304 = arith.constant 1.000000e+00 : f32
      %736 = vector.broadcast %cst_304 : f32 to vector<8x128xf32>
      %737 = arith.subf %736, %574 : vector<8x128xf32>
      %cst_305 = arith.constant 2.500000e+00 : f32
      %738 = vector.broadcast %cst_305 : f32 to vector<8x128xf32>
      %739 = arith.mulf %737, %738 : vector<8x128xf32>
      %740 = arith.mulf %739, %640 : vector<8x128xf32>
      %741 = arith.addf %735, %740 : vector<8x128xf32>
      %cst_306 = arith.constant 6.000000e-01 : f32
      %742 = vector.broadcast %cst_306 : f32 to vector<8x128xf32>
      %743 = arith.subf %574, %742 : vector<8x128xf32>
      %cst_307 = arith.constant 2.500000e+00 : f32
      %744 = vector.broadcast %cst_307 : f32 to vector<8x128xf32>
      %745 = arith.mulf %743, %744 : vector<8x128xf32>
      %746 = arith.mulf %745, %640 : vector<8x128xf32>
      %cst_308 = arith.constant 1.400000e+00 : f32
      %747 = vector.broadcast %cst_308 : f32 to vector<8x128xf32>
      %748 = arith.subf %747, %574 : vector<8x128xf32>
      %cst_309 = arith.constant 2.500000e+00 : f32
      %749 = vector.broadcast %cst_309 : f32 to vector<8x128xf32>
      %750 = arith.mulf %748, %749 : vector<8x128xf32>
      %751 = arith.mulf %750, %648 : vector<8x128xf32>
      %752 = arith.addf %746, %751 : vector<8x128xf32>
      %cst_310 = arith.constant 1.000000e+00 : f32
      %753 = vector.broadcast %cst_310 : f32 to vector<8x128xf32>
      %754 = arith.subf %574, %753 : vector<8x128xf32>
      %cst_311 = arith.constant 2.500000e+00 : f32
      %755 = vector.broadcast %cst_311 : f32 to vector<8x128xf32>
      %756 = arith.mulf %754, %755 : vector<8x128xf32>
      %757 = arith.mulf %756, %648 : vector<8x128xf32>
      %cst_312 = arith.constant 1.800000e+00 : f32
      %758 = vector.broadcast %cst_312 : f32 to vector<8x128xf32>
      %759 = arith.subf %758, %574 : vector<8x128xf32>
      %cst_313 = arith.constant 2.500000e+00 : f32
      %760 = vector.broadcast %cst_313 : f32 to vector<8x128xf32>
      %761 = arith.mulf %759, %760 : vector<8x128xf32>
      %762 = arith.mulf %761, %656 : vector<8x128xf32>
      %763 = arith.addf %757, %762 : vector<8x128xf32>
      %cst_314 = arith.constant 1.400000e+00 : f32
      %764 = vector.broadcast %cst_314 : f32 to vector<8x128xf32>
      %765 = arith.subf %574, %764 : vector<8x128xf32>
      %cst_315 = arith.constant 2.500000e+00 : f32
      %766 = vector.broadcast %cst_315 : f32 to vector<8x128xf32>
      %767 = arith.mulf %765, %766 : vector<8x128xf32>
      %768 = arith.mulf %767, %656 : vector<8x128xf32>
      %cst_316 = arith.constant 2.200000e+00 : f32
      %769 = vector.broadcast %cst_316 : f32 to vector<8x128xf32>
      %770 = arith.subf %769, %574 : vector<8x128xf32>
      %cst_317 = arith.constant 2.500000e+00 : f32
      %771 = vector.broadcast %cst_317 : f32 to vector<8x128xf32>
      %772 = arith.mulf %770, %771 : vector<8x128xf32>
      %773 = arith.mulf %772, %664 : vector<8x128xf32>
      %774 = arith.addf %768, %773 : vector<8x128xf32>
      %cst_318 = arith.constant -2.200000e+00 : f32
      %775 = vector.broadcast %cst_318 : f32 to vector<8x128xf32>
      %776 = arith.subf %574, %775 : vector<8x128xf32>
      %cst_319 = arith.constant 1.250000e+00 : f32
      %777 = vector.broadcast %cst_319 : f32 to vector<8x128xf32>
      %778 = arith.mulf %776, %777 : vector<8x128xf32>
      %779 = arith.mulf %778, %675 : vector<8x128xf32>
      %cst_320 = arith.constant -1.000000e+00 : f32
      %780 = vector.broadcast %cst_320 : f32 to vector<8x128xf32>
      %781 = arith.subf %780, %574 : vector<8x128xf32>
      %cst_321 = arith.constant 1.250000e+00 : f32
      %782 = vector.broadcast %cst_321 : f32 to vector<8x128xf32>
      %783 = arith.mulf %781, %782 : vector<8x128xf32>
      %784 = arith.mulf %783, %686 : vector<8x128xf32>
      %785 = arith.addf %779, %784 : vector<8x128xf32>
      %cst_322 = arith.constant -1.800000e+00 : f32
      %786 = vector.broadcast %cst_322 : f32 to vector<8x128xf32>
      %787 = arith.subf %574, %786 : vector<8x128xf32>
      %cst_323 = arith.constant 1.250000e+00 : f32
      %788 = vector.broadcast %cst_323 : f32 to vector<8x128xf32>
      %789 = arith.mulf %787, %788 : vector<8x128xf32>
      %790 = arith.mulf %789, %686 : vector<8x128xf32>
      %cst_324 = arith.constant -6.000000e-01 : f32
      %791 = vector.broadcast %cst_324 : f32 to vector<8x128xf32>
      %792 = arith.subf %791, %574 : vector<8x128xf32>
      %cst_325 = arith.constant 1.250000e+00 : f32
      %793 = vector.broadcast %cst_325 : f32 to vector<8x128xf32>
      %794 = arith.mulf %792, %793 : vector<8x128xf32>
      %795 = arith.mulf %794, %697 : vector<8x128xf32>
      %796 = arith.addf %790, %795 : vector<8x128xf32>
      %cst_326 = arith.constant -1.400000e+00 : f32
      %797 = vector.broadcast %cst_326 : f32 to vector<8x128xf32>
      %798 = arith.subf %574, %797 : vector<8x128xf32>
      %cst_327 = arith.constant 1.250000e+00 : f32
      %799 = vector.broadcast %cst_327 : f32 to vector<8x128xf32>
      %800 = arith.mulf %798, %799 : vector<8x128xf32>
      %801 = arith.mulf %800, %697 : vector<8x128xf32>
      %cst_328 = arith.constant -2.000000e-01 : f32
      %802 = vector.broadcast %cst_328 : f32 to vector<8x128xf32>
      %803 = arith.subf %802, %574 : vector<8x128xf32>
      %cst_329 = arith.constant 1.250000e+00 : f32
      %804 = vector.broadcast %cst_329 : f32 to vector<8x128xf32>
      %805 = arith.mulf %803, %804 : vector<8x128xf32>
      %806 = arith.mulf %805, %708 : vector<8x128xf32>
      %807 = arith.addf %801, %806 : vector<8x128xf32>
      %cst_330 = arith.constant -1.000000e+00 : f32
      %808 = vector.broadcast %cst_330 : f32 to vector<8x128xf32>
      %809 = arith.subf %574, %808 : vector<8x128xf32>
      %cst_331 = arith.constant 1.250000e+00 : f32
      %810 = vector.broadcast %cst_331 : f32 to vector<8x128xf32>
      %811 = arith.mulf %809, %810 : vector<8x128xf32>
      %812 = arith.mulf %811, %708 : vector<8x128xf32>
      %cst_332 = arith.constant 2.000000e-01 : f32
      %813 = vector.broadcast %cst_332 : f32 to vector<8x128xf32>
      %814 = arith.subf %813, %574 : vector<8x128xf32>
      %cst_333 = arith.constant 1.250000e+00 : f32
      %815 = vector.broadcast %cst_333 : f32 to vector<8x128xf32>
      %816 = arith.mulf %814, %815 : vector<8x128xf32>
      %817 = arith.mulf %816, %719 : vector<8x128xf32>
      %818 = arith.addf %812, %817 : vector<8x128xf32>
      %cst_334 = arith.constant -6.000000e-01 : f32
      %819 = vector.broadcast %cst_334 : f32 to vector<8x128xf32>
      %820 = arith.subf %574, %819 : vector<8x128xf32>
      %cst_335 = arith.constant 1.250000e+00 : f32
      %821 = vector.broadcast %cst_335 : f32 to vector<8x128xf32>
      %822 = arith.mulf %820, %821 : vector<8x128xf32>
      %823 = arith.mulf %822, %719 : vector<8x128xf32>
      %cst_336 = arith.constant 6.000000e-01 : f32
      %824 = vector.broadcast %cst_336 : f32 to vector<8x128xf32>
      %825 = arith.subf %824, %574 : vector<8x128xf32>
      %cst_337 = arith.constant 1.250000e+00 : f32
      %826 = vector.broadcast %cst_337 : f32 to vector<8x128xf32>
      %827 = arith.mulf %825, %826 : vector<8x128xf32>
      %828 = arith.mulf %827, %730 : vector<8x128xf32>
      %829 = arith.addf %823, %828 : vector<8x128xf32>
      %cst_338 = arith.constant -2.000000e-01 : f32
      %830 = vector.broadcast %cst_338 : f32 to vector<8x128xf32>
      %831 = arith.subf %574, %830 : vector<8x128xf32>
      %cst_339 = arith.constant 1.250000e+00 : f32
      %832 = vector.broadcast %cst_339 : f32 to vector<8x128xf32>
      %833 = arith.mulf %831, %832 : vector<8x128xf32>
      %834 = arith.mulf %833, %730 : vector<8x128xf32>
      %cst_340 = arith.constant 1.000000e+00 : f32
      %835 = vector.broadcast %cst_340 : f32 to vector<8x128xf32>
      %836 = arith.subf %835, %574 : vector<8x128xf32>
      %cst_341 = arith.constant 1.250000e+00 : f32
      %837 = vector.broadcast %cst_341 : f32 to vector<8x128xf32>
      %838 = arith.mulf %836, %837 : vector<8x128xf32>
      %839 = arith.mulf %838, %741 : vector<8x128xf32>
      %840 = arith.addf %834, %839 : vector<8x128xf32>
      %cst_342 = arith.constant 2.000000e-01 : f32
      %841 = vector.broadcast %cst_342 : f32 to vector<8x128xf32>
      %842 = arith.subf %574, %841 : vector<8x128xf32>
      %cst_343 = arith.constant 1.250000e+00 : f32
      %843 = vector.broadcast %cst_343 : f32 to vector<8x128xf32>
      %844 = arith.mulf %842, %843 : vector<8x128xf32>
      %845 = arith.mulf %844, %741 : vector<8x128xf32>
      %cst_344 = arith.constant 1.400000e+00 : f32
      %846 = vector.broadcast %cst_344 : f32 to vector<8x128xf32>
      %847 = arith.subf %846, %574 : vector<8x128xf32>
      %cst_345 = arith.constant 1.250000e+00 : f32
      %848 = vector.broadcast %cst_345 : f32 to vector<8x128xf32>
      %849 = arith.mulf %847, %848 : vector<8x128xf32>
      %850 = arith.mulf %849, %752 : vector<8x128xf32>
      %851 = arith.addf %845, %850 : vector<8x128xf32>
      %cst_346 = arith.constant 6.000000e-01 : f32
      %852 = vector.broadcast %cst_346 : f32 to vector<8x128xf32>
      %853 = arith.subf %574, %852 : vector<8x128xf32>
      %cst_347 = arith.constant 1.250000e+00 : f32
      %854 = vector.broadcast %cst_347 : f32 to vector<8x128xf32>
      %855 = arith.mulf %853, %854 : vector<8x128xf32>
      %856 = arith.mulf %855, %752 : vector<8x128xf32>
      %cst_348 = arith.constant 1.800000e+00 : f32
      %857 = vector.broadcast %cst_348 : f32 to vector<8x128xf32>
      %858 = arith.subf %857, %574 : vector<8x128xf32>
      %cst_349 = arith.constant 1.250000e+00 : f32
      %859 = vector.broadcast %cst_349 : f32 to vector<8x128xf32>
      %860 = arith.mulf %858, %859 : vector<8x128xf32>
      %861 = arith.mulf %860, %763 : vector<8x128xf32>
      %862 = arith.addf %856, %861 : vector<8x128xf32>
      %cst_350 = arith.constant 1.000000e+00 : f32
      %863 = vector.broadcast %cst_350 : f32 to vector<8x128xf32>
      %864 = arith.subf %574, %863 : vector<8x128xf32>
      %cst_351 = arith.constant 1.250000e+00 : f32
      %865 = vector.broadcast %cst_351 : f32 to vector<8x128xf32>
      %866 = arith.mulf %864, %865 : vector<8x128xf32>
      %867 = arith.mulf %866, %763 : vector<8x128xf32>
      %cst_352 = arith.constant 2.200000e+00 : f32
      %868 = vector.broadcast %cst_352 : f32 to vector<8x128xf32>
      %869 = arith.subf %868, %574 : vector<8x128xf32>
      %cst_353 = arith.constant 1.250000e+00 : f32
      %870 = vector.broadcast %cst_353 : f32 to vector<8x128xf32>
      %871 = arith.mulf %869, %870 : vector<8x128xf32>
      %872 = arith.mulf %871, %774 : vector<8x128xf32>
      %873 = arith.addf %867, %872 : vector<8x128xf32>
      %cst_354 = arith.constant -2.200000e+00 : f32
      %874 = vector.broadcast %cst_354 : f32 to vector<8x128xf32>
      %875 = arith.subf %574, %874 : vector<8x128xf32>
      %cst_355 = arith.constant 0.833333313 : f32
      %876 = vector.broadcast %cst_355 : f32 to vector<8x128xf32>
      %877 = arith.mulf %875, %876 : vector<8x128xf32>
      %878 = arith.mulf %877, %785 : vector<8x128xf32>
      %cst_356 = arith.constant -6.000000e-01 : f32
      %879 = vector.broadcast %cst_356 : f32 to vector<8x128xf32>
      %880 = arith.subf %879, %574 : vector<8x128xf32>
      %cst_357 = arith.constant 0.833333313 : f32
      %881 = vector.broadcast %cst_357 : f32 to vector<8x128xf32>
      %882 = arith.mulf %880, %881 : vector<8x128xf32>
      %883 = arith.mulf %882, %796 : vector<8x128xf32>
      %884 = arith.addf %878, %883 : vector<8x128xf32>
      %cst_358 = arith.constant -1.800000e+00 : f32
      %885 = vector.broadcast %cst_358 : f32 to vector<8x128xf32>
      %886 = arith.subf %574, %885 : vector<8x128xf32>
      %cst_359 = arith.constant 0.833333313 : f32
      %887 = vector.broadcast %cst_359 : f32 to vector<8x128xf32>
      %888 = arith.mulf %886, %887 : vector<8x128xf32>
      %889 = arith.mulf %888, %796 : vector<8x128xf32>
      %cst_360 = arith.constant -2.000000e-01 : f32
      %890 = vector.broadcast %cst_360 : f32 to vector<8x128xf32>
      %891 = arith.subf %890, %574 : vector<8x128xf32>
      %cst_361 = arith.constant 0.833333313 : f32
      %892 = vector.broadcast %cst_361 : f32 to vector<8x128xf32>
      %893 = arith.mulf %891, %892 : vector<8x128xf32>
      %894 = arith.mulf %893, %807 : vector<8x128xf32>
      %895 = arith.addf %889, %894 : vector<8x128xf32>
      %cst_362 = arith.constant -1.400000e+00 : f32
      %896 = vector.broadcast %cst_362 : f32 to vector<8x128xf32>
      %897 = arith.subf %574, %896 : vector<8x128xf32>
      %cst_363 = arith.constant 0.833333313 : f32
      %898 = vector.broadcast %cst_363 : f32 to vector<8x128xf32>
      %899 = arith.mulf %897, %898 : vector<8x128xf32>
      %900 = arith.mulf %899, %807 : vector<8x128xf32>
      %cst_364 = arith.constant 2.000000e-01 : f32
      %901 = vector.broadcast %cst_364 : f32 to vector<8x128xf32>
      %902 = arith.subf %901, %574 : vector<8x128xf32>
      %cst_365 = arith.constant 0.833333313 : f32
      %903 = vector.broadcast %cst_365 : f32 to vector<8x128xf32>
      %904 = arith.mulf %902, %903 : vector<8x128xf32>
      %905 = arith.mulf %904, %818 : vector<8x128xf32>
      %906 = arith.addf %900, %905 : vector<8x128xf32>
      %cst_366 = arith.constant -1.000000e+00 : f32
      %907 = vector.broadcast %cst_366 : f32 to vector<8x128xf32>
      %908 = arith.subf %574, %907 : vector<8x128xf32>
      %cst_367 = arith.constant 0.833333313 : f32
      %909 = vector.broadcast %cst_367 : f32 to vector<8x128xf32>
      %910 = arith.mulf %908, %909 : vector<8x128xf32>
      %911 = arith.mulf %910, %818 : vector<8x128xf32>
      %cst_368 = arith.constant 6.000000e-01 : f32
      %912 = vector.broadcast %cst_368 : f32 to vector<8x128xf32>
      %913 = arith.subf %912, %574 : vector<8x128xf32>
      %cst_369 = arith.constant 0.833333313 : f32
      %914 = vector.broadcast %cst_369 : f32 to vector<8x128xf32>
      %915 = arith.mulf %913, %914 : vector<8x128xf32>
      %916 = arith.mulf %915, %829 : vector<8x128xf32>
      %917 = arith.addf %911, %916 : vector<8x128xf32>
      %cst_370 = arith.constant -6.000000e-01 : f32
      %918 = vector.broadcast %cst_370 : f32 to vector<8x128xf32>
      %919 = arith.subf %574, %918 : vector<8x128xf32>
      %cst_371 = arith.constant 0.833333313 : f32
      %920 = vector.broadcast %cst_371 : f32 to vector<8x128xf32>
      %921 = arith.mulf %919, %920 : vector<8x128xf32>
      %922 = arith.mulf %921, %829 : vector<8x128xf32>
      %cst_372 = arith.constant 1.000000e+00 : f32
      %923 = vector.broadcast %cst_372 : f32 to vector<8x128xf32>
      %924 = arith.subf %923, %574 : vector<8x128xf32>
      %cst_373 = arith.constant 0.833333313 : f32
      %925 = vector.broadcast %cst_373 : f32 to vector<8x128xf32>
      %926 = arith.mulf %924, %925 : vector<8x128xf32>
      %927 = arith.mulf %926, %840 : vector<8x128xf32>
      %928 = arith.addf %922, %927 : vector<8x128xf32>
      %cst_374 = arith.constant -2.000000e-01 : f32
      %929 = vector.broadcast %cst_374 : f32 to vector<8x128xf32>
      %930 = arith.subf %574, %929 : vector<8x128xf32>
      %cst_375 = arith.constant 0.833333313 : f32
      %931 = vector.broadcast %cst_375 : f32 to vector<8x128xf32>
      %932 = arith.mulf %930, %931 : vector<8x128xf32>
      %933 = arith.mulf %932, %840 : vector<8x128xf32>
      %cst_376 = arith.constant 1.400000e+00 : f32
      %934 = vector.broadcast %cst_376 : f32 to vector<8x128xf32>
      %935 = arith.subf %934, %574 : vector<8x128xf32>
      %cst_377 = arith.constant 0.833333313 : f32
      %936 = vector.broadcast %cst_377 : f32 to vector<8x128xf32>
      %937 = arith.mulf %935, %936 : vector<8x128xf32>
      %938 = arith.mulf %937, %851 : vector<8x128xf32>
      %939 = arith.addf %933, %938 : vector<8x128xf32>
      %cst_378 = arith.constant 2.000000e-01 : f32
      %940 = vector.broadcast %cst_378 : f32 to vector<8x128xf32>
      %941 = arith.subf %574, %940 : vector<8x128xf32>
      %cst_379 = arith.constant 0.833333313 : f32
      %942 = vector.broadcast %cst_379 : f32 to vector<8x128xf32>
      %943 = arith.mulf %941, %942 : vector<8x128xf32>
      %944 = arith.mulf %943, %851 : vector<8x128xf32>
      %cst_380 = arith.constant 1.800000e+00 : f32
      %945 = vector.broadcast %cst_380 : f32 to vector<8x128xf32>
      %946 = arith.subf %945, %574 : vector<8x128xf32>
      %cst_381 = arith.constant 0.833333313 : f32
      %947 = vector.broadcast %cst_381 : f32 to vector<8x128xf32>
      %948 = arith.mulf %946, %947 : vector<8x128xf32>
      %949 = arith.mulf %948, %862 : vector<8x128xf32>
      %950 = arith.addf %944, %949 : vector<8x128xf32>
      %cst_382 = arith.constant 6.000000e-01 : f32
      %951 = vector.broadcast %cst_382 : f32 to vector<8x128xf32>
      %952 = arith.subf %574, %951 : vector<8x128xf32>
      %cst_383 = arith.constant 0.833333313 : f32
      %953 = vector.broadcast %cst_383 : f32 to vector<8x128xf32>
      %954 = arith.mulf %952, %953 : vector<8x128xf32>
      %955 = arith.mulf %954, %862 : vector<8x128xf32>
      %cst_384 = arith.constant 2.200000e+00 : f32
      %956 = vector.broadcast %cst_384 : f32 to vector<8x128xf32>
      %957 = arith.subf %956, %574 : vector<8x128xf32>
      %cst_385 = arith.constant 0.833333313 : f32
      %958 = vector.broadcast %cst_385 : f32 to vector<8x128xf32>
      %959 = arith.mulf %957, %958 : vector<8x128xf32>
      %960 = arith.mulf %959, %873 : vector<8x128xf32>
      %961 = arith.addf %955, %960 : vector<8x128xf32>
      %962 = tpu.concatenate %884, %895, %906, %917, %928, %939, %950, %961 in 1 : vector<8x128xf32>, vector<8x128xf32>, vector<8x128xf32>, vector<8x128xf32>, vector<8x128xf32>, vector<8x128xf32>, vector<8x128xf32>, vector<8x128xf32> -> vector<8x1024xf32>
      %963 = arith.negf %574 : vector<8x128xf32>
      %964 = math.exp %963 : vector<8x128xf32>
      %cst_386 = arith.constant 1.000000e+00 : f32
      %965 = vector.broadcast %cst_386 : f32 to vector<8x128xf32>
      %966 = arith.addf %965, %964 : vector<8x128xf32>
      %967 = arith.divf %965, %966 : vector<8x128xf32>
      %968 = arith.mulf %574, %967 : vector<8x128xf32>
      %cst_387 = arith.constant dense<0.000000e+00> : vector<8x128xf32>
      %969 = tpu.matmul %968, %575, %cst_387 {dimension_numbers = #tpu.dot_dimension_numbers<[1], [0], [0], [1], [0, 0, 1, 1], [], []>} : vector<8x128xf32>, vector<128x128xf32>, vector<8x128xf32> -> vector<8x128xf32>
      %cst_388 = arith.constant dense<0.000000e+00> : vector<8x128xf32>
      %970 = tpu.matmul %962, %576, %cst_388 {dimension_numbers = #tpu.dot_dimension_numbers<[1], [0], [0], [1], [0, 0, 1, 1], [], []>} : vector<8x1024xf32>, vector<1024x128xf32>, vector<8x128xf32> -> vector<8x128xf32>
      %971 = arith.addf %969, %970 : vector<8x128xf32>
      %972 = arith.negf %971 : vector<8x128xf32>
      %973 = math.exp %972 : vector<8x128xf32>
      %cst_389 = arith.constant 1.000000e+00 : f32
      %974 = vector.broadcast %cst_389 : f32 to vector<8x128xf32>
      %975 = arith.addf %974, %973 : vector<8x128xf32>
      %976 = arith.divf %974, %975 : vector<8x128xf32>
      %c0_390 = arith.constant 0 : index
      %c0_391 = arith.constant 0 : index
      %977 = vector.load %arg9[%c0_390, %c0_391] : memref<8x128xf32, #tpu.memory_space<vmem>>, vector<8x128xf32>
      tpu.vector_store %arg9[%c0_390, %c0_391], %976 {strides = array<i32>} : memref<8x128xf32, #tpu.memory_space<vmem>>, vector<8x128xf32>,
    } else {
    }
    return
  }
  func.func @transform_0(%arg0: i32, %arg1: i32) -> (i32, i32, i32) {
    %c0_i32 = arith.constant 0 : i32
    %c0_i32_0 = arith.constant 0 : i32
    return %arg1, %arg0, %c0_i32 : i32, i32, i32
  }
  func.func @transform_1(%arg0: i32, %arg1: i32) -> (i32, i32) {
    %c0_i32 = arith.constant 0 : i32
    %c0_i32_0 = arith.constant 0 : i32
    %c0_i32_1 = arith.constant 0 : i32
    return %c0_i32, %c0_i32_0 : i32, i32
  }
  func.func @transform_2(%arg0: i32, %arg1: i32) -> (i32, i32) {
    %c0_i32 = arith.constant 0 : i32
    %c0_i32_0 = arith.constant 0 : i32
    %c0_i32_1 = arith.constant 0 : i32
    return %c0_i32, %c0_i32_0 : i32, i32
  }
  func.func @transform_3(%arg0: i32, %arg1: i32) -> (i32, i32) {
    %c0_i32 = arith.constant 0 : i32
    %c0_i32_0 = arith.constant 0 : i32
    %c0_i32_1 = arith.constant 0 : i32
    return %c0_i32, %c0_i32_0 : i32, i32
  }
  func.func @transform_4(%arg0: i32, %arg1: i32) -> (i32, i32) {
    %c0_i32 = arith.constant 0 : i32
    %c0_i32_0 = arith.constant 0 : i32
    %c0_i32_1 = arith.constant 0 : i32
    return %c0_i32, %c0_i32_0 : i32, i32
  }
  func.func @transform_5(%arg0: i32, %arg1: i32) -> (i32, i32) {
    %c0_i32 = arith.constant 0 : i32
    %c0_i32_0 = arith.constant 0 : i32
    %c0_i32_1 = arith.constant 0 : i32
    return %c0_i32, %c0_i32_0 : i32, i32
  }
  func.func @transform_6(%arg0: i32, %arg1: i32) -> (i32, i32) {
    %c0_i32 = arith.constant 0 : i32
    %c0_i32_0 = arith.constant 0 : i32
    %c0_i32_1 = arith.constant 0 : i32
    return %c0_i32, %c0_i32_0 : i32, i32
  }
  func.func @transform_7(%arg0: i32, %arg1: i32) -> (i32, i32) {
    %c0_i32 = arith.constant 0 : i32
    %c0_i32_0 = arith.constant 0 : i32
    return %arg0, %c0_i32 : i32, i32
  }
}

</mosaic_0001>

<bundles_post_ra>
// kernel: rnn_kan_forward.1
= control target key start
LH: loop header
LB: loop body
LE: loop exit
PB: predicated region body
PF: predicated region fallthrough
CT: control target
= control target key end

     0   :  { %12 = vsyncpa [#allocation5], 0  ;;  %s3663_s24 = smov [#allocation4]   ;;  %s5231_s0 = inlined_call_operand.vmem [shape: f32[8,8,128], index: 0, kind: input, shape index: {}]   ;;  %s5232_s1 = inlined_call_operand.vmem [shape: f32[256,256], index: 1, kind: input, shape index: {}]   ;;  %s5233_s2 = inlined_call_operand.vmem [shape: f32[1,128], index: 2, kind: input, shape index: {}]   ;;  %s5234_s3 = inlined_call_operand.vmem [shape: f32[128,128], index: 3, kind: input, shape index: {}]   ;;  %s5235_s4 = inlined_call_operand.vmem [shape: f32[1024,128], index: 4, kind: input, shape index: {}]   ;;  %s5236_s5 = inlined_call_operand.vmem [shape: f32[128,128], index: 5, kind: input, shape index: {}]   ;;  %s5237_s6 = inlined_call_operand.hbm [shape: f32[1024,128], index: 6, kind: input, shape index: {}]   ;;  %s5238_s7 = inlined_call_operand.vmem [shape: f32[8,128], index: 7, kind: output, shape index: {}]  }
   0x1   :  { %s30_s25 = sshll.u32 %s3663_s24, 4  ;;  %s3639_s28 = scalar_lea.hbm %s5237_s6, 16384  ;;  %s31_s25 = int_to_ptr.vmem [resolvable:$true] %s30_s25 }
   0x2   :  { %p3640_p0 = scmp.ne.s32.totalorder %s5237_s6, %s3639_s28  ;;  %p3643_p1 = scmp.lt.u32.totalorder %s3639_s28, %s5237_s6 }
   0x4   :  { %p3645_p2 = pnand %p3643_p1, %p3640_p0 }
   0x6   :  { %3648 = shalt.err (!%p3645_p2)
}
   0x7   :  { %s3649_s10 = scalar_lea.vmem %s31_s25, 16384  ;;  %p3654_p4 = scmp.lt.s32.totalorder %s31_s25, %s31_s25 }
   0x8   :  { %p3650_p3 = scmp.ne.s32.totalorder %s31_s25, %s3649_s10  ;;  %p3655_p5 = scmp.lt.s32.totalorder %s3649_s10, %s3649_s10 }
   0xa   :  { %p3656_p6 = por %p3655_p5, %p3654_p4 }
   0xc   :  { %p3657_p7 = pnand %p3656_p6, %p3650_p3 }
   0xe   :  { %3660 = shalt.err (!%p3657_p7)
}
   0xf   :  { %s3664_s11 = smov 128   ;;  %s3665_s12 = smov 8  }
  0x10   :  { %36 = dma.hbm_to_vmem [thread:$0]  %s5237_s6, 16384, %s31_s25, [#allocation5], %s3664_s11, %s3664_s11, %s3665_s12  }
  0x11   :  { %3661 = dma.done.wait [#allocation5], 16384  }
  0x12   :  { %3662 = vsyncadd [#allocation5], 4294950912  ;;  %v3666_v0 = vmov 0.0   ;;  %v50_v1 = vld [vmem:[%s5232_s1 + $0x8] sm:$0xff]  ;;  %v52_v2 = vld [vmem:[%s5232_s1 + $0x18] sm:$0xff] }
  0x13   :  { %177 = vmatprep.mubr.f32.mxu0 %v3666_v0  ;;  %v49_v3 = vld [vmem:[%s5232_s1] sm:$0xff]  ;;  %v3731_v4 = vpack.c.bf16 %v52_v2, %v50_v1  ;;  %v51_v5 = vld [vmem:[%s5232_s1 + $0x10] sm:$0xff]  ;;  %v54_v6 = vld [vmem:[%s5232_s1 + $0x28] sm:$0xff] }
  0x14   :  { %v56_v7 = vld [vmem:[%s5232_s1 + $0x38] sm:$0xff]  ;;  %v3742_v8 = vpack.c.bf16 %v51_v5, %v49_v3  ;;  %v53_v10 = vld [vmem:[%s5232_s1 + $0x20] sm:$0xff]  ;;  %v55_v11 = vld [vmem:[%s5232_s1 + $0x30] sm:$0xff] }
  0x15   :  { %v3744_v9 = vpack.c.bf16 %v56_v7, %v54_v6  ;;  %v58_v12 = vld [vmem:[%s5232_s1 + $0x48] sm:$0xff]  ;;  %2708 = vmatprep.subr.bf16.mxu0 %v3731_v4  ;;  %v60_v13 = vld [vmem:[%s5232_s1 + $0x58] sm:$0xff]  ;;  %2772 = vmatprep.subr.bf16.mxu1 %v3731_v4  ;;  %v3761_v14 = vpack.c.bf16 %v55_v11, %v53_v10  ;;  %v57_v16 = vld [vmem:[%s5232_s1 + $0x40] sm:$0xff] }
  0x16   :  { %2710 = vmatpush1.bf16.msra.mxu0 %v3742_v8  ;;  %2774 = vmatpush1.bf16.msra.mxu1 %v3742_v8  ;;  %v3765_v15 = vpack.c.bf16 %v60_v13, %v58_v12  ;;  %v59_v17 = vld [vmem:[%s5232_s1 + $0x50] sm:$0xff]  ;;  %v62_v18 = vld [vmem:[%s5232_s1 + $0x68] sm:$0xff]  ;;  %v64_v19 = vld [vmem:[%s5232_s1 + $0x78] sm:$0xff] }
  0x17   :  { %2712 = vmatprep.subr.bf16.mxu0 %v3744_v9  ;;  %2776 = vmatprep.subr.bf16.mxu1 %v3744_v9  ;;  %v3781_v20 = vpack.c.bf16 %v59_v17, %v57_v16  ;;  %v3785_v21 = vpack.c.bf16 %v64_v19, %v62_v18  ;;  %v61_v22 = vld [vmem:[%s5232_s1 + $0x60] sm:$0xff]  ;;  %v63_v23 = vld [vmem:[%s5232_s1 + $0x70] sm:$0xff]  ;;  %v66_v24 = vld [vmem:[%s5232_s1 + $0x88] sm:$0xff] }
  0x18   :  { %v68_v25 = vld [vmem:[%s5232_s1 + $0x98] sm:$0xff]  ;;  %v3801_v26 = vpack.c.bf16 %v63_v23, %v61_v22  ;;  %v65_v28 = vld [vmem:[%s5232_s1 + $0x80] sm:$0xff]  ;;  %v67_v29 = vld [vmem:[%s5232_s1 + $0x90] sm:$0xff] }
  0x19   :  { %v3805_v27 = vpack.c.bf16 %v68_v25, %v66_v24  ;;  %v70_v30 = vld [vmem:[%s5232_s1 + $0xa8] sm:$0xff]  ;;  %v72_v31 = vld [vmem:[%s5232_s1 + $0xb8] sm:$0xff]  ;;  %v3821_v32 = vpack.c.bf16 %v67_v29, %v65_v28  ;;  %v69_v34 = vld [vmem:[%s5232_s1 + $0xa0] sm:$0xff] }
  0x1a   :  { %2714 = vmatpush1.bf16.msra.mxu0 %v3761_v14  ;;  %2778 = vmatpush1.bf16.msra.mxu1 %v3761_v14  ;;  %v3825_v33 = vpack.c.bf16 %v72_v31, %v70_v30  ;;  %v71_v35 = vld [vmem:[%s5232_s1 + $0xb0] sm:$0xff]  ;;  %v74_v36 = vld [vmem:[%s5232_s1 + $0xc8] sm:$0xff]  ;;  %v76_v37 = vld [vmem:[%s5232_s1 + $0xd8] sm:$0xff] }
  0x1b   :  { %2716 = vmatprep.subr.bf16.mxu0 %v3765_v15  ;;  %2780 = vmatprep.subr.bf16.mxu1 %v3765_v15  ;;  %v3841_v38 = vpack.c.bf16 %v71_v35, %v69_v34  ;;  %v3845_v39 = vpack.c.bf16 %v76_v37, %v74_v36  ;;  %v73_v40 = vld [vmem:[%s5232_s1 + $0xc0] sm:$0xff]  ;;  %v75_v41 = vld [vmem:[%s5232_s1 + $0xd0] sm:$0xff]  ;;  %v78_v42 = vld [vmem:[%s5232_s1 + $0xe8] sm:$0xff] }
  0x1c   :  { %v80_v43 = vld [vmem:[%s5232_s1 + $0xf8] sm:$0xff]  ;;  %v3861_v44 = vpack.c.bf16 %v75_v41, %v73_v40  ;;  %v77_v46 = vld [vmem:[%s5232_s1 + $0xe0] sm:$0xff]  ;;  %v79_v47 = vld [vmem:[%s5232_s1 + $0xf0] sm:$0xff] }
  0x1d   :  { %v3865_v45 = vpack.c.bf16 %v80_v43, %v78_v42  ;;  %v82_v48 = vld [vmem:[%s5232_s1 + $0x108] sm:$0xff]  ;;  %v84_v49 = vld [vmem:[%s5232_s1 + $0x118] sm:$0xff]  ;;  %v3881_v50 = vpack.c.bf16 %v79_v47, %v77_v46  ;;  %v81_v52 = vld [vmem:[%s5232_s1 + $0x100] sm:$0xff] }
  0x1e   :  { %2718 = vmatpush1.bf16.msra.mxu0 %v3781_v20  ;;  %2782 = vmatpush1.bf16.msra.mxu1 %v3781_v20  ;;  %v3885_v51 = vpack.c.bf16 %v84_v49, %v82_v48  ;;  %v83_v53 = vld [vmem:[%s5232_s1 + $0x110] sm:$0xff]  ;;  %v86_v54 = vld [vmem:[%s5232_s1 + $0x128] sm:$0xff]  ;;  %v88_v55 = vld [vmem:[%s5232_s1 + $0x138] sm:$0xff] }
  0x1f   :  { %2720 = vmatprep.subr.bf16.mxu0 %v3785_v21  ;;  %2784 = vmatprep.subr.bf16.mxu1 %v3785_v21  ;;  %v3901_v56 = vpack.c.bf16 %v83_v53, %v81_v52  ;;  %v3905_v57 = vpack.c.bf16 %v88_v55, %v86_v54  ;;  %v85_v58 = vld [vmem:[%s5232_s1 + $0x120] sm:$0xff]  ;;  %v87_v59 = vld [vmem:[%s5232_s1 + $0x130] sm:$0xff]  ;;  %v90_v60 = vld [vmem:[%s5232_s1 + $0x148] sm:$0xff] }
  0x20   :  { %v92_v61 = vld [vmem:[%s5232_s1 + $0x158] sm:$0xff]  ;;  %v3921_v62 = vpack.c.bf16 %v87_v59, %v85_v58  ;;  %v89_v1 = vld [vmem:[%s5232_s1 + $0x140] sm:$0xff]  ;;  %v91_v2 = vld [vmem:[%s5232_s1 + $0x150] sm:$0xff] }
  0x21   :  { %v3925_v63 = vpack.c.bf16 %v92_v61, %v90_v60  ;;  %v94_v3 = vld [vmem:[%s5232_s1 + $0x168] sm:$0xff]  ;;  %v96_v5 = vld [vmem:[%s5232_s1 + $0x178] sm:$0xff]  ;;  %v3941_v6 = vpack.c.bf16 %v91_v2, %v89_v1  ;;  %v93_v10 = vld [vmem:[%s5232_s1 + $0x160] sm:$0xff] }
  0x22   :  { %2722 = vmatpush1.bf16.msra.mxu0 %v3801_v26  ;;  %2786 = vmatpush1.bf16.msra.mxu1 %v3801_v26  ;;  %v3945_v7 = vpack.c.bf16 %v96_v5, %v94_v3  ;;  %v95_v11 = vld [vmem:[%s5232_s1 + $0x170] sm:$0xff]  ;;  %v98_v12 = vld [vmem:[%s5232_s1 + $0x188] sm:$0xff]  ;;  %v100_v13 = vld [vmem:[%s5232_s1 + $0x198] sm:$0xff] }
  0x23   :  { %2724 = vmatprep.subr.bf16.mxu0 %v3805_v27  ;;  %2788 = vmatprep.subr.bf16.mxu1 %v3805_v27  ;;  %v3961_v16 = vpack.c.bf16 %v95_v11, %v93_v10  ;;  %v3965_v17 = vpack.c.bf16 %v100_v13, %v98_v12  ;;  %v97_v18 = vld [vmem:[%s5232_s1 + $0x180] sm:$0xff]  ;;  %v99_v19 = vld [vmem:[%s5232_s1 + $0x190] sm:$0xff]  ;;  %v102_v22 = vld [vmem:[%s5232_s1 + $0x1a8] sm:$0xff] }
  0x24   :  { %v104_v23 = vld [vmem:[%s5232_s1 + $0x1b8] sm:$0xff]  ;;  %v3981_v24 = vpack.c.bf16 %v99_v19, %v97_v18  ;;  %v101_v28 = vld [vmem:[%s5232_s1 + $0x1a0] sm:$0xff]  ;;  %v103_v29 = vld [vmem:[%s5232_s1 + $0x1b0] sm:$0xff] }
  0x25   :  { %v3985_v25 = vpack.c.bf16 %v104_v23, %v102_v22  ;;  %v106_v30 = vld [vmem:[%s5232_s1 + $0x1c8] sm:$0xff]  ;;  %v108_v31 = vld [vmem:[%s5232_s1 + $0x1d8] sm:$0xff]  ;;  %v4001_v34 = vpack.c.bf16 %v103_v29, %v101_v28  ;;  %v105_v36 = vld [vmem:[%s5232_s1 + $0x1c0] sm:$0xff] }
  0x26   :  { %2726 = vmatpush1.bf16.msra.mxu0 %v3821_v32  ;;  %2790 = vmatpush1.bf16.msra.mxu1 %v3821_v32  ;;  %v4005_v35 = vpack.c.bf16 %v108_v31, %v106_v30  ;;  %v107_v37 = vld [vmem:[%s5232_s1 + $0x1d0] sm:$0xff]  ;;  %v110_v40 = vld [vmem:[%s5232_s1 + $0x1e8] sm:$0xff]  ;;  %v112_v41 = vld [vmem:[%s5232_s1 + $0x1f8] sm:$0xff] }
  0x27   :  { %2728 = vmatprep.subr.bf16.mxu0 %v3825_v33  ;;  %2792 = vmatprep.subr.bf16.mxu1 %v3825_v33  ;;  %v4021_v42 = vpack.c.bf16 %v107_v37, %v105_v36  ;;  %v4025_v43 = vpack.c.bf16 %v112_v41, %v110_v40  ;;  %v109_v46 = vld [vmem:[%s5232_s1 + $0x1e0] sm:$0xff]  ;;  %v111_v47 = vld [vmem:[%s5232_s1 + $0x1f0] sm:$0xff]  ;;  %v2293_v1 = vld [vmem:[%s5231_s0 + $0x8] sm:$0xff] }
  0x28   :  { %v4035_v48 = vpack.c.bf16 %v111_v47, %v109_v46  ;;  %v4080_v49 = vld [vmem:[%s5233_s2] ss:$0 sm:$0xff]  ;;  %v2294_v13 = vld [vmem:[%s5231_s0 + $0x10] sm:$0xff]  ;;  %v2295_v30 = vld [vmem:[%s5231_s0 + $0x18] sm:$0xff] }
  0x29   :  { %v184_v53 = vld [vmem:[%s5231_s0] sm:$0xff] }
  0x2a   :  { %2730 = vmatpush1.bf16.msra.mxu0 %v3841_v38  ;;  %2794 = vmatpush1.bf16.msra.mxu1 %v3841_v38  ;;  %v2296_v47 = vld [vmem:[%s5231_s0 + $0x20] sm:$0xff] }
  0x2b   :  { %2732 = vmatprep.subr.bf16.mxu0 %v3845_v39  ;;  %2796 = vmatprep.subr.bf16.mxu1 %v3845_v39 }
  0x2e   :  { %2734 = vmatpush1.bf16.msra.mxu0 %v3861_v44  ;;  %2798 = vmatpush1.bf16.msra.mxu1 %v3861_v44 }
  0x2f   :  { %2736 = vmatprep.subr.bf16.mxu0 %v3865_v45  ;;  %2800 = vmatprep.subr.bf16.mxu1 %v3865_v45 }
  0x32   :  { %2738 = vmatpush1.bf16.msra.mxu0 %v3881_v50  ;;  %2802 = vmatpush1.bf16.msra.mxu1 %v3881_v50 }
  0x33   :  { %2740 = vmatprep.subr.bf16.mxu0 %v3885_v51  ;;  %2804 = vmatprep.subr.bf16.mxu1 %v3885_v51 }
  0x36   :  { %2742 = vmatpush1.bf16.msra.mxu0 %v3901_v56  ;;  %2806 = vmatpush1.bf16.msra.mxu1 %v3901_v56 }
  0x37   :  { %2744 = vmatprep.subr.bf16.mxu0 %v3905_v57  ;;  %2808 = vmatprep.subr.bf16.mxu1 %v3905_v57 }
  0x3a   :  { %2746 = vmatpush1.bf16.msra.mxu0 %v3921_v62  ;;  %2810 = vmatpush1.bf16.msra.mxu1 %v3921_v62 }
  0x3b   :  { %2748 = vmatprep.subr.bf16.mxu0 %v3925_v63  ;;  %2812 = vmatprep.subr.bf16.mxu1 %v3925_v63 }
  0x3e   :  { %2750 = vmatpush1.bf16.msra.mxu0 %v3941_v6  ;;  %2814 = vmatpush1.bf16.msra.mxu1 %v3941_v6 }
  0x3f   :  { %2752 = vmatprep.subr.bf16.mxu0 %v3945_v7  ;;  %2816 = vmatprep.subr.bf16.mxu1 %v3945_v7 }
  0x42   :  { %2754 = vmatpush1.bf16.msra.mxu0 %v3961_v16  ;;  %2818 = vmatpush1.bf16.msra.mxu1 %v3961_v16 }
  0x43   :  { %2756 = vmatprep.subr.bf16.mxu0 %v3965_v17  ;;  %2820 = vmatprep.subr.bf16.mxu1 %v3965_v17 }
  0x46   :  { %2758 = vmatpush1.bf16.msra.mxu0 %v3981_v24  ;;  %2822 = vmatpush1.bf16.msra.mxu1 %v3981_v24 }
  0x47   :  { %2760 = vmatprep.subr.bf16.mxu0 %v3985_v25  ;;  %2824 = vmatprep.subr.bf16.mxu1 %v3985_v25 }
  0x4a   :  { %2762 = vmatpush1.bf16.msra.mxu0 %v4001_v34  ;;  %2826 = vmatpush1.bf16.msra.mxu1 %v4001_v34 }
  0x4b   :  { %2764 = vmatprep.subr.bf16.mxu0 %v4005_v35  ;;  %2828 = vmatprep.subr.bf16.mxu1 %v4005_v35 }
  0x4e   :  { %2766 = vmatpush1.bf16.msra.mxu0 %v4021_v42  ;;  %2830 = vmatpush1.bf16.msra.mxu1 %v4021_v42 }
  0x4f   :  { %2768 = vmatprep.subr.bf16.mxu0 %v4025_v43  ;;  %2832 = vmatprep.subr.bf16.mxu1 %v4025_v43 }
  0x52   :  { %2770 = vmatpush1.bf16.msra.mxu0 %v4035_v48  ;;  %2834 = vmatpush1.bf16.msra.mxu1 %v4035_v48 }
  0x53   :  { %2836 = vmatprep.subr.bf16.mxu0 %v3731_v4  ;;  %2900 = vmatprep.subr.bf16.mxu1 %v3731_v4 }
  0x55   :  { %178 = vmatmul.mubr.f32.vlgmr.msra.gmra.mrb[0].mxu0 %v3666_v0 }
  0x56   :  { %2838 = vmatpush1.bf16.msra.mxu0 %v3742_v8 }
  0x57   :  { %2840 = vmatprep.subr.bf16.mxu0 %v3744_v9 }
  0x5a   :  { %2842 = vmatpush1.bf16.msra.mxu0 %v3761_v14 }
  0x5b   :  { %2844 = vmatprep.subr.bf16.mxu0 %v3765_v15 }
  0x5e   :  { %2846 = vmatpush1.bf16.msra.mxu0 %v3781_v20 }
  0x5f   :  { %2848 = vmatprep.subr.bf16.mxu0 %v3785_v21 }
  0x62   :  { %2850 = vmatpush1.bf16.msra.mxu0 %v3801_v26 }
  0x63   :  { %2852 = vmatprep.subr.bf16.mxu0 %v3805_v27 }
  0x66   :  { %2854 = vmatpush1.bf16.msra.mxu0 %v3821_v32 }
  0x67   :  { %2856 = vmatprep.subr.bf16.mxu0 %v3825_v33 }
  0x6a   :  { %2858 = vmatpush1.bf16.msra.mxu0 %v3841_v38 }
  0x6b   :  { %2860 = vmatprep.subr.bf16.mxu0 %v3845_v39 }
  0x6e   :  { %2862 = vmatpush1.bf16.msra.mxu0 %v3861_v44 }
  0x6f   :  { %2864 = vmatprep.subr.bf16.mxu0 %v3865_v45 }
  0x72   :  { %2866 = vmatpush1.bf16.msra.mxu0 %v3881_v50 }
  0x73   :  { %2868 = vmatprep.subr.bf16.mxu0 %v3885_v51 }
  0x76   :  { %2870 = vmatpush1.bf16.msra.mxu0 %v3901_v56 }
  0x77   :  { %2872 = vmatprep.subr.bf16.mxu0 %v3905_v57 }
  0x7a   :  { %2874 = vmatpush1.bf16.msra.mxu0 %v3921_v62 }
  0x7b   :  { %2876 = vmatprep.subr.bf16.mxu0 %v3925_v63 }
  0x7e   :  { %2878 = vmatpush1.bf16.msra.mxu0 %v3941_v6 }
  0x7f   :  { %2880 = vmatprep.subr.bf16.mxu0 %v3945_v7 }
  0x82   :  { %2882 = vmatpush1.bf16.msra.mxu0 %v3961_v16 }
  0x83   :  { %2884 = vmatprep.subr.bf16.mxu0 %v3965_v17 }
  0x86   :  { %2886 = vmatpush1.bf16.msra.mxu0 %v3981_v24 }
  0x87   :  { %2888 = vmatprep.subr.bf16.mxu0 %v3985_v25 }
  0x8a   :  { %2890 = vmatpush1.bf16.msra.mxu0 %v4001_v34 }
  0x8b   :  { %2892 = vmatprep.subr.bf16.mxu0 %v4005_v35 }
  0x8e   :  { %2894 = vmatpush1.bf16.msra.mxu0 %v4021_v42 }
  0x8f   :  { %2896 = vmatprep.subr.bf16.mxu0 %v4025_v43 }
  0x92   :  { %2898 = vmatpush1.bf16.msra.mxu0 %v4035_v48 }
  0x93   :  { %2964 = vmatprep.subr.bf16.mxu0 %v3731_v4 }
 0x128   :  { %v179_v52 = vpop.f32.mrb[0].mxu0 }
 0x129   :  { %v181_v54 = vpop.f32.mrb[1].mxu0  ;;  %v185_v58 = vadd.f32 %v184_v53, %v179_v52 }
 0x12a   :  { %v193_v55 = vadd.f32 %v4080_v49, %v181_v54 }
 0x12c   :  { %3593 = vtanh.f32 %v193_v55 }
 0x12d   :  { %3595 = vtanh.f32 %v185_v58 }
 0x136   :  { %v3594_v59 = vpop.eup %3593 }
 0x137   :  { %v199_v60 = vmul.f32 0.0, %v3594_v59  ;;  %v3596_v61 = vpop.eup %3595 }
 0x139   :  { %264 = vmatprep.mubr.f32.mxu1 %v199_v60 }
 0x13a   :  { %265 = vmatmul.mubr.f32.vlgmr.msra.gmra.mrb[0].mxu1 %v3596_v61 }
 0x13b   :  { %2902 = vmatpush1.bf16.msra.mxu1 %v3742_v8 }
 0x13c   :  { %2904 = vmatprep.subr.bf16.mxu1 %v3744_v9 }
 0x13f   :  { %2906 = vmatpush1.bf16.msra.mxu1 %v3761_v14 }
 0x140   :  { %2908 = vmatprep.subr.bf16.mxu1 %v3765_v15 }
 0x143   :  { %2910 = vmatpush1.bf16.msra.mxu1 %v3781_v20 }
 0x144   :  { %2912 = vmatprep.subr.bf16.mxu1 %v3785_v21 }
 0x147   :  { %2914 = vmatpush1.bf16.msra.mxu1 %v3801_v26 }
 0x148   :  { %2916 = vmatprep.subr.bf16.mxu1 %v3805_v27 }
 0x14b   :  { %2918 = vmatpush1.bf16.msra.mxu1 %v3821_v32 }
 0x14c   :  { %2920 = vmatprep.subr.bf16.mxu1 %v3825_v33 }
 0x14f   :  { %2922 = vmatpush1.bf16.msra.mxu1 %v3841_v38 }
 0x150   :  { %2924 = vmatprep.subr.bf16.mxu1 %v3845_v39 }
 0x153   :  { %2926 = vmatpush1.bf16.msra.mxu1 %v3861_v44 }
 0x154   :  { %2928 = vmatprep.subr.bf16.mxu1 %v3865_v45 }
 0x157   :  { %2930 = vmatpush1.bf16.msra.mxu1 %v3881_v50 }
 0x158   :  { %2932 = vmatprep.subr.bf16.mxu1 %v3885_v51 }
 0x15b   :  { %2934 = vmatpush1.bf16.msra.mxu1 %v3901_v56 }
 0x15c   :  { %2936 = vmatprep.subr.bf16.mxu1 %v3905_v57 }
 0x15f   :  { %2938 = vmatpush1.bf16.msra.mxu1 %v3921_v62 }
 0x160   :  { %2940 = vmatprep.subr.bf16.mxu1 %v3925_v63 }
 0x163   :  { %2942 = vmatpush1.bf16.msra.mxu1 %v3941_v6 }
 0x164   :  { %2944 = vmatprep.subr.bf16.mxu1 %v3945_v7 }
 0x167   :  { %2946 = vmatpush1.bf16.msra.mxu1 %v3961_v16 }
 0x168   :  { %2948 = vmatprep.subr.bf16.mxu1 %v3965_v17 }
 0x16b   :  { %2950 = vmatpush1.bf16.msra.mxu1 %v3981_v24 }
 0x16c   :  { %2952 = vmatprep.subr.bf16.mxu1 %v3985_v25 }
 0x16f   :  { %2954 = vmatpush1.bf16.msra.mxu1 %v4001_v34 }
 0x170   :  { %2956 = vmatprep.subr.bf16.mxu1 %v4005_v35 }
 0x173   :  { %2958 = vmatpush1.bf16.msra.mxu1 %v4021_v42 }
 0x174   :  { %2960 = vmatprep.subr.bf16.mxu1 %v4025_v43 }
 0x177   :  { %2962 = vmatpush1.bf16.msra.mxu1 %v4035_v48 }
 0x178   :  { %3028 = vmatprep.subr.bf16.mxu1 %v3731_v4 }
 0x20d   :  { %v266_v2 = vpop.f32.mrb[0].mxu1 }
 0x20e   :  { %v273_v3 = vadd.f32 %v2293_v1, %v266_v2  ;;  %v268_v5 = vpop.f32.mrb[1].mxu1 }
 0x20f   :  { %v275_v10 = vadd.f32 %v4080_v49, %v268_v5 }
 0x211   :  { %3597 = vtanh.f32 %v275_v10  ;;  %v898_v10 = vld [vmem:[%s5235_s4 + $0x10] sm:$0xff] }
 0x212   :  { %3599 = vtanh.f32 %v273_v3 }
 0x21b   :  { %v3598_v11 = vpop.eup %3597 }
 0x21c   :  { %v3600_v12 = vpop.eup %3599  ;;  %341 = vmatprep.mubr.f32.mxu0 %v3598_v11  ;;  %v899_v11 = vld [vmem:[%s5235_s4 + $0x18] sm:$0xff] }
 0x21d   :  { %342 = vmatmul.mubr.f32.vlgmr.msra.gmra.mrb[2].mxu0 %v3600_v12 }
 0x21e   :  { %2966 = vmatpush1.bf16.msra.mxu0 %v3742_v8 }
 0x21f   :  { %2968 = vmatprep.subr.bf16.mxu0 %v3744_v9 }
 0x222   :  { %2970 = vmatpush1.bf16.msra.mxu0 %v3761_v14 }
 0x223   :  { %2972 = vmatprep.subr.bf16.mxu0 %v3765_v15 }
 0x226   :  { %2974 = vmatpush1.bf16.msra.mxu0 %v3781_v20 }
 0x227   :  { %2976 = vmatprep.subr.bf16.mxu0 %v3785_v21 }
 0x22a   :  { %2978 = vmatpush1.bf16.msra.mxu0 %v3801_v26 }
 0x22b   :  { %2980 = vmatprep.subr.bf16.mxu0 %v3805_v27 }
 0x22e   :  { %2982 = vmatpush1.bf16.msra.mxu0 %v3821_v32 }
 0x22f   :  { %2984 = vmatprep.subr.bf16.mxu0 %v3825_v33 }
 0x232   :  { %2986 = vmatpush1.bf16.msra.mxu0 %v3841_v38 }
 0x233   :  { %2988 = vmatprep.subr.bf16.mxu0 %v3845_v39 }
 0x236   :  { %2990 = vmatpush1.bf16.msra.mxu0 %v3861_v44 }
 0x237   :  { %2992 = vmatprep.subr.bf16.mxu0 %v3865_v45 }
 0x23a   :  { %2994 = vmatpush1.bf16.msra.mxu0 %v3881_v50 }
 0x23b   :  { %2996 = vmatprep.subr.bf16.mxu0 %v3885_v51 }
 0x23e   :  { %2998 = vmatpush1.bf16.msra.mxu0 %v3901_v56 }
 0x23f   :  { %3000 = vmatprep.subr.bf16.mxu0 %v3905_v57 }
 0x242   :  { %3002 = vmatpush1.bf16.msra.mxu0 %v3921_v62 }
 0x243   :  { %3004 = vmatprep.subr.bf16.mxu0 %v3925_v63 }
 0x246   :  { %3006 = vmatpush1.bf16.msra.mxu0 %v3941_v6 }
 0x247   :  { %3008 = vmatprep.subr.bf16.mxu0 %v3945_v7 }
 0x24a   :  { %3010 = vmatpush1.bf16.msra.mxu0 %v3961_v16 }
 0x24b   :  { %3012 = vmatprep.subr.bf16.mxu0 %v3965_v17 }
 0x24e   :  { %3014 = vmatpush1.bf16.msra.mxu0 %v3981_v24 }
 0x24f   :  { %3016 = vmatprep.subr.bf16.mxu0 %v3985_v25 }
 0x252   :  { %3018 = vmatpush1.bf16.msra.mxu0 %v4001_v34 }
 0x253   :  { %3020 = vmatprep.subr.bf16.mxu0 %v4005_v35 }
 0x256   :  { %3022 = vmatpush1.bf16.msra.mxu0 %v4021_v42 }
 0x257   :  { %3024 = vmatprep.subr.bf16.mxu0 %v4025_v43 }
 0x25a   :  { %3026 = vmatpush1.bf16.msra.mxu0 %v4035_v48 }
 0x25b   :  { %3092 = vmatprep.subr.bf16.mxu0 %v3731_v4 }
 0x2f0   :  { %v343_v18 = vpop.f32.mrb[2].mxu0 }
 0x2f1   :  { %v350_v19 = vadd.f32 %v2294_v13, %v343_v18  ;;  %v345_v22 = vpop.f32.mrb[3].mxu0  ;;  %v3289_v13 = vpack.c.bf16 %v899_v11, %v898_v10  ;;  %v962_v18 = vld [vmem:[%s5235_s4 + $0x210] sm:$0xff]  ;;  %v972_v10 = vld [vmem:[%s5235_s4 + $0x260] sm:$0xff] }
 0x2f2   :  { %v352_v23 = vadd.f32 %v4080_v49, %v345_v22 }
 0x2f4   :  { %3601 = vtanh.f32 %v352_v23  ;;  %v916_v23 = vld [vmem:[%s5235_s4 + $0xa0] sm:$0xff] }
 0x2f5   :  { %3603 = vtanh.f32 %v350_v19  ;;  %v963_v19 = vld [vmem:[%s5235_s4 + $0x218] sm:$0xff] }
 0x2f6   :  { %v3353_v22 = vpack.c.bf16 %v963_v19, %v962_v18  ;;  %v927_v18 = vld [vmem:[%s5235_s4 + $0xf8] sm:$0xff]  ;;  %v990_v19 = vld [vmem:[%s5235_s4 + $0x2f0] sm:$0xff] }
 0x2fe   :  { %v3602_v28 = vpop.eup %3601 }
 0x2ff   :  { %v3604_v29 = vpop.eup %3603  ;;  %418 = vmatprep.mubr.f32.mxu1 %v3602_v28  ;;  %v917_v28 = vld [vmem:[%s5235_s4 + $0xa8] sm:$0xff] }
 0x300   :  { %419 = vmatmul.mubr.f32.vlgmr.msra.gmra.mrb[2].mxu1 %v3604_v29  ;;  %v980_v29 = vld [vmem:[%s5235_s4 + $0x2a0] sm:$0xff] }
 0x301   :  { %3030 = vmatpush1.bf16.msra.mxu1 %v3742_v8 }
 0x302   :  { %3032 = vmatprep.subr.bf16.mxu1 %v3744_v9 }
 0x305   :  { %3034 = vmatpush1.bf16.msra.mxu1 %v3761_v14 }
 0x306   :  { %3036 = vmatprep.subr.bf16.mxu1 %v3765_v15 }
 0x309   :  { %3038 = vmatpush1.bf16.msra.mxu1 %v3781_v20 }
 0x30a   :  { %3040 = vmatprep.subr.bf16.mxu1 %v3785_v21 }
 0x30d   :  { %3042 = vmatpush1.bf16.msra.mxu1 %v3801_v26 }
 0x30e   :  { %3044 = vmatprep.subr.bf16.mxu1 %v3805_v27 }
 0x311   :  { %3046 = vmatpush1.bf16.msra.mxu1 %v3821_v32 }
 0x312   :  { %3048 = vmatprep.subr.bf16.mxu1 %v3825_v33 }
 0x315   :  { %3050 = vmatpush1.bf16.msra.mxu1 %v3841_v38 }
 0x316   :  { %3052 = vmatprep.subr.bf16.mxu1 %v3845_v39 }
 0x319   :  { %3054 = vmatpush1.bf16.msra.mxu1 %v3861_v44 }
 0x31a   :  { %3056 = vmatprep.subr.bf16.mxu1 %v3865_v45 }
 0x31d   :  { %3058 = vmatpush1.bf16.msra.mxu1 %v3881_v50 }
 0x31e   :  { %3060 = vmatprep.subr.bf16.mxu1 %v3885_v51 }
 0x321   :  { %3062 = vmatpush1.bf16.msra.mxu1 %v3901_v56 }
 0x322   :  { %3064 = vmatprep.subr.bf16.mxu1 %v3905_v57 }
 0x325   :  { %3066 = vmatpush1.bf16.msra.mxu1 %v3921_v62 }
 0x326   :  { %3068 = vmatprep.subr.bf16.mxu1 %v3925_v63 }
 0x329   :  { %3070 = vmatpush1.bf16.msra.mxu1 %v3941_v6 }
 0x32a   :  { %3072 = vmatprep.subr.bf16.mxu1 %v3945_v7 }
 0x32d   :  { %3074 = vmatpush1.bf16.msra.mxu1 %v3961_v16 }
 0x32e   :  { %3076 = vmatprep.subr.bf16.mxu1 %v3965_v17 }
 0x331   :  { %3078 = vmatpush1.bf16.msra.mxu1 %v3981_v24 }
 0x332   :  { %3080 = vmatprep.subr.bf16.mxu1 %v3985_v25 }
 0x335   :  { %3082 = vmatpush1.bf16.msra.mxu1 %v4001_v34 }
 0x336   :  { %3084 = vmatprep.subr.bf16.mxu1 %v4005_v35 }
 0x339   :  { %3086 = vmatpush1.bf16.msra.mxu1 %v4021_v42 }
 0x33a   :  { %3088 = vmatprep.subr.bf16.mxu1 %v4025_v43 }
 0x33d   :  { %3090 = vmatpush1.bf16.msra.mxu1 %v4035_v48 }
 0x33e   :  { %3156 = vmatprep.subr.bf16.mxu1 %v3731_v4 }
 0x3d3   :  { %v420_v31 = vpop.f32.mrb[2].mxu1 }
 0x3d4   :  { %v427_v36 = vadd.f32 %v2295_v30, %v420_v31  ;;  %v422_v37 = vpop.f32.mrb[3].mxu1  ;;  %v3291_v30 = vpack.c.bf16 %v917_v28, %v916_v23  ;;  %v981_v31 = vld [vmem:[%s5235_s4 + $0x2a8] sm:$0xff] }
 0x3d5   :  { %v429_v40 = vadd.f32 %v4080_v49, %v422_v37  ;;  %v901_v37 = vld [vmem:[%s5235_s4 + $0x28] sm:$0xff] }
 0x3d7   :  { %3605 = vtanh.f32 %v429_v40  ;;  %v3355_v40 = vpack.c.bf16 %v981_v31, %v980_v29  ;;  %v911_v31 = vld [vmem:[%s5235_s4 + $0x78] sm:$0xff] }
 0x3d8   :  { %3607 = vtanh.f32 %v427_v36  ;;  %v900_v36 = vld [vmem:[%s5235_s4 + $0x20] sm:$0xff] }
 0x3e1   :  { %v3606_v41 = vpop.eup %3605 }
 0x3e2   :  { %v3608_v46 = vpop.eup %3607  ;;  %495 = vmatprep.mubr.f32.mxu0 %v3606_v41  ;;  %v3293_v41 = vpack.c.bf16 %v901_v37, %v900_v36  ;;  %v974_v37 = vld [vmem:[%s5235_s4 + $0x270] sm:$0xff] }
 0x3e3   :  { %496 = vmatmul.mubr.f32.vlgmr.msra.gmra.mrb[4].mxu0 %v3608_v46  ;;  %v964_v46 = vld [vmem:[%s5235_s4 + $0x220] sm:$0xff] }
 0x3e4   :  { %3094 = vmatpush1.bf16.msra.mxu0 %v3742_v8 }
 0x3e5   :  { %3096 = vmatprep.subr.bf16.mxu0 %v3744_v9 }
 0x3e8   :  { %3098 = vmatpush1.bf16.msra.mxu0 %v3761_v14 }
 0x3e9   :  { %3100 = vmatprep.subr.bf16.mxu0 %v3765_v15 }
 0x3ec   :  { %3102 = vmatpush1.bf16.msra.mxu0 %v3781_v20 }
 0x3ed   :  { %3104 = vmatprep.subr.bf16.mxu0 %v3785_v21 }
 0x3f0   :  { %3106 = vmatpush1.bf16.msra.mxu0 %v3801_v26 }
 0x3f1   :  { %3108 = vmatprep.subr.bf16.mxu0 %v3805_v27 }
 0x3f4   :  { %3110 = vmatpush1.bf16.msra.mxu0 %v3821_v32 }
 0x3f5   :  { %3112 = vmatprep.subr.bf16.mxu0 %v3825_v33 }
 0x3f8   :  { %3114 = vmatpush1.bf16.msra.mxu0 %v3841_v38 }
 0x3f9   :  { %3116 = vmatprep.subr.bf16.mxu0 %v3845_v39 }
 0x3fc   :  { %3118 = vmatpush1.bf16.msra.mxu0 %v3861_v44 }
 0x3fd   :  { %3120 = vmatprep.subr.bf16.mxu0 %v3865_v45 }
 0x400   :  { %3122 = vmatpush1.bf16.msra.mxu0 %v3881_v50 }
 0x401   :  { %3124 = vmatprep.subr.bf16.mxu0 %v3885_v51 }
 0x404   :  { %3126 = vmatpush1.bf16.msra.mxu0 %v3901_v56 }
 0x405   :  { %3128 = vmatprep.subr.bf16.mxu0 %v3905_v57 }
 0x408   :  { %3130 = vmatpush1.bf16.msra.mxu0 %v3921_v62 }
 0x409   :  { %3132 = vmatprep.subr.bf16.mxu0 %v3925_v63 }
 0x40c   :  { %3134 = vmatpush1.bf16.msra.mxu0 %v3941_v6 }
 0x40d   :  { %3136 = vmatprep.subr.bf16.mxu0 %v3945_v7 }
 0x410   :  { %3138 = vmatpush1.bf16.msra.mxu0 %v3961_v16 }
 0x411   :  { %3140 = vmatprep.subr.bf16.mxu0 %v3965_v17 }
 0x414   :  { %3142 = vmatpush1.bf16.msra.mxu0 %v3981_v24 }
 0x415   :  { %3144 = vmatprep.subr.bf16.mxu0 %v3985_v25 }
 0x418   :  { %3146 = vmatpush1.bf16.msra.mxu0 %v4001_v34 }
 0x419   :  { %3148 = vmatprep.subr.bf16.mxu0 %v4005_v35 }
 0x41c   :  { %3150 = vmatpush1.bf16.msra.mxu0 %v4021_v42 }
 0x41d   :  { %3152 = vmatprep.subr.bf16.mxu0 %v4025_v43 }
 0x420   :  { %3154 = vmatpush1.bf16.msra.mxu0 %v4035_v48 }
 0x421   :  { %3220 = vmatprep.subr.bf16.mxu0 %v3731_v4  ;;  %v2297_v4 = vld [vmem:[%s5231_s0 + $0x28] sm:$0xff] }
 0x4b6   :  { %v497_v52 = vpop.f32.mrb[4].mxu0 }
 0x4b7   :  { %v504_v53 = vadd.f32 %v2296_v47, %v497_v52  ;;  %v499_v54 = vpop.f32.mrb[5].mxu0  ;;  %v965_v47 = vld [vmem:[%s5235_s4 + $0x228] sm:$0xff]  ;;  %v918_v52 = vld [vmem:[%s5235_s4 + $0xb0] sm:$0xff] }
 0x4b8   :  { %v506_v55 = vadd.f32 %v4080_v49, %v499_v54  ;;  %v919_v54 = vld [vmem:[%s5235_s4 + $0xb8] sm:$0xff] }
 0x4ba   :  { %3609 = vtanh.f32 %v506_v55  ;;  %v982_v55 = vld [vmem:[%s5235_s4 + $0x2b0] sm:$0xff] }
 0x4bb   :  { %3611 = vtanh.f32 %v504_v53  ;;  %v3357_v53 = vpack.c.bf16 %v965_v47, %v964_v46  ;;  %v944_v47 = vld [vmem:[%s5235_s4 + $0x180] sm:$0xff] }
 0x4c4   :  { %v3610_v58 = vpop.eup %3609 }
 0x4c5   :  { %v3612_v59 = vpop.eup %3611  ;;  %572 = vmatprep.mubr.f32.mxu1 %v3610_v58  ;;  %v983_v58 = vld [vmem:[%s5235_s4 + $0x2b8] sm:$0xff] }
 0x4c6   :  { %573 = vmatmul.mubr.f32.vlgmr.msra.gmra.mrb[4].mxu1 %v3612_v59  ;;  %v3295_v59 = vpack.c.bf16 %v919_v54, %v918_v52  ;;  %v945_v52 = vld [vmem:[%s5235_s4 + $0x188] sm:$0xff]  ;;  %v5239_v54 = vmov 0.0|0.0  }
 0x4c7   :  { %3158 = vmatpush1.bf16.msra.mxu1 %v3742_v8 }
 0x4c8   :  { %3160 = vmatprep.subr.bf16.mxu1 %v3744_v9 }
 0x4cb   :  { %3162 = vmatpush1.bf16.msra.mxu1 %v3761_v14 }
 0x4cc   :  { %3164 = vmatprep.subr.bf16.mxu1 %v3765_v15 }
 0x4cf   :  { %3166 = vmatpush1.bf16.msra.mxu1 %v3781_v20 }
 0x4d0   :  { %3168 = vmatprep.subr.bf16.mxu1 %v3785_v21 }
 0x4d3   :  { %3170 = vmatpush1.bf16.msra.mxu1 %v3801_v26 }
 0x4d4   :  { %3172 = vmatprep.subr.bf16.mxu1 %v3805_v27 }
 0x4d7   :  { %3174 = vmatpush1.bf16.msra.mxu1 %v3821_v32 }
 0x4d8   :  { %3176 = vmatprep.subr.bf16.mxu1 %v3825_v33 }
 0x4db   :  { %3178 = vmatpush1.bf16.msra.mxu1 %v3841_v38 }
 0x4dc   :  { %3180 = vmatprep.subr.bf16.mxu1 %v3845_v39 }
 0x4df   :  { %3182 = vmatpush1.bf16.msra.mxu1 %v3861_v44 }
 0x4e0   :  { %3184 = vmatprep.subr.bf16.mxu1 %v3865_v45 }
 0x4e3   :  { %3186 = vmatpush1.bf16.msra.mxu1 %v3881_v50 }
 0x4e4   :  { %3188 = vmatprep.subr.bf16.mxu1 %v3885_v51 }
 0x4e7   :  { %3190 = vmatpush1.bf16.msra.mxu1 %v3901_v56 }
 0x4e8   :  { %3192 = vmatprep.subr.bf16.mxu1 %v3905_v57 }
 0x4eb   :  { %3194 = vmatpush1.bf16.msra.mxu1 %v3921_v62 }
 0x4ec   :  { %3196 = vmatprep.subr.bf16.mxu1 %v3925_v63 }
 0x4ef   :  { %3198 = vmatpush1.bf16.msra.mxu1 %v3941_v6 }
 0x4f0   :  { %3200 = vmatprep.subr.bf16.mxu1 %v3945_v7 }
 0x4f3   :  { %3202 = vmatpush1.bf16.msra.mxu1 %v3961_v16 }
 0x4f4   :  { %3204 = vmatprep.subr.bf16.mxu1 %v3965_v17 }
 0x4f7   :  { %3206 = vmatpush1.bf16.msra.mxu1 %v3981_v24 }
 0x4f8   :  { %3208 = vmatprep.subr.bf16.mxu1 %v3985_v25 }
 0x4fb   :  { %3210 = vmatpush1.bf16.msra.mxu1 %v4001_v34 }
 0x4fc   :  { %3212 = vmatprep.subr.bf16.mxu1 %v4005_v35 }
 0x4ff   :  { %3214 = vmatpush1.bf16.msra.mxu1 %v4021_v42 }
 0x500   :  { %3216 = vmatprep.subr.bf16.mxu1 %v4025_v43 }
 0x503   :  { %3218 = vmatpush1.bf16.msra.mxu1 %v4035_v48 }
 0x599   :  { %v574_v60 = vpop.f32.mrb[4].mxu1 }
 0x59a   :  { %v581_v61 = vadd.f32 %v2297_v4, %v574_v60  ;;  %v576_v1 = vpop.f32.mrb[5].mxu1  ;;  %v3359_v4 = vpack.c.bf16 %v983_v58, %v982_v55  ;;  %v902_v60 = vld [vmem:[%s5235_s4 + $0x30] sm:$0xff] }
 0x59b   :  { %v583_v2 = vadd.f32 %v4080_v49, %v576_v1  ;;  %v966_v1 = vld [vmem:[%s5235_s4 + $0x230] sm:$0xff] }
 0x59d   :  { %3613 = vtanh.f32 %v583_v2 }
 0x59e   :  { %3615 = vtanh.f32 %v581_v61  ;;  %v903_v61 = vld [vmem:[%s5235_s4 + $0x38] sm:$0xff] }
 0x59f   :  { %v3297_v2 = vpack.c.bf16 %v903_v61, %v902_v60 }
 0x5a7   :  { %v3614_v3 = vpop.eup %3613 }
 0x5a8   :  { %v3616_v5 = vpop.eup %3615  ;;  %649 = vmatprep.mubr.f32.mxu0 %v3614_v3  ;;  %v967_v3 = vld [vmem:[%s5235_s4 + $0x238] sm:$0xff] }
 0x5a9   :  { %650 = vmatmul.mubr.f32.vlgmr.msra.gmra.mrb[6].mxu0 %v3616_v5  ;;  %v920_v5 = vld [vmem:[%s5235_s4 + $0xc0] sm:$0xff] }
 0x5aa   :  { %3222 = vmatpush1.bf16.msra.mxu0 %v3742_v8  ;;  %v2298_v8 = vld [vmem:[%s5231_s0 + $0x30] sm:$0xff] }
 0x5ab   :  { %3224 = vmatprep.subr.bf16.mxu0 %v3744_v9 }
 0x5ae   :  { %3226 = vmatpush1.bf16.msra.mxu0 %v3761_v14 }
 0x5af   :  { %3228 = vmatprep.subr.bf16.mxu0 %v3765_v15 }
 0x5b2   :  { %3230 = vmatpush1.bf16.msra.mxu0 %v3781_v20 }
 0x5b3   :  { %3232 = vmatprep.subr.bf16.mxu0 %v3785_v21 }
 0x5b6   :  { %3234 = vmatpush1.bf16.msra.mxu0 %v3801_v26 }
 0x5b7   :  { %3236 = vmatprep.subr.bf16.mxu0 %v3805_v27  ;;  %v912_v27 = vld [vmem:[%s5235_s4 + $0x80] sm:$0xff] }
 0x5ba   :  { %3238 = vmatpush1.bf16.msra.mxu0 %v3821_v32  ;;  %v913_v32 = vld [vmem:[%s5235_s4 + $0x88] sm:$0xff] }
 0x5bb   :  { %3240 = vmatprep.subr.bf16.mxu0 %v3825_v33  ;;  %v976_v33 = vld [vmem:[%s5235_s4 + $0x280] sm:$0xff] }
 0x5be   :  { %3242 = vmatpush1.bf16.msra.mxu0 %v3841_v38  ;;  %v3283_v38 = vpack.c.bf16 %v913_v32, %v912_v27  ;;  %v905_v27 = vld [vmem:[%s5235_s4 + $0x48] sm:$0xff]  ;;  %v968_v32 = vld [vmem:[%s5235_s4 + $0x240] sm:$0xff] }
 0x5bf   :  { %3244 = vmatprep.subr.bf16.mxu0 %v3845_v39  ;;  %v977_v39 = vld [vmem:[%s5235_s4 + $0x288] sm:$0xff] }
 0x5c0   :  { %3284 = vmatprep.subr.bf16.mxu1 %v3283_v38 }
 0x5c2   :  { %3246 = vmatpush1.bf16.msra.mxu0 %v3861_v44  ;;  %v3347_v44 = vpack.c.bf16 %v977_v39, %v976_v33  ;;  %v969_v33 = vld [vmem:[%s5235_s4 + $0x248] sm:$0xff]  ;;  %v922_v39 = vld [vmem:[%s5235_s4 + $0xd0] sm:$0xff] }
 0x5c3   :  { %3248 = vmatprep.subr.bf16.mxu0 %v3865_v45  ;;  %v2299_v45 = vld [vmem:[%s5231_s0 + $0x38] sm:$0xff] }
 0x5c6   :  { %3250 = vmatpush1.bf16.msra.mxu0 %v3881_v50 }
 0x5c7   :  { %3252 = vmatprep.subr.bf16.mxu0 %v3885_v51 }
 0x5ca   :  { %3254 = vmatpush1.bf16.msra.mxu0 %v3901_v56 }
 0x5cb   :  { %3256 = vmatprep.subr.bf16.mxu0 %v3905_v57 }
 0x5ce   :  { %3258 = vmatpush1.bf16.msra.mxu0 %v3921_v62 }
 0x5cf   :  { %3260 = vmatprep.subr.bf16.mxu0 %v3925_v63 }
 0x5d2   :  { %3262 = vmatpush1.bf16.msra.mxu0 %v3941_v6  ;;  %v896_v6 = vld [vmem:[%s5235_s4] sm:$0xff] }
 0x5d3   :  { %3264 = vmatprep.subr.bf16.mxu0 %v3945_v7  ;;  %v897_v7 = vld [vmem:[%s5235_s4 + $0x8] sm:$0xff] }
 0x5d6   :  { %3266 = vmatpush1.bf16.msra.mxu0 %v3961_v16  ;;  %v960_v16 = vld [vmem:[%s5235_s4 + $0x200] sm:$0xff] }
 0x5d7   :  { %3268 = vmatprep.subr.bf16.mxu0 %v3965_v17  ;;  %v3285_v17 = vpack.c.bf16 %v897_v7, %v896_v6  ;;  %v970_v6 = vld [vmem:[%s5235_s4 + $0x250] sm:$0xff]  ;;  %v971_v7 = vld [vmem:[%s5235_s4 + $0x258] sm:$0xff] }
 0x5da   :  { %3270 = vmatpush1.bf16.msra.mxu0 %v3981_v24  ;;  %v961_v24 = vld [vmem:[%s5235_s4 + $0x208] sm:$0xff] }
 0x5db   :  { %3272 = vmatprep.subr.bf16.mxu0 %v3985_v25  ;;  %v3349_v25 = vpack.c.bf16 %v961_v24, %v960_v16  ;;  %v924_v16 = vld [vmem:[%s5235_s4 + $0xe0] sm:$0xff] }
 0x5dc   :  { %v988_v24 = vld [vmem:[%s5235_s4 + $0x2e0] sm:$0xff] }
 0x5de   :  { %3274 = vmatpush1.bf16.msra.mxu0 %v4001_v34  ;;  %v914_v34 = vld [vmem:[%s5235_s4 + $0x90] sm:$0xff] }
 0x5df   :  { %3276 = vmatprep.subr.bf16.mxu0 %v4005_v35  ;;  %v915_v35 = vld [vmem:[%s5235_s4 + $0x98] sm:$0xff] }
 0x5e2   :  { %3278 = vmatpush1.bf16.msra.mxu0 %v4021_v42  ;;  %v978_v42 = vld [vmem:[%s5235_s4 + $0x290] sm:$0xff] }
 0x5e3   :  { %3280 = vmatprep.subr.bf16.mxu0 %v4025_v43  ;;  %v3287_v43 = vpack.c.bf16 %v915_v35, %v914_v34  ;;  %v3369_v35 = vpack.c.bf16 %v971_v7, %v970_v6 }
 0x5e6   :  { %3282 = vmatpush1.bf16.msra.mxu0 %v4035_v48  ;;  %v979_v48 = vld [vmem:[%s5235_s4 + $0x298] sm:$0xff] }
 0x5e7   :  { %3348 = vmatprep.subr.bf16.mxu0 %v3347_v44  ;;  %v3351_v12 = vpack.c.bf16 %v979_v48, %v978_v42  ;;  %v923_v44 = vld [vmem:[%s5235_s4 + $0xd8] sm:$0xff]  ;;  %v909_v48 = vld [vmem:[%s5235_s4 + $0x68] sm:$0xff] }
 0x67c   :  { %v651_v9 = vpop.f32.mrb[6].mxu0 }
 0x67d   :  { %v658_v14 = vadd.f32 %v2298_v8, %v651_v9  ;;  %v653_v15 = vpop.f32.mrb[7].mxu0  ;;  %v921_v8 = vld [vmem:[%s5235_s4 + $0xc8] sm:$0xff]  ;;  %v3361_v9 = vpack.c.bf16 %v967_v3, %v966_v1 }
 0x67e   :  { %v660_v20 = vadd.f32 %v4080_v49, %v653_v15  ;;  %v984_v15 = vld [vmem:[%s5235_s4 + $0x2c0] sm:$0xff] }
 0x680   :  { %3617 = vtanh.f32 %v660_v20  ;;  %v985_v20 = vld [vmem:[%s5235_s4 + $0x2c8] sm:$0xff] }
 0x681   :  { %3619 = vtanh.f32 %v658_v14  ;;  %v3299_v14 = vpack.c.bf16 %v921_v8, %v920_v5 }
 0x68a   :  { %v3618_v21 = vpop.eup %3617 }
 0x68b   :  { %v3620_v26 = vpop.eup %3619  ;;  %726 = vmatprep.mubr.f32.mxu1 %v3618_v21  ;;  %v904_v21 = vld [vmem:[%s5235_s4 + $0x40] sm:$0xff] }
 0x68c   :  { %727 = vmatmul.mubr.f32.vlgmr.msra.gmra.mrb[6].mxu1 %v3620_v26  ;;  %v3363_v26 = vpack.c.bf16 %v985_v20, %v984_v15  ;;  %v3301_v38 = vpack.c.bf16 %v905_v27, %v904_v21 }
 0x68d   :  { %3286 = vmatpush3.bf16.msra.mxu1 %v3285_v17  ;;  %v925_v17 = vld [vmem:[%s5235_s4 + $0xe8] sm:$0xff] }
 0x68e   :  { %3288 = vmatprep.subr.bf16.mxu1 %v3287_v43  ;;  %v3307_v42 = vpack.c.bf16 %v925_v17, %v924_v16  ;;  %v908_v43 = vld [vmem:[%s5235_s4 + $0x60] sm:$0xff] }
 0x68f   :  { %v3309_v23 = vpack.c.bf16 %v909_v48, %v908_v43 }
 0x691   :  { %3290 = vmatpush3.bf16.msra.mxu1 %v3289_v13  ;;  %v926_v13 = vld [vmem:[%s5235_s4 + $0xf0] sm:$0xff] }
 0x692   :  { %3292 = vmatprep.subr.bf16.mxu1 %v3291_v30  ;;  %v3311_v29 = vpack.c.bf16 %v927_v18, %v926_v13  ;;  %v910_v30 = vld [vmem:[%s5235_s4 + $0x70] sm:$0xff] }
 0x695   :  { %3294 = vmatpush3.bf16.msra.mxu1 %v3293_v41  ;;  %v3313_v41 = vpack.c.bf16 %v911_v31, %v910_v30 }
 0x696   :  { %3296 = vmatprep.subr.bf16.mxu1 %v3295_v59 }
 0x699   :  { %3298 = vmatpush3.bf16.msra.mxu1 %v3297_v2  ;;  %v4528_v2 = vld [vmem:[%s5234_s3 + $0x8] sm:$0xff] }
 0x69a   :  { %3300 = vmatprep.subr.bf16.mxu1 %v3299_v14 }
 0x69d   :  { %3302 = vmatpush3.bf16.msra.mxu1 %v3301_v38 }
 0x75f   :  { %v728_v50 = vpop.f32.mrb[6].mxu1 }
 0x760   :  { %v735_v51 = vadd.f32 %v2299_v45, %v728_v50  ;;  %v730_v56 = vpop.f32.mrb[7].mxu1  ;;  %v986_v45 = vld [vmem:[%s5235_s4 + $0x2d0] sm:$0xff]  ;;  %v3365_v50 = vpack.c.bf16 %v969_v33, %v968_v32 }
 0x761   :  { %v737_v57 = vadd.f32 %v4080_v49, %v730_v56  ;;  %v987_v56 = vld [vmem:[%s5235_s4 + $0x2d8] sm:$0xff] }
 0x763   :  { %3621 = vtanh.f32 %v737_v57  ;;  %v906_v57 = vld [vmem:[%s5235_s4 + $0x50] sm:$0xff] }
 0x764   :  { %3623 = vtanh.f32 %v735_v51  ;;  %v3303_v51 = vpack.c.bf16 %v923_v44, %v922_v39 }
 0x766   :  { %3304 = vmatprep.subr.bf16.mxu1 %v3303_v51 }
 0x76d   :  { %v3622_v62 = vpop.eup %3621 }
 0x76e   :  { %v3624_v63 = vpop.eup %3623  ;;  %872 = vmatprep.mubr.f32.mxu0 %v3622_v62  ;;  %v907_v62 = vld [vmem:[%s5235_s4 + $0x58] sm:$0xff] }
 0x76f   :  { %873 = vmatmul.mubr.f32.vlgmr.msra.gmra.mrb[8].mxu0 %v3624_v63  ;;  %v3367_v63 = vpack.c.bf16 %v987_v56, %v986_v45  ;;  %v3305_v34 = vpack.c.bf16 %v907_v62, %v906_v57 }
 0x770   :  { %3350 = vmatpush3.bf16.msra.mxu0 %v3349_v25  ;;  %v989_v25 = vld [vmem:[%s5235_s4 + $0x2e8] sm:$0xff] }
 0x771   :  { %3352 = vmatprep.subr.bf16.mxu0 %v3351_v12  ;;  %v3371_v11 = vpack.c.bf16 %v989_v25, %v988_v24  ;;  %v973_v12 = vld [vmem:[%s5235_s4 + $0x268] sm:$0xff]  ;;  %3306 = vmatpush3.bf16.msra.mxu1 %v3305_v34 }
 0x772   :  { %3308 = vmatprep.subr.bf16.mxu1 %v3307_v42  ;;  %v3373_v28 = vpack.c.bf16 %v973_v12, %v972_v10 }
 0x774   :  { %3354 = vmatpush3.bf16.msra.mxu0 %v3353_v22  ;;  %v991_v22 = vld [vmem:[%s5235_s4 + $0x2f8] sm:$0xff] }
 0x775   :  { %3356 = vmatprep.subr.bf16.mxu0 %v3355_v40  ;;  %v3375_v36 = vpack.c.bf16 %v991_v22, %v990_v19  ;;  %v975_v40 = vld [vmem:[%s5235_s4 + $0x278] sm:$0xff]  ;;  %3310 = vmatpush3.bf16.msra.mxu1 %v3309_v23 }
 0x776   :  { %3312 = vmatprep.subr.bf16.mxu1 %v3311_v29  ;;  %v3377_v46 = vpack.c.bf16 %v975_v40, %v974_v37 }
 0x778   :  { %3358 = vmatpush3.bf16.msra.mxu0 %v3357_v53  ;;  %v3315_v53 = vpack.c.bf16 %v945_v52, %v944_v47 }
 0x779   :  { %3360 = vmatprep.subr.bf16.mxu0 %v3359_v4  ;;  %3314 = vmatpush3.bf16.msra.mxu1 %v3313_v41 }
 0x77a   :  { %3316 = vmatprep.subr.bf16.mxu1 %v3315_v53 }
 0x77c   :  { %3362 = vmatpush3.bf16.msra.mxu0 %v3361_v9 }
 0x77d   :  { %3364 = vmatprep.subr.bf16.mxu0 %v3363_v26 }
 0x780   :  { %3366 = vmatpush3.bf16.msra.mxu0 %v3365_v50 }
 0x781   :  { %3368 = vmatprep.subr.bf16.mxu0 %v3367_v63 }
 0x784   :  { %3370 = vmatpush3.bf16.msra.mxu0 %v3369_v35 }
 0x785   :  { %3372 = vmatprep.subr.bf16.mxu0 %v3371_v11 }
 0x788   :  { %3374 = vmatpush3.bf16.msra.mxu0 %v3373_v28 }
 0x789   :  { %3376 = vmatprep.subr.bf16.mxu0 %v3375_v36 }
 0x78c   :  { %3378 = vmatpush3.bf16.msra.mxu0 %v3377_v46 }
 0x78d   :  { %3411 = vmatprep.subr.bf16.mxu0 %v5239_v54 }
 0x842   :  { %v874_v55 = vpop.f32.mrb[8].mxu0 }
 0x843   :  { %v875_v58 = vpop.f32.mrb[9].mxu0 }
 0x844   :  { %v878_v59 = vadd.f32 %v4080_v49, %v875_v58  ;;  %v4520_v49 = vld [vmem:[%s5234_s3] sm:$0xff] }
 0x845   :  { %v3412_v44 = vpack.c.bf16 %v4528_v2, %v4520_v49  ;;  %v885_v49 = vld [vmem:[%s5234_s3 + $0x28] sm:$0xff] }
 0x846   :  { %3625 = vtanh.f32 %v878_v59 }
 0x850   :  { %v4504_v4 = vpop.eup %3625 }
 0x851   :  { %vm1028_vm0 = vcmp.ge.f32.partialorder %v4504_v4, -1.8  ;;  %vm1029_vm1 = vcmp.lt.f32.partialorder %v4504_v4, -1.4  ;;  %vm1032_vm2 = vcmp.ge.f32.partialorder %v4504_v4, -1.4 }
 0x852   :  { %vm4509_vm3 = vmand %vm1028_vm0, %vm1029_vm1  ;;  %vm1033_vm4 = vcmp.lt.f32.partialorder %v4504_v4, -1.0  ;;  %vm1036_vm5 = vcmp.ge.f32.partialorder %v4504_v4, -1.0  ;;  %vm1037_vm6 = vcmp.lt.f32.partialorder %v4504_v4, -0.6  ;;  %vm1040_vm7 = vcmp.ge.f32.partialorder %v4504_v4, -0.6 }
 0x853   :  { %vm1034_vm8 = vmand %vm1032_vm2, %vm1033_vm4  ;;  %vm1041_vm9 = vcmp.lt.f32.partialorder %v4504_v4, -0.2  ;;  %v1071_v61 = vsub.f32 -1.4, %v4504_v4  ;;  %v1078_v1 = vsub.f32 -1.0, %v4504_v4  ;;  %v4536_v9 = vadd.f32 1.0, %v4504_v4 }
 0x854   :  { %v1035_v3 = vsel %vm1034_vm8, 1.0, %v3666_v0  ;;  %vm1038_vm10 = vmand %vm1036_vm5, %vm1037_vm6  ;;  %v2301_v5 = vadd.f32 1.8, %v4504_v4  ;;  %v4533_v8 = vadd.f32 1.4, %v4504_v4  ;;  %v4541_v14 = vsel %vm4509_vm3, 1.0, %v3666_v0 }
 0x855   :  { %vm1042_vm11 = vmand %vm1040_vm7, %vm1041_vm9  ;;  %v1079_v15 = vmul.f32 2.5, %v1078_v1  ;;  %v4546_v20 = vsub.f32 -0.6, %v4504_v4  ;;  %v1039_v21 = vsel %vm1038_vm10, 1.0, %v3666_v0  ;;  %v1090_v32 = vmul.f32 2.5, %v4536_v9 }
 0x856   :  { %v1076_v26 = vmul.f32 2.5, %v2301_v5  ;;  %v1083_v27 = vmul.f32 2.5, %v4533_v8  ;;  %v1092_v39 = vsub.f32 -0.2, %v4504_v4  ;;  %v1043_v45 = vsel %vm1042_vm11, 1.0, %v3666_v0 }
 0x857   :  { %v1080_v33 = vmul.f32 %v1079_v15, %v1035_v3  ;;  %v1086_v38 = vmul.f32 2.5, %v4546_v20  ;;  %v1072_v50 = vmul.f32 2.5, %v1071_v61  ;;  %v1091_v62 = vmul.f32 %v1090_v32, %v1039_v21 }
 0x858   :  { %v1077_v51 = vmul.f32 %v1076_v26, %v4541_v14  ;;  %v1084_v56 = vmul.f32 %v1083_v27, %v1035_v3  ;;  %v1093_v63 = vmul.f32 2.5, %v1092_v39  ;;  %v4558_v6 = vadd.f32 0.6, %v4504_v4 }
 0x859   :  { %v1087_v57 = vmul.f32 %v1086_v38, %v1039_v21  ;;  %v1143_v16 = vmul.f32 1.25, %v2301_v5  ;;  %v1145_v17 = vmul.f32 1.25, %v4546_v20  ;;  %v1148_v24 = vmul.f32 1.25, %v4533_v8 }
 0x85a   :  { %v4560_v7 = vadd.f32 %v1080_v33, %v1077_v51  ;;  %v1094_v34 = vmul.f32 %v1093_v63, %v1043_v45  ;;  %v1150_v35 = vmul.f32 1.25, %v1092_v39  ;;  %v1188_v42 = vmul.f32 0.8333333, %v2301_v5 }
 0x85b   :  { %v1088_v25 = vadd.f32 %v1087_v57, %v1084_v56  ;;  %v1190_v48 = vmul.f32 0.8333333, %v1092_v39  ;;  %vm1044_vm12 = vcmp.ge.f32.partialorder %v4504_v4, -0.2  ;;  %vm1045_vm13 = vcmp.lt.f32.partialorder %v4504_v4, 0.2 }
 0x85c   :  { %v1144_v43 = vmul.f32 %v1143_v16, %v4560_v7  ;;  %v4567_v10 = vadd.f32 %v1094_v34, %v1091_v62  ;;  %vm1046_vm14 = vmand %vm1044_vm12, %vm1045_vm13  ;;  %vm1048_vm15 = vcmp.ge.f32.partialorder %v4504_v4, 0.2  ;;  %v1097_v13 = vmul.f32 2.5, %v4558_v6 }
 0x85d   :  { %v1146_v11 = vmul.f32 %v1145_v17, %v1088_v25  ;;  %v1149_v12 = vmul.f32 %v1148_v24, %v1088_v25  ;;  %vm1049_vm0 = vcmp.lt.f32.partialorder %v4504_v4, 0.6  ;;  %vm1052_vm1 = vcmp.ge.f32.partialorder %v4504_v4, 0.6 }
 0x85e   :  { %vm1053_vm2 = vcmp.lt.f32.partialorder %v4504_v4, 1.0  ;;  %v1151_v19 = vmul.f32 %v1150_v35, %v4567_v10  ;;  %vm1050_vm3 = vmand %vm1048_vm15, %vm1049_vm0  ;;  %vm1056_vm4 = vcmp.ge.f32.partialorder %v4504_v4, 1.0  ;;  %vm1057_vm5 = vcmp.lt.f32.partialorder %v4504_v4, 1.4 }
 0x85f   :  { %v4574_v18 = vadd.f32 %v1146_v11, %v1144_v43  ;;  %v1047_v22 = vsel %vm1046_vm14, 1.0, %v3666_v0  ;;  %vm1054_vm6 = vmand %vm1052_vm1, %vm1053_vm2  ;;  %v4581_v23 = vsub.f32 0.2, %v4504_v4  ;;  %v2305_v28 = vadd.f32 0.2, %v4504_v4 }
 0x860   :  { %v4585_v29 = vsub.f32 1.0, %v4504_v4  ;;  %v4587_v30 = vadd.f32 %v1151_v19, %v1149_v12  ;;  %v1051_v36 = vsel %vm1050_vm3, 1.0, %v3666_v0  ;;  %vm1058_vm7 = vmand %vm1056_vm4, %vm1057_vm5  ;;  %v4592_v37 = vsub.f32 0.6, %v4504_v4 }
 0x861   :  { %v1189_v31 = vmul.f32 %v1188_v42, %v4574_v18  ;;  %v1055_v40 = vsel %vm1054_vm6, 1.0, %v3666_v0  ;;  %v1100_v41 = vmul.f32 2.5, %v4581_v23  ;;  %v1104_v46 = vmul.f32 2.5, %v2305_v28 }
 0x862   :  { %v4597_v47 = vadd.f32 -0.2, %v4504_v4  ;;  %v1191_v52 = vmul.f32 %v1190_v48, %v4587_v30  ;;  %v1107_v53 = vmul.f32 2.5, %v4592_v37  ;;  %v1114_v55 = vmul.f32 2.5, %v4585_v29 }
 0x863   :  { %v4603_v58 = vadd.f32 -0.6, %v4504_v4  ;;  %v4606_v59 = vsel %vm1058_vm7, 1.0, %v3666_v0  ;;  %v1105_v60 = vmul.f32 %v1104_v46, %v1047_v22  ;;  %v1120_v3 = vsub.f32 1.4, %v4504_v4 }
 0x864   :  { %v1111_v61 = vmul.f32 2.5, %v4597_v47  ;;  %v1192_v5 = vadd.f32 %v1191_v52, %v1189_v31  ;;  %v1108_v15 = vmul.f32 %v1107_v53, %v1051_v36  ;;  %v1115_v21 = vmul.f32 %v1114_v55, %v1055_v40 }
 0x865   :  { %v1118_v26 = vmul.f32 2.5, %v4603_v58  ;;  %v1073_v27 = vmul.f32 %v1072_v50, %v4541_v14  ;;  %v1098_v32 = vmul.f32 %v1097_v13, %v1043_v45  ;;  %v1121_v38 = vmul.f32 2.5, %v1120_v3 }
 0x866   :  { %v1112_v33 = vmul.f32 %v1111_v61, %v1051_v36  ;;  %1294 = vmatprep.mubr.f32.mxu1 %v1192_v5  ;;  %v1101_v39 = vmul.f32 %v1100_v41, %v1047_v22  ;;  %v1109_v51 = vadd.f32 %v1108_v15, %v1105_v60  ;;  %v1163_v57 = vmul.f32 1.25, %v2305_v28 }
 0x867   :  { %v1119_v56 = vmul.f32 %v1118_v26, %v1055_v40  ;;  %v1122_v63 = vmul.f32 %v1121_v38, %v4606_v59  ;;  %v1165_v16 = vmul.f32 1.25, %v4585_v29  ;;  %v1168_v17 = vmul.f32 1.25, %v4597_v47 }
 0x868   :  { %v1116_v62 = vadd.f32 %v1115_v21, %v1112_v33  ;;  %v1164_v24 = vmul.f32 %v1163_v57, %v1109_v51  ;;  %vm1024_vm8 = vcmp.ge.f32.partialorder %v4504_v4, -2.2  ;;  %vm1025_vm9 = vcmp.lt.f32.partialorder %v4504_v4, -1.8 }
 0x869   :  { %v2300_v14 = vadd.f32 2.2, %v4504_v4  ;;  %v4618_v45 = vadd.f32 %v1122_v63, %v1119_v56  ;;  %v1170_v34 = vmul.f32 1.25, %v1120_v3  ;;  %vm1026_vm10 = vmand %vm1024_vm8, %vm1025_vm9  ;;  %v1208_v35 = vmul.f32 0.8333333, %v2305_v28  ;;  %v929_v56 = vld [vmem:[%s5235_s4 + $0x108] sm:$0xff] }
 0x86a   :  { %v1166_v50 = vmul.f32 %v1165_v16, %v1116_v62  ;;  %v1169_v25 = vmul.f32 %v1168_v17, %v1116_v62  ;;  %v1210_v42 = vmul.f32 0.8333333, %v1120_v3  ;;  %v1027_v43 = vsel %vm1026_vm10, 1.0, %v3666_v0 }
 0x86b   :  { %v1069_v48 = vmul.f32 2.5, %v2300_v14  ;;  %v1171_v12 = vmul.f32 %v1170_v34, %v4618_v45  ;;  %v1138_v13 = vmul.f32 1.25, %v2300_v14  ;;  %v1140_v19 = vmul.f32 1.25, %v1078_v1 }
 0x86c   :  { %v1167_v11 = vadd.f32 %v1166_v50, %v1164_v24  ;;  %v1102_v31 = vadd.f32 %v1101_v39, %v1098_v32  ;;  %v1158_v36 = vmul.f32 1.25, %v4558_v6  ;;  %v1160_v40 = vmul.f32 1.25, %v4592_v37  ;;  %v883_v24 = vld [vmem:[%s5234_s3 + $0x18] sm:$0xff] }
 0x86d   :  { %v1070_v22 = vmul.f32 %v1069_v48, %v1027_v43  ;;  %v4626_v41 = vadd.f32 %v1171_v12, %v1169_v25  ;;  %v1141_v46 = vmul.f32 %v1140_v19, %v4560_v7  ;;  %v1183_v52 = vmul.f32 0.8333333, %v2300_v14  ;;  %v930_v25 = vld [vmem:[%s5235_s4 + $0x110] sm:$0xff]  ;;  %v948_v43 = vld [vmem:[%s5235_s4 + $0x1a0] sm:$0xff]  ;;  %v949_v48 = vld [vmem:[%s5235_s4 + $0x1a8] sm:$0xff] }
 0x86e   :  { %v1209_v28 = vmul.f32 %v1208_v35, %v1167_v11  ;;  %v1159_v55 = vmul.f32 %v1158_v36, %v1102_v31  ;;  %v1161_v60 = vmul.f32 %v1160_v40, %v1109_v51  ;;  %v1205_v61 = vmul.f32 0.8333333, %v4585_v29 }
 0x86f   :  { %v1074_v53 = vadd.f32 %v1073_v27, %v1070_v22  ;;  %v1211_v3 = vmul.f32 %v1210_v42, %v4626_v41  ;;  %v1185_v1 = vmul.f32 0.8333333, %v4546_v20  ;;  %v1153_v5 = vmul.f32 1.25, %v4536_v9  ;;  %v928_v20 = vld [vmem:[%s5235_s4 + $0x100] sm:$0xff]  ;;  %v931_v42 = vld [vmem:[%s5235_s4 + $0x118] sm:$0xff] }
 0x870   :  { %v1155_v15 = vmul.f32 1.25, %v4581_v23  ;;  %v1162_v26 = vadd.f32 %v1161_v60, %v1159_v55  ;;  %v1203_v32 = vmul.f32 0.8333333, %v4558_v6  ;;  %v1206_v33 = vmul.f32 %v1205_v61, %v1167_v11 }
 0x871   :  { %v1139_v21 = vmul.f32 %v1138_v13, %v1074_v53  ;;  %v1212_v7 = vadd.f32 %v1211_v3, %v1209_v28  ;;  %v1154_v27 = vmul.f32 %v1153_v5, %v4567_v10  ;;  %v1200_v39 = vmul.f32 0.8333333, %v4592_v37  ;;  %v946_v37 = vld [vmem:[%s5235_s4 + $0x190] sm:$0xff]  ;;  %v932_v28 = vld [vmem:[%s5235_s4 + $0x120] sm:$0xff]  ;;  %v951_v53 = vld [vmem:[%s5235_s4 + $0x1b8] sm:$0xff] }
 0x872   :  { %v1156_v38 = vmul.f32 %v1155_v15, %v1102_v31  ;;  %v1186_v51 = vmul.f32 %v1185_v1, %v4574_v18  ;;  %v1204_v57 = vmul.f32 %v1203_v32, %v1162_v26  ;;  %v1198_v6 = vmul.f32 0.8333333, %v4536_v9  ;;  %v947_v18 = vld [vmem:[%s5235_s4 + $0x198] sm:$0xff]  ;;  %v882_v9 = vld [vmem:[%s5234_s3 + $0x10] sm:$0xff]  ;;  %v884_v31 = vld [vmem:[%s5234_s3 + $0x20] sm:$0xff] }
 0x873   :  { %v1142_v29 = vadd.f32 %v1141_v46, %v1139_v21  ;;  %1434 = vmatprep.mubr.f32.mxu0 %v1212_v7  ;;  %v1201_v10 = vmul.f32 %v1200_v39, %v1162_v26  ;;  %v2310_v63 = vmul.f32 -1.442695, %v4504_v4  ;;  %vm1060_vm11 = vcmp.ge.f32.partialorder %v4504_v4, 1.4  ;;  %v933_v46 = vld [vmem:[%s5235_s4 + $0x128] sm:$0xff]  ;;  %v886_v21 = vld [vmem:[%s5234_s3 + $0x30] sm:$0xff] }
 0x874   :  { %v4645_v62 = vadd.f32 %v1156_v38, %v1154_v27  ;;  %v1207_v17 = vadd.f32 %v1206_v33, %v1204_v57  ;;  %vm1061_vm12 = vcmp.lt.f32.partialorder %v4504_v4, 1.8  ;;  %v3317_v14 = vpack.c.bf16 %v929_v56, %v928_v20  ;;  %v934_v39 = vld [vmem:[%s5235_s4 + $0x130] sm:$0xff]  ;;  %v952_v56 = vld [vmem:[%s5235_s4 + $0x1c0] sm:$0xff] }
 0x875   :  { %v1184_v16 = vmul.f32 %v1183_v52, %v1142_v29  ;;  %3627 = vpow2.f32 %v2310_v63  ;;  %vm1062_vm13 = vmand %vm1060_vm11, %vm1061_vm12  ;;  %v3319_v35 = vpack.c.bf16 %v947_v18, %v946_v37  ;;  %v4676_v11 = vadd.f32 -1.0, %v4504_v4  ;;  %v950_v52 = vld [vmem:[%s5235_s4 + $0x1b0] sm:$0xff]  ;;  %v889_v37 = vld [vmem:[%s5234_s3 + $0x48] sm:$0xff] }
 0x876   :  { %v1199_v50 = vmul.f32 %v1198_v6, %v4645_v62  ;;  %1435 = vmatmul.mubr.f32.vlgmr.msra.gmra.mrb[10].mxu0 %v1207_v17  ;;  %v1127_v12 = vsub.f32 1.8, %v4504_v4  ;;  %v3415_v19 = vpack.c.bf16 %v883_v24, %v882_v9  ;;  %vm3668_vm14 = vmmov 0  }
 0x877   :  { %v1187_v34 = vadd.f32 %v1186_v51, %v1184_v16  ;;  %3413 = vmatpush3.bf16.msra.mxu0 %v3412_v44  ;;  %2669 = vmatprep.mubr.msk.f32.mxu0 %vm3668_vm14, %v3666_v0  ;;  %v4685_v22 = vsel %vm1062_vm13, 1.0, %v3666_v0  ;;  %v1125_v2 = vmul.f32 2.5, %v4676_v11  ;;  %v3321_v36 = vpack.c.bf16 %v931_v42, %v930_v25  ;;  %v955_v42 = vld [vmem:[%s5235_s4 + $0x1d8] sm:$0xff] }
 0x878   :  { %v1202_v13 = vadd.f32 %v1201_v10, %v1199_v50  ;;  %3414 = vmatprep.subr.bf16.mxu0 %v5239_v54  ;;  %v1128_v44 = vmul.f32 2.5, %v1127_v12  ;;  %v3323_v40 = vpack.c.bf16 %v949_v48, %v948_v43  ;;  %vm1064_vm15 = vcmp.ge.f32.partialorder %v4504_v4, 1.8  ;;  %v888_v10 = vld [vmem:[%s5234_s3 + $0x40] sm:$0xff]  ;;  %v937_v50 = vld [vmem:[%s5235_s4 + $0x148] sm:$0xff] }
 0x879   :  { %1295 = vmatmul.mubr.f32.vlgmr.msra.gmra.mrb[8].mxu1 %v1187_v34  ;;  %vm1065_vm0 = vcmp.lt.f32.partialorder %v4504_v4, 2.2  ;;  %v1126_v55 = vmul.f32 %v1125_v2, %v4606_v59  ;;  %v1173_v61 = vmul.f32 1.25, %v4603_v58  ;;  %v3418_v3 = vpack.c.bf16 %v885_v49, %v884_v31  ;;  %v887_v59 = vld [vmem:[%s5234_s3 + $0x38] sm:$0xff] }
 0x87a   :  { %3318 = vmatpush3.bf16.msra.mxu1 %v3317_v14  ;;  %1364 = vmatprep.mubr.f32.mxu1 %v1202_v13  ;;  %v1129_v60 = vmul.f32 %v1128_v44, %v4685_v22  ;;  %v2309_v1 = vadd.f32 -1.4, %v4504_v4  ;;  %v4714_v5 = vsub.f32 2.2, %v4504_v4  ;;  %v1213_v15 = vmul.f32 0.8333333, %v4597_v47  ;;  %vm4731_vm1 = vmand %vm1064_vm15, %vm1065_vm0 }
 0x87b   :  { %3320 = vmatprep.subr.bf16.mxu1 %v3319_v35  ;;  %3416 = vmatpush3.bf16.msra.mxu0 %v3415_v19  ;;  %v1174_v32 = vmul.f32 %v1173_v61, %v4618_v45  ;;  %v1175_v33 = vmul.f32 1.25, %v1127_v12  ;;  %v3325_v7 = vpack.c.bf16 %v933_v46, %v932_v28  ;;  %v3327_v38 = vpack.c.bf16 %v951_v53, %v950_v52  ;;  %v935_v45 = vld [vmem:[%s5235_s4 + $0x138] sm:$0xff]  ;;  %v936_v14 = vld [vmem:[%s5235_s4 + $0x140] sm:$0xff]  ;;  %v954_v35 = vld [vmem:[%s5235_s4 + $0x1d0] sm:$0xff] }
 0x87c   :  { %3417 = vmatprep.subr.bf16.mxu0 %v5239_v54  ;;  %v4724_v26 = vadd.f32 %v1129_v60, %v1126_v55  ;;  %v1214_v27 = vmul.f32 %v1213_v15, %v4626_v41  ;;  %v3421_v20 = vpack.c.bf16 %v887_v59, %v886_v21  ;;  %v953_v41 = vld [vmem:[%s5235_s4 + $0x1c8] sm:$0xff]  ;;  %v1132_v57 = vmul.f32 2.5, %v2309_v1  ;;  %v891_v13 = vld [vmem:[%s5234_s3 + $0x58] sm:$0xff]  ;;  %v892_v46 = vld [vmem:[%s5234_s3 + $0x60] sm:$0xff] }
 0x87d   :  { %v1135_v6 = vmul.f32 2.5, %v4714_v5  ;;  %v1067_v63 = vsel %vm4731_vm1, 1.0, %v3666_v0  ;;  %v1215_v17 = vmul.f32 0.8333333, %v1127_v12  ;;  %v3329_v9 = vpack.c.bf16 %v935_v45, %v934_v39  ;;  %v890_v12 = vld [vmem:[%s5234_s3 + $0x50] sm:$0xff]  ;;  %v939_v2 = vld [vmem:[%s5235_s4 + $0x158] sm:$0xff] }
 0x87e   :  { %3322 = vmatpush3.bf16.msra.mxu1 %v3321_v36  ;;  %v1176_v29 = vmul.f32 %v1175_v33, %v4724_v26  ;;  %v3331_v24 = vpack.c.bf16 %v953_v41, %v952_v56  ;;  %v3424_v34 = vpack.c.bf16 %v889_v37, %v888_v10  ;;  %v1133_v43 = vmul.f32 %v1132_v57, %v4685_v22  ;;  %v938_v22 = vld [vmem:[%s5235_s4 + $0x150] sm:$0xff]  ;;  %v956_v36 = vld [vmem:[%s5235_s4 + $0x1e0] sm:$0xff]  ;;  %v893_v52 = vld [vmem:[%s5234_s3 + $0x68] sm:$0xff] }
 0x87f   :  { %3324 = vmatprep.subr.bf16.mxu1 %v3323_v40  ;;  %v3628_v51 = vpop.eup %3627  ;;  %3419 = vmatpush3.bf16.msra.mxu0 %v3418_v3  ;;  %v1136_v48 = vmul.f32 %v1135_v6, %v1067_v63  ;;  %v3333_v31 = vpack.c.bf16 %v937_v50, %v936_v14  ;;  %v3335_v49 = vpack.c.bf16 %v955_v42, %v954_v35  ;;  %v957_v40 = vld [vmem:[%s5235_s4 + $0x1e8] sm:$0xff]  ;;  %v1178_v55 = vmul.f32 1.25, %v4676_v11  ;;  %v940_v3 = vld [vmem:[%s5235_s4 + $0x160] sm:$0xff]  ;;  %v958_v21 = vld [vmem:[%s5235_s4 + $0x1f0] sm:$0xff] }
 0x880   :  { %3420 = vmatprep.subr.bf16.mxu0 %v5239_v54  ;;  %v1226_v18 = vadd.f32 1.0, %v3628_v51  ;;  %v4760_v16 = vadd.f32 %v1176_v29, %v1174_v32  ;;  %v3427_v44 = vpack.c.bf16 %v891_v13, %v890_v12  ;;  %v3337_v53 = vpack.c.bf16 %v939_v2, %v938_v22  ;;  %v941_v1 = vld [vmem:[%s5235_s4 + $0x168] sm:$0xff]  ;;  %v959_v11 = vld [vmem:[%s5235_s4 + $0x1f8] sm:$0xff]  ;;  %v1008_v51 = vld [vmem:[%s5235_s4 + $0x380] sm:$0xff] }
 0x881   :  { %v1137_v28 = vadd.f32 %v1136_v48, %v1133_v43  ;;  %v1180_v60 = vmul.f32 1.25, %v4714_v5  ;;  %v3339_v61 = vpack.c.bf16 %v957_v40, %v956_v36  ;;  %v3430_v15 = vpack.c.bf16 %v893_v52, %v892_v46  ;;  %v895_v47 = vld [vmem:[%s5234_s3 + $0x78] sm:$0xff]  ;;  %v994_v14 = vld [vmem:[%s5235_s4 + $0x310] sm:$0xff]  ;;  %v996_v43 = vld [vmem:[%s5235_s4 + $0x320] sm:$0xff] }
 0x882   :  { %3326 = vmatpush3.bf16.msra.mxu1 %v3325_v7  ;;  %3629 = vrcp.f32 %v1226_v18  ;;  %v1216_v25 = vmul.f32 %v1215_v17, %v4760_v16  ;;  %v1179_v59 = vmul.f32 %v1178_v55, %v4724_v26  ;;  %v894_v7 = vld [vmem:[%s5234_s3 + $0x70] sm:$0xff]  ;;  %v3343_v39 = vpack.c.bf16 %v959_v11, %v958_v21  ;;  %v943_v45 = vld [vmem:[%s5235_s4 + $0x178] sm:$0xff]  ;;  %v992_v17 = vld [vmem:[%s5235_s4 + $0x300] sm:$0xff] }
 0x883   :  { %3328 = vmatprep.subr.bf16.mxu1 %v3327_v38  ;;  %3422 = vmatpush3.bf16.msra.mxu0 %v3421_v20  ;;  %v1181_v32 = vmul.f32 %v1180_v60, %v1137_v28  ;;  %v942_v26 = vld [vmem:[%s5235_s4 + $0x170] sm:$0xff]  ;;  %v3433_v29 = vpack.c.bf16 %v895_v47, %v894_v7  ;;  %v1193_v56 = vmul.f32 0.8333333, %v4533_v8  ;;  %v1195_v41 = vmul.f32 0.8333333, %v4581_v23  ;;  %v993_v8 = vld [vmem:[%s5235_s4 + $0x308] sm:$0xff] }
 0x884   :  { %3423 = vmatprep.subr.bf16.mxu0 %v5239_v54  ;;  %v4783_v19 = vadd.f32 %v1216_v25, %v1214_v27  ;;  %v3341_v27 = vpack.c.bf16 %v941_v1, %v940_v3  ;;  %v3345_v57 = vpack.c.bf16 %v943_v45, %v942_v26  ;;  %v1218_v6 = vmul.f32 0.8333333, %v4603_v58  ;;  %v1012_v25 = vld [vmem:[%s5235_s4 + $0x3a0] sm:$0xff]  ;;  %v997_v48 = vld [vmem:[%s5235_s4 + $0x328] sm:$0xff]  ;;  %v1014_v12 = vld [vmem:[%s5235_s4 + $0x3b0] sm:$0xff] }
 0x885   :  { %v1182_v20 = vadd.f32 %v1181_v32, %v1179_v59  ;;  %v1220_v10 = vmul.f32 0.8333333, %v4714_v5  ;;  %v1194_v37 = vmul.f32 %v1193_v56, %v4587_v30  ;;  %v1196_v18 = vmul.f32 %v1195_v41, %v4645_v62  ;;  %v1010_v5 = vld [vmem:[%s5235_s4 + $0x390] sm:$0xff]  ;;  %v1011_v30 = vld [vmem:[%s5235_s4 + $0x398] sm:$0xff]  ;;  %v1017_v36 = vld [vmem:[%s5235_s4 + $0x3c8] sm:$0xff] }
 0x886   :  { %3330 = vmatpush3.bf16.msra.mxu1 %v3329_v9  ;;  %v1219_v23 = vmul.f32 %v1218_v6, %v4760_v16  ;;  %v3381_v62 = vpack.c.bf16 %v993_v8, %v992_v17  ;;  %v995_v16 = vld [vmem:[%s5235_s4 + $0x318] sm:$0xff]  ;;  %v998_v22 = vld [vmem:[%s5235_s4 + $0x330] sm:$0xff]  ;;  %v1000_v46 = vld [vmem:[%s5235_s4 + $0x340] sm:$0xff] }
 0x887   :  { %3332 = vmatprep.subr.bf16.mxu1 %v3331_v24  ;;  %3425 = vmatpush3.bf16.msra.mxu0 %v3424_v34  ;;  %v1221_v58 = vmul.f32 %v1220_v10, %v1182_v20  ;;  %v1197_v9 = vadd.f32 %v1196_v18, %v1194_v37  ;;  %v3383_v24 = vpack.c.bf16 %v1011_v30, %v1010_v5  ;;  %v1013_v34 = vld [vmem:[%s5235_s4 + $0x3a8] sm:$0xff]  ;;  %v1015_v13 = vld [vmem:[%s5235_s4 + $0x3b8] sm:$0xff]  ;;  %v1002_v3 = vld [vmem:[%s5235_s4 + $0x350] sm:$0xff] }
 0x888   :  { %3426 = vmatprep.subr.bf16.mxu0 %v5239_v54  ;;  %v3385_v35 = vpack.c.bf16 %v995_v16, %v994_v14  ;;  %v3387_v42 = vpack.c.bf16 %v1013_v34, %v1012_v25  ;;  %v999_v2 = vld [vmem:[%s5235_s4 + $0x338] sm:$0xff]  ;;  %v1001_v52 = vld [vmem:[%s5235_s4 + $0x348] sm:$0xff]  ;;  %v1004_v32 = vld [vmem:[%s5235_s4 + $0x360] sm:$0xff] }
 0x889   :  { %v1222_v50 = vadd.f32 %v1221_v58, %v1219_v23  ;;  %v3393_v40 = vpack.c.bf16 %v999_v2, %v998_v22  ;;  %v1019_v55 = vld [vmem:[%s5235_s4 + $0x3d8] sm:$0xff]  ;;  %v3397_v60 = vpack.c.bf16 %v1001_v52, %v1000_v46  ;;  %v1021_v21 = vld [vmem:[%s5235_s4 + $0x3e8] sm:$0xff]  ;;  %v1022_v7 = vld [vmem:[%s5235_s4 + $0x3f0] sm:$0xff] }
 0x88a   :  { %3334 = vmatpush3.bf16.msra.mxu1 %v3333_v31  ;;  %v3389_v31 = vpack.c.bf16 %v997_v48, %v996_v43  ;;  %v1003_v1 = vld [vmem:[%s5235_s4 + $0x358] sm:$0xff]  ;;  %v1645_v56 = vld [vmem:[#allocation4 + $0x188] sm:$0xff]  ;;  %v1596_v41 = vld [vmem:[#allocation4] sm:$0xff] }
 0x88b   :  { %3336 = vmatprep.subr.bf16.mxu1 %v3335_v49  ;;  %3428 = vmatpush3.bf16.msra.mxu0 %v3427_v44  ;;  %v3391_v49 = vpack.c.bf16 %v1015_v13, %v1014_v12  ;;  %v1016_v44 = vld [vmem:[%s5235_s4 + $0x3c0] sm:$0xff]  ;;  %v3401_v11 = vpack.c.bf16 %v1003_v1, %v1002_v3  ;;  %v1023_v47 = vld [vmem:[%s5235_s4 + $0x3f8] sm:$0xff]  ;;  %v1629_v18 = vld [vmem:[#allocation4 + $0x108] sm:$0xff] }
 0x88c   :  { %v3630_v33 = vpop.eup %3629  ;;  %3429 = vmatprep.subr.bf16.mxu0 %v5239_v54  ;;  %v3395_v28 = vpack.c.bf16 %v1017_v36, %v1016_v44  ;;  %v1007_v26 = vld [vmem:[%s5235_s4 + $0x378] sm:$0xff]  ;;  %v1628_v37 = vld [vmem:[#allocation4 + $0x100] sm:$0xff]  ;;  %v1646_v23 = vld [vmem:[#allocation4 + $0x190] sm:$0xff] }
 0x88d   :  { %v1229_v38 = vmul.f32 %v3630_v33, %v4504_v4  ;;  %v1009_v4 = vld [vmem:[%s5235_s4 + $0x388] sm:$0xff]  ;;  %v3469_v17 = vpack.c.bf16 %v1629_v18, %v1628_v37  ;;  %v1615_v8 = vld [vmem:[#allocation4 + $0x98] sm:$0xff]  ;;  %v1598_v30 = vld [vmem:[#allocation4 + $0x10] sm:$0xff] }
 0x88e   :  { %3338 = vmatpush3.bf16.msra.mxu1 %v3337_v53  ;;  %v3379_v63 = vpack.c.bf16 %v1009_v4, %v1008_v51  ;;  %v1018_v53 = vld [vmem:[%s5235_s4 + $0x3d0] sm:$0xff]  ;;  %v1005_v33 = vld [vmem:[%s5235_s4 + $0x368] sm:$0xff]  ;;  %v1644_v4 = vld [vmem:[#allocation4 + $0x180] sm:$0xff] }
 0x88f   :  { %3340 = vmatprep.subr.bf16.mxu1 %v3339_v61  ;;  %3431 = vmatpush3.bf16.msra.mxu0 %v3430_v15  ;;  %v3399_v61 = vpack.c.bf16 %v1019_v55, %v1018_v53  ;;  %v1020_v15 = vld [vmem:[%s5235_s4 + $0x3e0] sm:$0xff]  ;;  %v1613_v51 = vld [vmem:[#allocation4 + $0x88] sm:$0xff]  ;;  %v3467_v6 = vpack.c.bf16 %v1645_v56, %v1644_v4  ;;  %v1647_v58 = vld [vmem:[#allocation4 + $0x198] sm:$0xff] }
 0x890   :  { %3432 = vmatprep.subr.bf16.mxu0 %v5239_v54  ;;  %v3403_v59 = vpack.c.bf16 %v1021_v21, %v1020_v15  ;;  %v3471_v5 = vpack.c.bf16 %v1647_v58, %v1646_v23  ;;  %v1631_v14 = vld [vmem:[#allocation4 + $0x118] sm:$0xff]  ;;  %v1617_v25 = vld [vmem:[#allocation4 + $0xa8] sm:$0xff]  ;;  %v1648_v34 = vld [vmem:[#allocation4 + $0x1a0] sm:$0xff] }
 0x891   :  { %v1600_v48 = vld [vmem:[#allocation4 + $0x20] sm:$0xff]  ;;  %v1601_v12 = vld [vmem:[#allocation4 + $0x28] sm:$0xff]  ;;  %v1618_v22 = vld [vmem:[#allocation4 + $0xb0] sm:$0xff] }
 0x892   :  { %3342 = vmatpush3.bf16.msra.mxu1 %v3341_v27  ;;  %v3405_v27 = vpack.c.bf16 %v1005_v33, %v1004_v32  ;;  %v1632_v13 = vld [vmem:[#allocation4 + $0x120] sm:$0xff]  ;;  %v1619_v2 = vld [vmem:[#allocation4 + $0xb8] sm:$0xff]  ;;  %v1602_v46 = vld [vmem:[#allocation4 + $0x30] sm:$0xff] }
 0x893   :  { %3344 = vmatprep.subr.bf16.mxu1 %v3343_v39  ;;  %3434 = vmatpush3.bf16.msra.mxu0 %v3433_v29  ;;  %v1006_v39 = vld [vmem:[%s5235_s4 + $0x370] sm:$0xff]  ;;  %v1612_v29 = vld [vmem:[#allocation4 + $0x80] sm:$0xff]  ;;  %v3447_v36 = vpack.c.bf16 %v1619_v2, %v1618_v22  ;;  %v1603_v53 = vld [vmem:[#allocation4 + $0x38] sm:$0xff] }
 0x894   :  { %v3409_v45 = vpack.c.bf16 %v1007_v26, %v1006_v39  ;;  %v3435_v20 = vpack.c.bf16 %v1613_v51, %v1612_v29  ;;  %3468 = vmatprep.subr.bf16.mxu0 %v3467_v6  ;;  %v1634_v55 = vld [vmem:[#allocation4 + $0x130] sm:$0xff]  ;;  %v1620_v1 = vld [vmem:[#allocation4 + $0xc0] sm:$0xff]  ;;  %v1621_v15 = vld [vmem:[#allocation4 + $0xc8] sm:$0xff] }
 0x895   :  { %v1652_v21 = vld [vmem:[#allocation4 + $0x1c0] sm:$0xff]  ;;  %v1605_v33 = vld [vmem:[#allocation4 + $0x48] sm:$0xff]  ;;  %v1623_v26 = vld [vmem:[#allocation4 + $0xd8] sm:$0xff] }
 0x896   :  { %3346 = vmatpush3.bf16.msra.mxu1 %v3345_v57  ;;  %2670 = vmatmul.mubr.f32.vlgmr.msra.gmra.mrb[12].mxu0 %v1229_v38  ;;  %v3407_v38 = vpack.c.bf16 %v1023_v47, %v1022_v7  ;;  %v1597_v57 = vld [vmem:[#allocation4 + $0x8] sm:$0xff]  ;;  %v1604_v32 = vld [vmem:[#allocation4 + $0x40] sm:$0xff]  ;;  %v1655_v29 = vld [vmem:[#allocation4 + $0x1d8] sm:$0xff] }
 0x897   :  { %3380 = vmatprep.subr.bf16.mxu1 %v3379_v63  ;;  %v3437_v10 = vpack.c.bf16 %v1597_v57, %v1596_v41  ;;  %v1614_v63 = vld [vmem:[#allocation4 + $0x90] sm:$0xff]  ;;  %3470 = vmatpush3.bf16.msra.mxu0 %v3469_v17  ;;  %v1636_v47 = vld [vmem:[#allocation4 + $0x140] sm:$0xff]  ;;  %v3453_v39 = vpack.c.bf16 %v1605_v33, %v1604_v32  ;;  %v1607_v56 = vld [vmem:[#allocation4 + $0x58] sm:$0xff] }
 0x898   :  { %3472 = vmatprep.subr.bf16.mxu0 %v3471_v5  ;;  %v1638_v41 = vld [vmem:[#allocation4 + $0x150] sm:$0xff]  ;;  %v1639_v6 = vld [vmem:[#allocation4 + $0x158] sm:$0xff]  ;;  %v1625_v37 = vld [vmem:[#allocation4 + $0xe8] sm:$0xff] }
 0x899   :  { %1365 = vmatmul.mubr.f32.vlgmr.msra.gmra.mrb[10].mxu1 %v1197_v9  ;;  %v1630_v9 = vld [vmem:[#allocation4 + $0x110] sm:$0xff]  ;;  %v1656_v18 = vld [vmem:[#allocation4 + $0x1e0] sm:$0xff]  ;;  %v1677_v22 = vld [vmem:[#allocation4 + $0x288] sm:$0xff] }
 0x89a   :  { %3382 = vmatpush3.bf16.msra.mxu1 %v3381_v62  ;;  %1504 = vmatprep.mubr.f32.mxu1 %v1222_v50  ;;  %v1599_v62 = vld [vmem:[#allocation4 + $0x18] sm:$0xff]  ;;  %v3473_v16 = vpack.c.bf16 %v1631_v14, %v1630_v9  ;;  %v1616_v50 = vld [vmem:[#allocation4 + $0xa0] sm:$0xff]  ;;  %v1626_v9 = vld [vmem:[#allocation4 + $0xf0] sm:$0xff] }
 0x89b   :  { %3384 = vmatprep.subr.bf16.mxu1 %v3383_v24  ;;  %v3441_v24 = vpack.c.bf16 %v1599_v62, %v1598_v30  ;;  %v1608_v58 = vld [vmem:[#allocation4 + $0x60] sm:$0xff]  ;;  %v1641_v62 = vld [vmem:[#allocation4 + $0x168] sm:$0xff]  ;;  %v1658_v14 = vld [vmem:[#allocation4 + $0x1f0] sm:$0xff] }
 0x89c   :  { %3474 = vmatpush3.bf16.msra.mxu0 %v3473_v16  ;;  %v1640_v5 = vld [vmem:[#allocation4 + $0x160] sm:$0xff]  ;;  %v1659_v16 = vld [vmem:[#allocation4 + $0x1f8] sm:$0xff] }
 0x89d   :  { %v1708_v2 = vld [vmem:[#allocation4 + $0x380] sm:$0xff] }
 0x89e   :  { %3386 = vmatpush3.bf16.msra.mxu1 %v3385_v35  ;;  %v3443_v35 = vpack.c.bf16 %v1617_v25, %v1616_v50  ;;  %v3493_v25 = vpack.c.bf16 %v1641_v62, %v1640_v5  ;;  %v4938_v33 = vld [vmem:[#allocation4 + $0x200] sm:$0xff]  ;;  %v4986_v62 = vld [vmem:[#allocation4 + $0x2b8] sm:$0xff] }
 0x89f   :  { %3388 = vmatprep.subr.bf16.mxu1 %v3387_v42  ;;  %v1649_v42 = vld [vmem:[#allocation4 + $0x1a8] sm:$0xff] }
 0x8a0   :  { %v3475_v43 = vpack.c.bf16 %v1649_v42, %v1648_v34  ;;  %v1611_v42 = vld [vmem:[#allocation4 + $0x78] sm:$0xff] }
 0x8a2   :  { %3390 = vmatpush3.bf16.msra.mxu1 %v3389_v31  ;;  %3476 = vmatprep.subr.bf16.mxu0 %v3475_v43  ;;  %v3445_v31 = vpack.c.bf16 %v1601_v12, %v1600_v48  ;;  %v3495_v43 = vpack.c.bf16 %v1659_v16, %v1658_v14  ;;  %v1642_v48 = vld [vmem:[#allocation4 + $0x170] sm:$0xff]  ;;  %v1643_v12 = vld [vmem:[#allocation4 + $0x178] sm:$0xff] }
 0x8a3   :  { %3392 = vmatprep.subr.bf16.mxu1 %v3391_v49  ;;  %v1633_v49 = vld [vmem:[#allocation4 + $0x128] sm:$0xff] }
 0x8a4   :  { %v3477_v44 = vpack.c.bf16 %v1633_v49, %v1632_v13  ;;  %v1676_v49 = vld [vmem:[#allocation4 + $0x280] sm:$0xff] }
 0x8a6   :  { %3394 = vmatpush3.bf16.msra.mxu1 %v3393_v40  ;;  %v1650_v40 = vld [vmem:[#allocation4 + $0x1b0] sm:$0xff]  ;;  %3478 = vmatpush3.bf16.msra.mxu0 %v3477_v44  ;;  %v3499_v44 = vpack.c.bf16 %v1677_v22, %v1676_v49 }
 0x8a7   :  { %3396 = vmatprep.subr.bf16.mxu1 %v3395_v28  ;;  %v1651_v28 = vld [vmem:[#allocation4 + $0x1b8] sm:$0xff] }
 0x8a8   :  { %v3479_v52 = vpack.c.bf16 %v1651_v28, %v1650_v40 }
 0x8aa   :  { %3398 = vmatpush3.bf16.msra.mxu1 %v3397_v60  ;;  %v1635_v60 = vld [vmem:[#allocation4 + $0x138] sm:$0xff]  ;;  %3480 = vmatprep.subr.bf16.mxu0 %v3479_v52 }
 0x8ab   :  { %3400 = vmatprep.subr.bf16.mxu1 %v3399_v61  ;;  %v3449_v61 = vpack.c.bf16 %v1603_v53, %v1602_v46  ;;  %v3481_v3 = vpack.c.bf16 %v1635_v60, %v1634_v55 }
 0x8ad   :  { %3482 = vmatpush3.bf16.msra.mxu0 %v3481_v3 }
 0x8ae   :  { %3402 = vmatpush3.bf16.msra.mxu1 %v3401_v11  ;;  %v3451_v11 = vpack.c.bf16 %v1621_v15, %v1620_v1 }
 0x8af   :  { %3404 = vmatprep.subr.bf16.mxu1 %v3403_v59  ;;  %v1653_v59 = vld [vmem:[#allocation4 + $0x1c8] sm:$0xff] }
 0x8b0   :  { %v3483_v7 = vpack.c.bf16 %v1653_v59, %v1652_v21 }
 0x8b2   :  { %3406 = vmatpush3.bf16.msra.mxu1 %v3405_v27  ;;  %v1637_v27 = vld [vmem:[#allocation4 + $0x148] sm:$0xff]  ;;  %3484 = vmatprep.subr.bf16.mxu0 %v3483_v7 }
 0x8b3   :  { %3408 = vmatprep.subr.bf16.mxu1 %v3407_v38  ;;  %v1622_v38 = vld [vmem:[#allocation4 + $0xd0] sm:$0xff]  ;;  %v3485_v51 = vpack.c.bf16 %v1637_v27, %v1636_v47  ;;  %v4940_v7 = vld [vmem:[#allocation4 + $0x208] sm:$0xff]  ;;  %v4942_v47 = vld [vmem:[#allocation4 + $0x300] sm:$0xff] }
 0x8b4   :  { %v3455_v4 = vpack.c.bf16 %v1623_v26, %v1622_v38  ;;  %v4944_v27 = vld [vmem:[#allocation4 + $0x308] sm:$0xff]  ;;  %v4946_v38 = vld [vmem:[#allocation4 + $0x290] sm:$0xff] }
 0x8b5   :  { %3486 = vmatpush3.bf16.msra.mxu0 %v3485_v51  ;;  %v4954_v51 = vld [vmem:[#allocation4 + $0x210] sm:$0xff] }
 0x8b6   :  { %3410 = vmatpush3.bf16.msra.mxu1 %v3409_v45  ;;  %v1654_v45 = vld [vmem:[#allocation4 + $0x1d0] sm:$0xff] }
 0x8b7   :  { %3436 = vmatprep.subr.bf16.mxu1 %v3435_v20  ;;  %v1606_v20 = vld [vmem:[#allocation4 + $0x50] sm:$0xff]  ;;  %v3487_v57 = vpack.c.bf16 %v1655_v29, %v1654_v45  ;;  %v4952_v29 = vld [vmem:[#allocation4 + $0x398] sm:$0xff] }
 0x8b8   :  { %v3457_v17 = vpack.c.bf16 %v1607_v56, %v1606_v20  ;;  %v4950_v45 = vld [vmem:[#allocation4 + $0x390] sm:$0xff] }
 0x8b9   :  { %1505 = vmatmul.mubr.f32.vlgmr.msra.gmra.mrb[12].mxu1 %v4783_v19  ;;  %v3439_v19 = vpack.c.bf16 %v1615_v8, %v1614_v63  ;;  %v1657_v63 = vld [vmem:[#allocation4 + $0x1e8] sm:$0xff]  ;;  %v3489_v8 = vpack.c.bf16 %v1639_v6, %v1638_v41  ;;  %3488 = vmatprep.subr.bf16.mxu0 %v3487_v57  ;;  %v4958_v20 = vld [vmem:[#allocation4 + $0x310] sm:$0xff]  ;;  %v4960_v41 = vld [vmem:[#allocation4 + $0x318] sm:$0xff] }
 0x8ba   :  { %3438 = vmatpush3.bf16.msra.mxu1 %v3437_v10  ;;  %v1624_v10 = vld [vmem:[#allocation4 + $0xe0] sm:$0xff]  ;;  %v3491_v30 = vpack.c.bf16 %v1657_v63, %v1656_v18  ;;  %v4964_v6 = vld [vmem:[#allocation4 + $0x2a8] sm:$0xff] }
 0x8bb   :  { %3440 = vmatprep.subr.bf16.mxu1 %v3439_v19  ;;  %v3459_v23 = vpack.c.bf16 %v1625_v37, %v1624_v10  ;;  %v1609_v19 = vld [vmem:[#allocation4 + $0x68] sm:$0xff]  ;;  %3490 = vmatpush3.bf16.msra.mxu0 %v3489_v8  ;;  %v4962_v57 = vld [vmem:[#allocation4 + $0x2a0] sm:$0xff] }
 0x8bc   :  { %v3461_v50 = vpack.c.bf16 %v1609_v19, %v1608_v58  ;;  %3492 = vmatprep.subr.bf16.mxu0 %v3491_v30  ;;  %v4966_v10 = vld [vmem:[#allocation4 + $0x3a0] sm:$0xff]  ;;  %v4968_v37 = vld [vmem:[#allocation4 + $0x3a8] sm:$0xff]  ;;  %v3533_v19 = vpack.c.bf16 %v4944_v27, %v4942_v47  ;;  %v4984_v30 = vld [vmem:[#allocation4 + $0x2b0] sm:$0xff] }
 0x8bd   :  { %v4970_v18 = vld [vmem:[#allocation4 + $0x220] sm:$0xff] }
 0x8be   :  { %3442 = vmatpush3.bf16.msra.mxu1 %v3441_v24  ;;  %v1627_v24 = vld [vmem:[#allocation4 + $0xf8] sm:$0xff]  ;;  %v4974_v8 = vld [vmem:[#allocation4 + $0x320] sm:$0xff] }
 0x8bf   :  { %3444 = vmatprep.subr.bf16.mxu1 %v3443_v35  ;;  %v3463_v34 = vpack.c.bf16 %v1627_v24, %v1626_v9  ;;  %v1610_v35 = vld [vmem:[#allocation4 + $0x70] sm:$0xff]  ;;  %3494 = vmatpush3.bf16.msra.mxu0 %v3493_v25  ;;  %v3535_v24 = vpack.c.bf16 %v4952_v29, %v4950_v45  ;;  %v5245_v45 = vpack.c.bf16 %v4940_v7, %v4938_v33 }
 0x8c0   :  { %v3465_v13 = vpack.c.bf16 %v1611_v42, %v1610_v35  ;;  %3496 = vmatprep.subr.bf16.mxu0 %v3495_v43 }
 0x8c2   :  { %3446 = vmatpush3.bf16.msra.mxu1 %v3445_v31  ;;  %v3497_v31 = vpack.c.bf16 %v1643_v12, %v1642_v48 }
 0x8c3   :  { %3448 = vmatprep.subr.bf16.mxu1 %v3447_v36  ;;  %v1709_v36 = vld [vmem:[#allocation4 + $0x388] sm:$0xff] }
 0x8c4   :  { %3498 = vmatpush3.bf16.msra.mxu0 %v3497_v31  ;;  %v3531_v40 = vpack.c.bf16 %v1709_v36, %v1708_v2 }
 0x8c6   :  { %3450 = vmatpush3.bf16.msra.mxu1 %v3449_v61  ;;  %3532 = vmatprep.subr.bf16.mxu0 %v3531_v40 }
 0x8c7   :  { %3452 = vmatprep.subr.bf16.mxu1 %v3451_v11 }
 0x8ca   :  { %3454 = vmatpush3.bf16.msra.mxu1 %v3453_v39  ;;  %v4948_v39 = vld [vmem:[#allocation4 + $0x298] sm:$0xff] }
 0x8cb   :  { %3456 = vmatprep.subr.bf16.mxu1 %v3455_v4  ;;  %v4956_v4 = vld [vmem:[#allocation4 + $0x218] sm:$0xff]  ;;  %v5247_v7 = vpack.c.bf16 %v4948_v39, %v4946_v38  ;;  %v1717_v38 = vld [vmem:[#allocation4 + $0x3c8] sm:$0xff] }
 0x8ce   :  { %3458 = vmatpush3.bf16.msra.mxu1 %v3457_v17  ;;  %v4972_v17 = vld [vmem:[#allocation4 + $0x228] sm:$0xff] }
 0x8cf   :  { %3460 = vmatprep.subr.bf16.mxu1 %v3459_v23  ;;  %v4976_v23 = vld [vmem:[#allocation4 + $0x328] sm:$0xff] }
 0x8d2   :  { %3462 = vmatpush3.bf16.msra.mxu1 %v3461_v50 }
 0x8d3   :  { %3464 = vmatprep.subr.bf16.mxu1 %v3463_v34 }
 0x8d6   :  { %3466 = vmatpush3.bf16.msra.mxu1 %v3465_v13 }
 0x8d7   :  { %3500 = vmatprep.subr.bf16.mxu1 %v3499_v44 }
 0x949   :  { %v2425_v28 = vpop.f32.mrb[10].mxu0 }
 0x94a   :  { %v2426_v46 = vpop.f32.mrb[11].mxu0 }
 0x94b   :  { %v2427_v53 = vadd.f32 %v2426_v46, %v2425_v28 }
 0x94c   :  { %v2355_v52 = vpop.f32.mrb[8].mxu1 }
 0x94d   :  { %v2356_v55 = vpop.f32.mrb[9].mxu1 }
 0x94e   :  { %v2357_v60 = vadd.f32 %v2356_v55, %v2355_v52 }
 0x969   :  { %v1576_v61 = vpop.f32.mrb[12].mxu0 }
 0x96a   :  { %v2671_v3 = vpop.f32.mrb[13].mxu0 }
 0x96c   :  { %v2390_v1 = vpop.f32.mrb[10].mxu1 }
 0x96d   :  { %v2391_v15 = vpop.f32.mrb[11].mxu1 }
 0x96e   :  { %v2392_v21 = vadd.f32 %v2391_v15, %v2390_v1 }
 0x970   :  { %v1367_v11 = vadd.f32 %v2392_v21, %v2357_v60 }
 0x972   :  { %v1437_v59 = vadd.f32 %v2427_v53, %v1367_v11 }
 0x98c   :  { %v2460_v32 = vpop.f32.mrb[12].mxu1 }
 0x98d   :  { %v2461_v26 = vpop.f32.mrb[13].mxu1 }
 0x98e   :  { %v2462_v56 = vadd.f32 %v2461_v26, %v2460_v32 }
 0x990   :  { %v1507_v63 = vadd.f32 %v2462_v56, %v1437_v59 }
 0x992   :  { %v4988_v9 = vadd.f32 %v1576_v61, %v1507_v63 }
 0x994   :  { %vm1728_vm2 = vcmp.ge.f32.partialorder %v4988_v9, -1.8  ;;  %vm1729_vm3 = vcmp.lt.f32.partialorder %v4988_v9, -1.4  ;;  %vm1732_vm4 = vcmp.ge.f32.partialorder %v4988_v9, -1.4 }
 0x995   :  { %vm1730_vm5 = vmand %vm1728_vm2, %vm1729_vm3  ;;  %vm1733_vm6 = vcmp.lt.f32.partialorder %v4988_v9, -1.0  ;;  %vm1736_vm7 = vcmp.ge.f32.partialorder %v4988_v9, -1.0  ;;  %vm1737_vm8 = vcmp.lt.f32.partialorder %v4988_v9, -0.6  ;;  %vm1740_vm9 = vcmp.ge.f32.partialorder %v4988_v9, -0.6 }
 0x996   :  { %v1731_v43 = vsel %vm1730_vm5, 1.0, %v3666_v0  ;;  %vm1734_vm10 = vmand %vm1732_vm4, %vm1733_vm6  ;;  %vm1741_vm11 = vcmp.lt.f32.partialorder %v4988_v9, -0.2  ;;  %v1771_v48 = vsub.f32 -1.4, %v4988_v9  ;;  %v1778_v12 = vsub.f32 -1.0, %v4988_v9 }
 0x997   :  { %v1735_v13 = vsel %vm1734_vm10, 1.0, %v3666_v0  ;;  %vm1738_vm12 = vmand %vm1736_vm7, %vm1737_vm8  ;;  %v2312_v31 = vadd.f32 1.8, %v4988_v9  ;;  %v5020_v49 = vadd.f32 1.4, %v4988_v9  ;;  %v2314_v22 = vadd.f32 1.0, %v4988_v9 }
 0x998   :  { %v1739_v2 = vsel %vm1738_vm12, 1.0, %v3666_v0  ;;  %vm1742_vm13 = vmand %vm1740_vm9, %vm1741_vm11  ;;  %v1772_v44 = vmul.f32 2.5, %v1771_v48  ;;  %v1779_v36 = vmul.f32 2.5, %v1778_v12  ;;  %v5027_v40 = vsub.f32 -0.6, %v4988_v9 }
 0x999   :  { %v1743_v28 = vsel %vm1742_vm13, 1.0, %v3666_v0  ;;  %v1776_v46 = vmul.f32 2.5, %v2312_v31  ;;  %v1783_v52 = vmul.f32 2.5, %v5020_v49  ;;  %v1790_v53 = vmul.f32 2.5, %v2314_v22 }
 0x99a   :  { %v5031_v55 = vmul.f32 %v1772_v44, %v1731_v43  ;;  %v1780_v60 = vmul.f32 %v1779_v36, %v1735_v13  ;;  %v1786_v61 = vmul.f32 2.5, %v5027_v40  ;;  %v1792_v3 = vsub.f32 -0.2, %v4988_v9 }
 0x99b   :  { %v1777_v1 = vmul.f32 %v1776_v46, %v1731_v43  ;;  %v1784_v15 = vmul.f32 %v1783_v52, %v1735_v13  ;;  %v1791_v21 = vmul.f32 %v1790_v53, %v1739_v2  ;;  %v1843_v11 = vmul.f32 1.25, %v2312_v31 }
 0x99c   :  { %v1787_v59 = vmul.f32 %v1786_v61, %v1739_v2  ;;  %v1793_v32 = vmul.f32 2.5, %v1792_v3  ;;  %v1845_v26 = vmul.f32 1.25, %v5027_v40  ;;  %v1848_v56 = vmul.f32 1.25, %v5020_v49 }
 0x99d   :  { %v1781_v63 = vadd.f32 %v1780_v60, %v1777_v1  ;;  %v1850_v48 = vmul.f32 1.25, %v1792_v3  ;;  %v1888_v54 = vmul.f32 0.8333333, %v2312_v31  ;;  %v1890_v44 = vmul.f32 0.8333333, %v1792_v3 }
 0x99e   :  { %v1788_v42 = vadd.f32 %v1787_v59, %v1784_v15  ;;  %v1794_v36 = vmul.f32 %v1793_v32, %v1743_v28  ;;  %vm1744_vm15 = vcmp.ge.f32.partialorder %v4988_v9, -0.2  ;;  %vm1745_vm0 = vcmp.lt.f32.partialorder %v4988_v9, 0.2 }
 0x99f   :  { %v1844_v43 = vmul.f32 %v1843_v11, %v1781_v63  ;;  %vm1746_vm1 = vmand %vm1744_vm15, %vm1745_vm0  ;;  %vm1748_vm2 = vcmp.ge.f32.partialorder %v4988_v9, 0.2  ;;  %vm1749_vm3 = vcmp.lt.f32.partialorder %v4988_v9, 0.6  ;;  %v5042_v13 = vadd.f32 0.6, %v4988_v9 }
 0x9a0   :  { %v1795_v2 = vadd.f32 %v1794_v36, %v1791_v21  ;;  %v1846_v46 = vmul.f32 %v1845_v26, %v1788_v42  ;;  %v1849_v52 = vmul.f32 %v1848_v56, %v1788_v42  ;;  %v1747_v31 = vsel %vm1746_vm1, 1.0, %v3666_v0  ;;  %vm1750_vm4 = vmand %vm1748_vm2, %vm1749_vm3 }
 0x9a1   :  { %v5046_v53 = vsel %vm1750_vm4, 1.0, %v3666_v0  ;;  %v1797_v60 = vmul.f32 2.5, %v5042_v13  ;;  %v1799_v61 = vsub.f32 0.2, %v4988_v9  ;;  %v5051_v3 = vadd.f32 0.2, %v4988_v9 }
 0x9a2   :  { %v1847_v1 = vadd.f32 %v1846_v46, %v1844_v43  ;;  %v1851_v15 = vmul.f32 %v1850_v48, %v1795_v2  ;;  %v1806_v11 = vsub.f32 0.6, %v4988_v9  ;;  %v1853_v21 = vmul.f32 1.25, %v2314_v22 }
 0x9a3   :  { %v1798_v59 = vmul.f32 %v1797_v60, %v1743_v28  ;;  %v1800_v42 = vmul.f32 2.5, %v1799_v61  ;;  %v1804_v32 = vmul.f32 2.5, %v5051_v3  ;;  %v1855_v26 = vmul.f32 1.25, %v1799_v61 }
 0x9a4   :  { %v1852_v56 = vadd.f32 %v1851_v15, %v1849_v52  ;;  %v1889_v36 = vmul.f32 %v1888_v54, %v1847_v1  ;;  %v1807_v34 = vmul.f32 2.5, %v1806_v11  ;;  %v1854_v35 = vmul.f32 %v1853_v21, %v1795_v2 }
 0x9a5   :  { %v1801_v50 = vmul.f32 %v1800_v42, %v1747_v31  ;;  %v1805_v14 = vmul.f32 %v1804_v32, %v1747_v31  ;;  %v1858_v25 = vmul.f32 1.25, %v5042_v13  ;;  %v1860_v5 = vmul.f32 1.25, %v1806_v11 }
 0x9a6   :  { %v1891_v16 = vmul.f32 %v1890_v44, %v1852_v56  ;;  %v1808_v48 = vmul.f32 %v1807_v34, %v5046_v53  ;;  %v1898_v43 = vmul.f32 0.8333333, %v2314_v22  ;;  %v1900_v46 = vmul.f32 0.8333333, %v1806_v11 }
 0x9a7   :  { %v1802_v58 = vadd.f32 %v1801_v50, %v1798_v59  ;;  %vm1724_vm5 = vcmp.ge.f32.partialorder %v4988_v9, -2.2  ;;  %vm1725_vm6 = vcmp.lt.f32.partialorder %v4988_v9, -1.8  ;;  %v2311_v28 = vadd.f32 2.2, %v4988_v9 }
 0x9a8   :  { %v1892_v54 = vadd.f32 %v1891_v16, %v1889_v36  ;;  %v1809_v52 = vadd.f32 %v1808_v48, %v1805_v14  ;;  %vm1726_vm7 = vmand %vm1724_vm5, %vm1725_vm6  ;;  %v1840_v2 = vmul.f32 1.25, %v1778_v12  ;;  %v1885_v31 = vmul.f32 0.8333333, %v5027_v40 }
 0x9a9   :  { %v1856_v44 = vmul.f32 %v1855_v26, %v1802_v58  ;;  %v1859_v60 = vmul.f32 %v1858_v25, %v1802_v58  ;;  %v1727_v34 = vsel %vm1726_vm7, 1.0, %v3666_v0  ;;  %v1769_v22 = vmul.f32 2.5, %v2311_v28 }
 0x9aa   :  { %1994 = vmatprep.mubr.f32.mxu1 %v1892_v54  ;;  %v1861_v50 = vmul.f32 %v1860_v5, %v1809_v52  ;;  %v1838_v15 = vmul.f32 1.25, %v2311_v28  ;;  %v1841_v11 = vmul.f32 %v1840_v2, %v1781_v63  ;;  %v1883_v21 = vmul.f32 0.8333333, %v2311_v28 }
 0x9ab   :  { %v1857_v59 = vadd.f32 %v1856_v44, %v1854_v35  ;;  %v1770_v42 = vmul.f32 %v1769_v22, %v1727_v34  ;;  %v1886_v16 = vmul.f32 %v1885_v31, %v1847_v1  ;;  %v1893_v14 = vmul.f32 0.8333333, %v5020_v49  ;;  %v5074_v49 = vld [vmem:[#allocation4 + $0x3b0] sm:$0xff] }
 0x9ac   :  { %v5065_v32 = vadd.f32 %v1861_v50, %v1859_v60  ;;  %v1895_v12 = vmul.f32 0.8333333, %v1799_v61  ;;  %vm1752_vm8 = vcmp.ge.f32.partialorder %v4988_v9, 0.6  ;;  %vm1753_vm9 = vcmp.lt.f32.partialorder %v4988_v9, 1.0 }
 0x9ad   :  { %v1899_v58 = vmul.f32 %v1898_v43, %v1857_v59  ;;  %v1774_v25 = vadd.f32 %v5031_v55, %v1770_v42  ;;  %v1894_v40 = vmul.f32 %v1893_v14, %v1852_v56  ;;  %vm1754_vm10 = vmand %vm1752_vm8, %vm1753_vm9  ;;  %vm1756_vm11 = vcmp.ge.f32.partialorder %v4988_v9, 1.0  ;;  %v5085_v56 = vld [vmem:[#allocation4 + $0x3b8] sm:$0xff] }
 0x9ae   :  { %v1901_v5 = vmul.f32 %v1900_v46, %v5065_v32  ;;  %v1896_v35 = vmul.f32 %v1895_v12, %v1857_v59  ;;  %v1755_v63 = vsel %vm1754_vm10, 1.0, %v3666_v0  ;;  %vm1757_vm12 = vcmp.lt.f32.partialorder %v4988_v9, 1.4 }
 0x9af   :  { %v1839_v61 = vmul.f32 %v1838_v15, %v1774_v25  ;;  %vm1758_vm13 = vmand %vm1756_vm11, %vm1757_vm12  ;;  %v5077_v1 = vadd.f32 -0.2, %v4988_v9  ;;  %v5080_v55 = vsub.f32 1.0, %v4988_v9  ;;  %v5083_v26 = vadd.f32 -0.6, %v4988_v9 }
 0x9b0   :  { %v1902_v36 = vadd.f32 %v1901_v5, %v1899_v58  ;;  %v1897_v48 = vadd.f32 %v1896_v35, %v1894_v40  ;;  %v1759_v43 = vsel %vm1758_vm13, 1.0, %v3666_v0  ;;  %v1820_v46 = vsub.f32 1.4, %v4988_v9 }
 0x9b1   :  { %v1842_v28 = vadd.f32 %v1841_v11, %v1839_v61  ;;  %v1811_v54 = vmul.f32 2.5, %v5077_v1  ;;  %v1814_v2 = vmul.f32 2.5, %v5080_v55  ;;  %v1818_v31 = vmul.f32 2.5, %v5083_v26 }
 0x9b2   :  { %2064 = vmatprep.mubr.f32.mxu0 %v1902_v36  ;;  %v1821_v44 = vmul.f32 2.5, %v1820_v46  ;;  %v1863_v60 = vmul.f32 1.25, %v5051_v3  ;;  %v1865_v34 = vmul.f32 1.25, %v5080_v55  ;;  %v3543_v22 = vpack.c.bf16 %v5085_v56, %v5074_v49 }
 0x9b3   :  { %v1884_v50 = vmul.f32 %v1883_v21, %v1842_v28  ;;  %2065 = vmatmul.mubr.f32.vlgmr.msra.gmra.mrb[14].mxu0 %v1897_v48  ;;  %v1812_v15 = vmul.f32 %v1811_v54, %v5046_v53  ;;  %v1815_v11 = vmul.f32 %v1814_v2, %v1755_v63  ;;  %v1819_v59 = vmul.f32 %v1818_v31, %v1755_v63  ;;  %v1698_v48 = vld [vmem:[#allocation4 + $0x330] sm:$0xff]  ;;  %v1699_v28 = vld [vmem:[#allocation4 + $0x338] sm:$0xff] }
 0x9b4   :  { %3534 = vmatpush3.bf16.msra.mxu0 %v3533_v19  ;;  %v1822_v42 = vmul.f32 %v1821_v44, %v1759_v43  ;;  %v1864_v14 = vmul.f32 %v1863_v60, %v1809_v52  ;;  %v1868_v12 = vmul.f32 1.25, %v5077_v1  ;;  %v1870_v58 = vmul.f32 1.25, %v1820_v46 }
 0x9b5   :  { %v1887_v25 = vadd.f32 %v1886_v16, %v1884_v50  ;;  %v1816_v40 = vadd.f32 %v1815_v11, %v1812_v15  ;;  %v1908_v5 = vmul.f32 0.8333333, %v5051_v3  ;;  %vm1760_vm15 = vcmp.ge.f32.partialorder %v4988_v9, 1.4  ;;  %3536 = vmatprep.subr.bf16.mxu0 %v3535_v24  ;;  %v1716_v50 = vld [vmem:[#allocation4 + $0x3c0] sm:$0xff] }
 0x9b6   :  { %v1823_v53 = vadd.f32 %v1822_v42, %v1819_v59  ;;  %vm1761_vm0 = vcmp.lt.f32.partialorder %v4988_v9, 1.8  ;;  %vm1764_vm1 = vcmp.ge.f32.partialorder %v4988_v9, 1.8  ;;  %vm1765_vm2 = vcmp.lt.f32.partialorder %v4988_v9, 2.2 }
 0x9b7   :  { %1995 = vmatmul.mubr.f32.vlgmr.msra.gmra.mrb[14].mxu1 %v1887_v25  ;;  %v1866_v47 = vmul.f32 %v1865_v34, %v1816_v40  ;;  %v1869_v27 = vmul.f32 %v1868_v12, %v1816_v40  ;;  %vm1762_vm3 = vmand %vm1760_vm15, %vm1761_vm0  ;;  %v2319_v19 = vadd.f32 -1.0, %v4988_v9  ;;  %v5111_v3 = vsub.f32 1.8, %v4988_v9  ;;  %v1667_v25 = vld [vmem:[#allocation4 + $0x238] sm:$0xff]  ;;  %v1684_v40 = vld [vmem:[#allocation4 + $0x2c0] sm:$0xff] }
 0x9b8   :  { %3502 = vmatpush3.bf16.msra.mxu1 %v5245_v45  ;;  %v1871_v29 = vmul.f32 %v1870_v58, %v1823_v53  ;;  %v1763_v24 = vsel %vm1762_vm3, 1.0, %v3666_v0  ;;  %vm1766_vm4 = vmand %vm1764_vm1, %vm1765_vm2  ;;  %v2320_v52 = vadd.f32 -1.4, %v4988_v9  ;;  %v1834_v21 = vsub.f32 2.2, %v4988_v9  ;;  %v1666_v58 = vld [vmem:[#allocation4 + $0x230] sm:$0xff] }
 0x9b9   :  { %v5246_v16 = vpack.c.bf16 %v4960_v41, %v4958_v20  ;;  %v5122_v35 = vadd.f32 %v1866_v47, %v1864_v14  ;;  %v1767_v63 = vsel %vm1766_vm4, 1.0, %v3666_v0  ;;  %v1825_v61 = vmul.f32 2.5, %v2319_v19  ;;  %3504 = vmatprep.subr.bf16.mxu1 %v5247_v7  ;;  %v1718_v45 = vld [vmem:[#allocation4 + $0x3d0] sm:$0xff] }
 0x9ba   :  { %v1828_v33 = vmul.f32 2.5, %v5111_v3  ;;  %v5248_v36 = vpack.c.bf16 %v4968_v37, %v4966_v10  ;;  %v5132_v54 = vadd.f32 %v1871_v29, %v1869_v27  ;;  %v1910_v20 = vmul.f32 0.8333333, %v1820_v46  ;;  %v1700_v27 = vld [vmem:[#allocation4 + $0x340] sm:$0xff]  ;;  %v1719_v29 = vld [vmem:[#allocation4 + $0x3d8] sm:$0xff] }
 0x9bb   :  { %3538 = vmatpush3.bf16.msra.mxu0 %v5246_v16  ;;  %v1832_v41 = vmul.f32 2.5, %v2320_v52  ;;  %v1835_v2 = vmul.f32 2.5, %v1834_v21  ;;  %v1909_v31 = vmul.f32 %v1908_v5, %v5122_v35  ;;  %v1826_v44 = vmul.f32 %v1825_v61, %v1759_v43  ;;  %v1668_v16 = vld [vmem:[#allocation4 + $0x240] sm:$0xff] }
 0x9bc   :  { %3540 = vmatprep.subr.bf16.mxu0 %v5248_v36  ;;  %v1829_v60 = vmul.f32 %v1828_v33, %v1763_v24  ;;  %v1873_v34 = vmul.f32 1.25, %v5083_v26  ;;  %v1911_v39 = vmul.f32 %v1910_v20, %v5132_v54  ;;  %v5249_v37 = vpack.c.bf16 %v4956_v4, %v4954_v51  ;;  %v1686_v33 = vld [vmem:[#allocation4 + $0x2d0] sm:$0xff] }
 0x9bd   :  { %v1833_v15 = vmul.f32 %v1832_v41, %v1763_v24  ;;  %v1836_v10 = vmul.f32 %v1835_v2, %v1767_v63  ;;  %v3545_v11 = vpack.c.bf16 %v1699_v28, %v1698_v48  ;;  %v1875_v42 = vmul.f32 1.25, %v5111_v3  ;;  %v1669_v63 = vld [vmem:[#allocation4 + $0x248] sm:$0xff]  ;;  %v1702_v48 = vld [vmem:[#allocation4 + $0x350] sm:$0xff]  ;;  %v1703_v28 = vld [vmem:[#allocation4 + $0x358] sm:$0xff] }
 0x9be   :  { %3506 = vmatpush3.bf16.msra.mxu1 %v5249_v37  ;;  %v1830_v46 = vadd.f32 %v1829_v60, %v1826_v44  ;;  %v1874_v59 = vmul.f32 %v1873_v34, %v1823_v53  ;;  %v1878_v14 = vmul.f32 1.25, %v2319_v19  ;;  %v5250_v43 = vpack.c.bf16 %v4964_v6, %v4962_v57  ;;  %v1685_v53 = vld [vmem:[#allocation4 + $0x2c8] sm:$0xff]  ;;  %v1671_v44 = vld [vmem:[#allocation4 + $0x258] sm:$0xff]  ;;  %v1688_v34 = vld [vmem:[#allocation4 + $0x2e0] sm:$0xff] }
 0x9bf   :  { %v5251_v12 = vpack.c.bf16 %v4976_v23, %v4974_v8  ;;  %v1912_v5 = vadd.f32 %v1911_v39, %v1909_v31  ;;  %v1837_v51 = vadd.f32 %v1836_v10, %v1833_v15  ;;  %v1880_v4 = vmul.f32 1.25, %v1834_v21  ;;  %v1701_v19 = vld [vmem:[#allocation4 + $0x348] sm:$0xff]  ;;  %v1670_v31 = vld [vmem:[#allocation4 + $0x250] sm:$0xff]  ;;  %v1704_v39 = vld [vmem:[#allocation4 + $0x360] sm:$0xff] }
 0x9c0   :  { %3508 = vmatprep.subr.bf16.mxu1 %v5250_v43  ;;  %v3547_v47 = vpack.c.bf16 %v1717_v38, %v1716_v50  ;;  %v1876_v57 = vmul.f32 %v1875_v42, %v1830_v46  ;;  %v1879_v6 = vmul.f32 %v1878_v14, %v1830_v46  ;;  %v5252_v23 = vpack.c.bf16 %v4972_v17, %v4970_v18  ;;  %v1687_v18 = vld [vmem:[#allocation4 + $0x2d8] sm:$0xff]  ;;  %v1721_v41 = vld [vmem:[#allocation4 + $0x3e8] sm:$0xff]  ;;  %v1722_v10 = vld [vmem:[#allocation4 + $0x3f0] sm:$0xff] }
 0x9c1   :  { %3542 = vmatpush3.bf16.msra.mxu0 %v5251_v12  ;;  %2134 = vmatprep.mubr.f32.mxu1 %v1912_v5  ;;  %v1881_v8 = vmul.f32 %v1880_v4, %v1837_v51  ;;  %v3513_v24 = vpack.c.bf16 %v1667_v25, %v1666_v58  ;;  %v1918_v49 = vmul.f32 0.8333333, %v5083_v26  ;;  %v5253_v56 = vpack.c.bf16 %v4986_v62, %v4984_v30  ;;  %v1720_v26 = vld [vmem:[#allocation4 + $0x3e0] sm:$0xff]  ;;  %v1689_v50 = vld [vmem:[#allocation4 + $0x2e8] sm:$0xff]  ;;  %v1723_v37 = vld [vmem:[#allocation4 + $0x3f8] sm:$0xff] }
 0x9c2   :  { %3544 = vmatprep.subr.bf16.mxu0 %v3543_v22  ;;  %3510 = vmatpush3.bf16.msra.mxu1 %v5252_v23  ;;  %v5153_v52 = vadd.f32 %v1876_v57, %v1874_v59  ;;  %v3515_v22 = vpack.c.bf16 %v1685_v53, %v1684_v40  ;;  %v3549_v61 = vpack.c.bf16 %v1701_v19, %v1700_v27  ;;  %v1920_v36 = vmul.f32 0.8333333, %v1834_v21  ;;  %v1705_v15 = vld [vmem:[#allocation4 + $0x368] sm:$0xff]  ;;  %v1672_v59 = vld [vmem:[#allocation4 + $0x260] sm:$0xff]  ;;  %v1690_v43 = vld [vmem:[#allocation4 + $0x2f0] sm:$0xff] }
 0x9c3   :  { %3512 = vmatprep.subr.bf16.mxu1 %v5253_v56  ;;  %v1882_v7 = vadd.f32 %v1881_v8, %v1879_v6  ;;  %v3551_v17 = vpack.c.bf16 %v1719_v29, %v1718_v45  ;;  %v3517_v30 = vpack.c.bf16 %v1669_v63, %v1668_v16  ;;  %v3519_v62 = vpack.c.bf16 %v1687_v18, %v1686_v33  ;;  %v1673_v42 = vld [vmem:[#allocation4 + $0x268] sm:$0xff]  ;;  %v1691_v12 = vld [vmem:[#allocation4 + $0x2f8] sm:$0xff]  ;;  %v1706_v25 = vld [vmem:[#allocation4 + $0x370] sm:$0xff] }
 0x9c4   :  { %v1919_v20 = vmul.f32 %v1918_v49, %v5153_v52  ;;  %v3553_v60 = vpack.c.bf16 %v1703_v28, %v1702_v48  ;;  %v3555_v38 = vpack.c.bf16 %v1721_v41, %v1720_v26  ;;  %v3523_v46 = vpack.c.bf16 %v1689_v50, %v1688_v34  ;;  %v1707_v40 = vld [vmem:[#allocation4 + $0x378] sm:$0xff]  ;;  %v1580_v23 = vld [vmem:[%s5236_s5] sm:$0xff]  ;;  %v1585_v16 = vld [vmem:[%s5236_s5 + $0x28] sm:$0xff] }
 0x9c5   :  { %3546 = vmatpush3.bf16.msra.mxu0 %v3545_v11  ;;  %v1921_v2 = vmul.f32 %v1920_v36, %v1882_v7  ;;  %v3521_v11 = vpack.c.bf16 %v1671_v44, %v1670_v31  ;;  %v3557_v14 = vpack.c.bf16 %v1705_v15, %v1704_v39  ;;  %v3559_v58 = vpack.c.bf16 %v1723_v37, %v1722_v10  ;;  %v1675_v27 = vld [vmem:[#allocation4 + $0x278] sm:$0xff]  ;;  %v1588_v36 = vld [vmem:[%s5236_s5 + $0x40] sm:$0xff]  ;;  %v1589_v18 = vld [vmem:[%s5236_s5 + $0x48] sm:$0xff] }
 0x9c6   :  { %3548 = vmatprep.subr.bf16.mxu0 %v3547_v47  ;;  %3514 = vmatpush3.bf16.msra.mxu1 %v3513_v24  ;;  %v3525_v5 = vpack.c.bf16 %v1673_v42, %v1672_v59  ;;  %v1913_v51 = vmul.f32 0.8333333, %v5077_v1  ;;  %v1915_v4 = vmul.f32 0.8333333, %v5111_v3  ;;  %v3527_v53 = vpack.c.bf16 %v1691_v12, %v1690_v43  ;;  %v1674_v47 = vld [vmem:[#allocation4 + $0x270] sm:$0xff]  ;;  %v1592_v41 = vld [vmem:[%s5236_s5 + $0x60] sm:$0xff] }
 0x9c7   :  { %3516 = vmatprep.subr.bf16.mxu1 %v3515_v22  ;;  %v1922_v21 = vadd.f32 %v1921_v2, %v1919_v20  ;;  %v3561_v19 = vpack.c.bf16 %v1707_v40, %v1706_v25  ;;  %v1903_v45 = vmul.f32 0.8333333, %v5042_v13  ;;  %v1905_v29 = vmul.f32 0.8333333, %v5080_v55  ;;  %v1584_v22 = vld [vmem:[%s5236_s5 + $0x20] sm:$0xff]  ;;  %v1590_v28 = vld [vmem:[%s5236_s5 + $0x50] sm:$0xff] }
 0x9c8   :  { %v1914_v57 = vmul.f32 %v1913_v51, %v5132_v54  ;;  %v1916_v6 = vmul.f32 %v1915_v4, %v5153_v52  ;;  %v3529_v8 = vpack.c.bf16 %v1675_v27, %v1674_v47  ;;  %v1581_v54 = vld [vmem:[%s5236_s5 + $0x8] sm:$0xff]  ;;  %v2321_v13 = vmul.f32 -1.442695, %v4988_v9  ;;  %v1591_v20 = vld [vmem:[%s5236_s5 + $0x58] sm:$0xff] }
 0x9c9   :  { %3550 = vmatpush3.bf16.msra.mxu0 %v3549_v61  ;;  %2204 = vmatprep.mubr.f32.mxu0 %v1922_v21  ;;  %v1904_v1 = vmul.f32 %v1903_v45, %v5065_v32  ;;  %v1906_v3 = vmul.f32 %v1905_v29, %v5122_v35  ;;  %v3564_v55 = vpack.c.bf16 %v1581_v54, %v1580_v23  ;;  %v5254_v49 = vmov 0.0|0.0   ;;  %v1582_v32 = vld [vmem:[%s5236_s5 + $0x10] sm:$0xff]  ;;  %v1583_v35 = vld [vmem:[%s5236_s5 + $0x18] sm:$0xff]  ;;  %v1593_v2 = vld [vmem:[%s5236_s5 + $0x68] sm:$0xff] }
 0x9ca   :  { %3552 = vmatprep.subr.bf16.mxu0 %v3551_v17  ;;  %3518 = vmatpush3.bf16.msra.mxu1 %v3517_v30  ;;  %v1917_v24 = vadd.f32 %v1916_v6, %v1914_v57  ;;  %3631 = vpow2.f32 %v2321_v13  ;;  %v3567_v56 = vpack.c.bf16 %v1583_v35, %v1582_v32  ;;  %v3570_v63 = vpack.c.bf16 %v1585_v16, %v1584_v22  ;;  %v1586_v61 = vld [vmem:[%s5236_s5 + $0x30] sm:$0xff]  ;;  %v1595_v31 = vld [vmem:[%s5236_s5 + $0x78] sm:$0xff] }
 0x9cb   :  { %3520 = vmatprep.subr.bf16.mxu1 %v3519_v62  ;;  %v1907_v52 = vadd.f32 %v1906_v3, %v1904_v1  ;;  %v3576_v17 = vpack.c.bf16 %v1589_v18, %v1588_v36  ;;  %v3579_v26 = vpack.c.bf16 %v1591_v20, %v1590_v28  ;;  %v3582_v30 = vpack.c.bf16 %v1593_v2, %v1592_v41  ;;  %v1594_v62 = vld [vmem:[%s5236_s5 + $0x70] sm:$0xff] }
 0x9cc   :  { %v3585_v44 = vpack.c.bf16 %v1595_v31, %v1594_v62 }
 0x9cd   :  { %3554 = vmatpush3.bf16.msra.mxu0 %v3553_v60 }
 0x9ce   :  { %3556 = vmatprep.subr.bf16.mxu0 %v3555_v38  ;;  %3522 = vmatpush3.bf16.msra.mxu1 %v3521_v11 }
 0x9cf   :  { %3524 = vmatprep.subr.bf16.mxu1 %v3523_v46 }
 0x9d1   :  { %3558 = vmatpush3.bf16.msra.mxu0 %v3557_v14 }
 0x9d2   :  { %3560 = vmatprep.subr.bf16.mxu0 %v3559_v58  ;;  %3526 = vmatpush3.bf16.msra.mxu1 %v3525_v5 }
 0x9d3   :  { %3528 = vmatprep.subr.bf16.mxu1 %v3527_v53 }
 0x9d4   :  { %v3632_v7 = vpop.eup %3631 }
 0x9d5   :  { %3562 = vmatpush3.bf16.msra.mxu0 %v3561_v19  ;;  %v1926_v48 = vadd.f32 1.0, %v3632_v7 }
 0x9d6   :  { %3530 = vmatpush3.bf16.msra.mxu1 %v3529_v8 }
 0x9d7   :  { %3563 = vmatprep.subr.bf16.mxu1 %v5254_v49  ;;  %3633 = vrcp.f32 %v1926_v48 }
 0x9d8   :  { %2205 = vmatmul.mubr.f32.vlgmr.msra.gmra.mrb[16].mxu0 %v1917_v24 }
 0x9d9   :  { %2135 = vmatmul.mubr.f32.vlgmr.msra.gmra.mrb[16].mxu1 %v1907_v52 }
 0x9da   :  { %3565 = vmatpush3.bf16.msra.mxu1 %v3564_v55  ;;  %2704 = vmatprep.mubr.msk.f32.mxu1 %vm3668_vm14, %v3666_v0  ;;  %v1587_v0 = vld [vmem:[%s5236_s5 + $0x38] sm:$0xff] }
 0x9db   :  { %3566 = vmatprep.subr.bf16.mxu1 %v5254_v49  ;;  %v3573_v33 = vpack.c.bf16 %v1587_v0, %v1586_v61 }
 0x9de   :  { %3568 = vmatpush3.bf16.msra.mxu1 %v3567_v56 }
 0x9df   :  { %3569 = vmatprep.subr.bf16.mxu1 %v5254_v49 }
 0x9e1   :  { %v3634_v60 = vpop.eup %3633 }
 0x9e2   :  { %3571 = vmatpush3.bf16.msra.mxu1 %v3570_v63  ;;  %v1929_v34 = vmul.f32 %v3634_v60, %v4988_v9 }
 0x9e3   :  { %3572 = vmatprep.subr.bf16.mxu1 %v5254_v49 }
 0x9e6   :  { %3574 = vmatpush3.bf16.msra.mxu1 %v3573_v33 }
 0x9e7   :  { %3575 = vmatprep.subr.bf16.mxu1 %v5254_v49 }
 0x9ea   :  { %3577 = vmatpush3.bf16.msra.mxu1 %v3576_v17 }
 0x9eb   :  { %3578 = vmatprep.subr.bf16.mxu1 %v5254_v49 }
 0x9ee   :  { %3580 = vmatpush3.bf16.msra.mxu1 %v3579_v26 }
 0x9ef   :  { %3581 = vmatprep.subr.bf16.mxu1 %v5254_v49 }
 0x9f2   :  { %3583 = vmatpush3.bf16.msra.mxu1 %v3582_v30 }
 0x9f3   :  { %3584 = vmatprep.subr.bf16.mxu1 %v5254_v49 }
 0x9f6   :  { %3586 = vmatpush3.bf16.msra.mxu1 %v3585_v44 }
 0x9f9   :  { %2705 = vmatmul.mubr.f32.vlgmr.msra.gmra.mrb[18].mxu1 %v1929_v34 }
 0xa86   :  { %v2547_v21 = vpop.f32.mrb[14].mxu0 }
 0xa87   :  { %v2548_v50 = vpop.f32.mrb[15].mxu0 }
 0xa88   :  { %v2549_v38 = vadd.f32 %v2548_v50, %v2547_v21 }
 0xa8a   :  { %v2512_v39 = vpop.f32.mrb[14].mxu1 }
 0xa8b   :  { %v2513_v15 = vpop.f32.mrb[15].mxu1 }
 0xa8c   :  { %v2514_v10 = vadd.f32 %v2513_v15, %v2512_v39 }
 0xa8e   :  { %v2067_v37 = vadd.f32 %v2549_v38, %v2514_v10 }
 0xaab   :  { %v2617_v11 = vpop.f32.mrb[16].mxu0 }
 0xaac   :  { %v2618_v46 = vpop.f32.mrb[17].mxu0  ;;  %v2582_v42 = vpop.f32.mrb[16].mxu1 }
 0xaad   :  { %v2619_v59 = vadd.f32 %v2618_v46, %v2617_v11  ;;  %v2583_v14 = vpop.f32.mrb[17].mxu1 }
 0xaae   :  { %v2584_v43 = vadd.f32 %v2583_v14, %v2582_v42 }
 0xab0   :  { %v2137_v12 = vadd.f32 %v2584_v43, %v2067_v37 }
 0xab2   :  { %v2207_v58 = vadd.f32 %v2619_v59, %v2137_v12 }
 0xacc   :  { %v2276_v25 = vpop.f32.mrb[18].mxu1 }
 0xacd   :  { %v2277_v40 = vadd.f32 %v2276_v25, %v2207_v58  ;;  %v2706_v5 = vpop.f32.mrb[19].mxu1 }
 0xacf   :  { %v2322_v9 = vmul.f32 -1.442695, %v2277_v40 }
 0xad1   :  { %3635 = vpow2.f32 %v2322_v9 }
 0xadb   :  { %v3636_v51 = vpop.eup %3635 }
 0xadc   :  { %v2283_v4 = vadd.f32 1.0, %v3636_v51 }
 0xade   :  { %3637 = vrcp.f32 %v2283_v4 }
 0xae8   :  { %v3638_v53 = vpop.eup %3637 }
 0xae9   :  { %2286 = vst [vmem:[%s5238_s7] sm:$0xff] %v3638_v53 }
 0xaea   :  { %2291 = vsyncpa [#allocation5], 1 }

</bundles_post_ra>
